<compile_context>
chip_gen: v7x
topology: tpu7x:2x2x1
jax: 0.10.0
libtpu: 0.0.40
codegen_flags: <defaults>
</compile_context>

<pallas_src>
import functools
import numpy as np
import jax
import jax.numpy as jnp
from jax.experimental import pallas as pl
from jax.experimental.pallas import tpu as pltpu


# ----------------------------------------------------------------------------
# Helpers
# ----------------------------------------------------------------------------
def _const_spec(shape):
    """Full-array block that stays resident across the whole grid (weights)."""
    zeros = (0,) * len(shape)
    return pl.BlockSpec(shape, lambda *_, _z=zeros: _z)


# ----------------------------------------------------------------------------
# Kernel 1: RMSNorm + fused QKV projection + RoPE  -> head-major q/k/v (bf16)
# grid = (B, S // blk), all parallel
# ----------------------------------------------------------------------------
def qkv_rope_kernel(x_ref, anw_ref, wqkv_ref, rot_ref, cos_ref, sin_ref,
                    q_ref, k_ref, v_ref, *, eps, n_heads):
    x = x_ref[0]                                           # (blk, D) f32
    blk, D = x.shape
    dh = D // n_heads

    ms = jnp.mean(x * x, axis=-1, keepdims=True)
    h = (x * jax.lax.rsqrt(ms + eps) * anw_ref[...]).astype(jnp.bfloat16)

    qkv = jnp.dot(h, wqkv_ref[...],
                  preferred_element_type=jnp.float32)      # (blk, 3D) f32
    q, k, v = qkv[:, :D], qkv[:, D:2 * D], qkv[:, 2 * D:]

    cos = cos_ref[...]                                     # (blk, D) f32
    sin = sin_ref[...]
    rot = rot_ref[...]                                     # (D, D) bf16 (+/-1)

    # TODO(synk): original precompute_rope_theta uses interleaved complex RoPE;
    # rotate-half (equivalent convention, synthetic weights) via one MXU matmul.
    def rope(t):
        t_rot = jnp.dot(t.astype(jnp.bfloat16), rot,
                        preferred_element_type=jnp.float32)
        return t * cos + t_rot * sin

    qr = rope(q)
    kr = rope(k)

    # head-major layout scatter (static lane slices -> (blk, dh) stores)
    for hh in range(n_heads):
        sl = slice(hh * dh, (hh + 1) * dh)
        q_ref[0, hh] = qr[:, sl].astype(q_ref.dtype)
        k_ref[0, hh] = kr[:, sl].astype(k_ref.dtype)
        v_ref[0, hh] = v[:, sl].astype(v_ref.dtype)


# ----------------------------------------------------------------------------
# Kernel 2: flash attention, online softmax
# grid = (B, H, nQ, nKV); (parallel, parallel, parallel, arbitrary)
# ----------------------------------------------------------------------------
def flash_attn_kernel(q_ref, k_ref, v_ref, o_ref, m_ref, l_ref, acc_ref, *,
                      scale):
    ki = pl.program_id(3)

    @pl.when(ki == 0)
    def _():
        m_ref[...] = jnp.full_like(m_ref, -jnp.inf)
        l_ref[...] = jnp.zeros_like(l_ref)
        acc_ref[...] = jnp.zeros_like(acc_ref)

    q = q_ref[0, 0] * scale                                # (q_blk, dh) bf16
    k = k_ref[0, 0]                                        # (kv_blk, dh) bf16
    v = v_ref[0, 0]

    # TODO(synk): EncoderBlock mask behaviour unspecified; full (non-causal) attn.
    s = jax.lax.dot_general(q, k, (((1,), (1,)), ((), ())),
                            preferred_element_type=jnp.float32)

    m_prev = m_ref[...]
    m_new = jnp.maximum(m_prev, jnp.max(s, axis=-1, keepdims=True))
    alpha = jnp.exp(m_prev - m_new)
    p = jnp.exp(s - m_new)
    l_ref[...] = alpha * l_ref[...] + jnp.sum(p, axis=-1, keepdims=True)
    acc_ref[...] = alpha * acc_ref[...] + jnp.dot(
        p.astype(v.dtype), v, preferred_element_type=jnp.float32)
    m_ref[...] = m_new

    @pl.when(ki == pl.num_programs(3) - 1)
    def _():
        o_ref[0, 0] = (acc_ref[...] *
                       pl.reciprocal(l_ref[...], approx=True)).astype(o_ref.dtype)


# ----------------------------------------------------------------------------
# Kernel 3: output projection + residual + SwiGLU FFN + fused seq/2 avg-pool
# grid = (B, S // blk), all parallel
# ----------------------------------------------------------------------------
def oproj_ffn_pool_kernel(x_ref, attn_ref, wo_ref, fnw_ref, w13_ref, w2_ref,
                          pool_ref, o_ref, *, eps, n_heads):
    x = x_ref[0]                                           # (blk, D) f32
    blk, D = x.shape
    F = w2_ref.shape[0]

    # output projection as a sum of per-head partial matmuls (no lane concat)
    attn = jnp.zeros((blk, D), jnp.float32)
    for hh in range(n_heads):
        attn = attn + jnp.dot(attn_ref[0, hh], wo_ref[hh],
                              preferred_element_type=jnp.float32)
    x1 = x + attn

    ms = jnp.mean(x1 * x1, axis=-1, keepdims=True)
    hf = (x1 * jax.lax.rsqrt(ms + eps) * fnw_ref[...]).astype(jnp.bfloat16)
    gu = jnp.dot(hf, w13_ref[...],
                 preferred_element_type=jnp.float32)       # (blk, 2F)
    g, u = gu[:, :F], gu[:, F:]
    g = g * jax.nn.sigmoid(g)                              # SiLU
    ff = jnp.dot((g * u).astype(jnp.bfloat16), w2_ref[...],
                 preferred_element_type=jnp.float32)
    x2 = x1 + ff                                           # (blk, D)

    # TODO(synk): EncoderBlock downsample mechanism unspecified; avg-pool of
    # adjacent positions via a tiny resident pooling matrix (constant input).
    o_ref[0] = jnp.dot(pool_ref[...], x2,
                       preferred_element_type=jnp.float32)


# ----------------------------------------------------------------------------
# Kernel 4: GatedDilatedModule channel reduction (K=5 "same" conv, value+gate)
#           + RMSNorm(seq_final) + Linear(seq_final -> target)
# grid = (B,), parallel
# ----------------------------------------------------------------------------
def conv_head_kernel(x_ref, cnw_ref, wcat_ref, bias_ref, sh_ref, esum_ref,
                     hnw_ref, wout_ref, o_ref, *, eps, ksize):
    x = x_ref[0]                                           # (S, D) f32
    S, D = x.shape
    K = ksize

    ms = jnp.mean(x * x, axis=-1, keepdims=True)
    xn = (x * jax.lax.rsqrt(ms + eps) * cnw_ref[...]).astype(jnp.bfloat16)

    # tap projection: z[s, k] = <xn[s, :], tap_k> for value (k<K) and gate taps
    z = jnp.dot(xn, wcat_ref[...],
                preferred_element_type=jnp.float32)        # (S, 2K)

    # banded shift-accumulate: y[s] = sum_k z[s + k - K//2, k]  (zero padded)
    lane = jax.lax.broadcasted_iota(jnp.int32, (S, 2 * K), 1)
    acc = jnp.zeros((S, 2 * K), jnp.float32)
    for kk in range(K):
        keep = ((lane == kk) | (lane == K + kk)).astype(jnp.float32)
        acc = acc + jnp.dot(sh_ref[kk], z * keep,
                            preferred_element_type=jnp.float32)
    y2 = jnp.dot(acc, esum_ref[...],
                 preferred_element_type=jnp.float32) + bias_ref[...]   # (S, 2)

    yv, yg = y2[:, 0:1], y2[:, 1:2]
    g = yv * jax.nn.sigmoid(yg)                            # gated conv (GLU)
    # TODO(synk): GatedDilatedModule internals unspecified; act_out -> SiLU.
    g = g * jax.nn.sigmoid(g)                              # (S, 1)

    # head: RMSNorm over seq_final + Linear(seq_final -> target)
    ms2 = jnp.mean(g * g, axis=0, keepdims=True)
    gn = g * jax.lax.rsqrt(ms2 + eps) * hnw_ref[...]       # (S, 1)
    o_ref[0] = jnp.sum(gn * wout_ref[...], axis=0, keepdims=True)   # (1, T)


# ----------------------------------------------------------------------------
# Wrappers
# ----------------------------------------------------------------------------
def encoder_layer(x, cos, sin, rot, layer, cfg):
    """One EncoderBlock (pre-norm attn w/ RoPE + SwiGLU FFN) + seq/2 downsample."""
    B, S, D = x.shape
    H = cfg['n_heads']
    dh = D // H
    blk = min(S, 128)
    assert S % blk == 0 and blk % 2 == 0, (S, blk)
    nS = S // blk
    bf16 = jnp.bfloat16

    # ---- kernel 1: norm + fused QKV + RoPE ----
    qkv_fn = pl.pallas_call(
        functools.partial(qkv_rope_kernel, eps=cfg['eps'], n_heads=H),
        grid=(B, nS),
        in_specs=[
            pl.BlockSpec((1, blk, D), lambda b, s: (b, s, 0)),
            _const_spec((1, D)),
            _const_spec((D, 3 * D)),
            _const_spec((D, D)),
            pl.BlockSpec((blk, D), lambda b, s: (s, 0)),
            pl.BlockSpec((blk, D), lambda b, s: (s, 0)),
        ],
        out_specs=(
            pl.BlockSpec((1, H, blk, dh), lambda b, s: (b, 0, s, 0)),
            pl.BlockSpec((1, H, blk, dh), lambda b, s: (b, 0, s, 0)),
            pl.BlockSpec((1, H, blk, dh), lambda b, s: (b, 0, s, 0)),
        ),
        out_shape=(
            jax.ShapeDtypeStruct((B, H, S, dh), bf16),
            jax.ShapeDtypeStruct((B, H, S, dh), bf16),
            jax.ShapeDtypeStruct((B, H, S, dh), bf16),
        ),
        compiler_params=pltpu.CompilerParams(
            dimension_semantics=("parallel", "parallel")),
    )
    q, k, v = qkv_fn(x, layer['attn_norm'], layer['wqkv'], rot, cos, sin)

    # ---- kernel 2: flash attention over (B, H, Q-tiles, KV-tiles) ----
    scale = 1.0 / float(dh) ** 0.5
    attn_fn = pl.pallas_call(
        functools.partial(flash_attn_kernel, scale=scale),
        grid=(B, H, nS, nS),
        in_specs=[
            pl.BlockSpec((1, 1, blk, dh), lambda b, h, qi, ki: (b, h, qi, 0)),
            pl.BlockSpec((1, 1, blk, dh), lambda b, h, qi, ki: (b, h, ki, 0)),
            pl.BlockSpec((1, 1, blk, dh), lambda b, h, qi, ki: (b, h, ki, 0)),
        ],
        out_specs=pl.BlockSpec((1, 1, blk, dh),
                               lambda b, h, qi, ki: (b, h, qi, 0)),
        out_shape=jax.ShapeDtypeStruct((B, H, S, dh), bf16),
        scratch_shapes=[
            pltpu.VMEM((blk, 1), jnp.float32),
            pltpu.VMEM((blk, 1), jnp.float32),
            pltpu.VMEM((blk, dh), jnp.float32),
        ],
        compiler_params=pltpu.CompilerParams(
            dimension_semantics=("parallel", "parallel", "parallel",
                                 "arbitrary")),
    )
    attn = attn_fn(q, k, v)

    # ---- kernel 3: O-proj + residual + FFN + fused downsample ----
    F = layer['w2'].shape[0]
    half = blk // 2
    # hoisted avg-pool matrix (resident constant; avoids in-kernel iota/where)
    ri = np.arange(half)[:, None]
    ci = np.arange(blk)[None, :]
    pool = np.where((ci == 2 * ri) | (ci == 2 * ri + 1), 0.5, 0.0).astype(np.float32)
    pool = jnp.asarray(pool)

    ffn_fn = pl.pallas_call(
        functools.partial(oproj_ffn_pool_kernel, eps=cfg['eps'], n_heads=H),
        grid=(B, nS),
        in_specs=[
            pl.BlockSpec((1, blk, D), lambda b, s: (b, s, 0)),
            pl.BlockSpec((1, H, blk, dh), lambda b, s: (b, 0, s, 0)),
            _const_spec((H, dh, D)),
            _const_spec((1, D)),
            _const_spec((D, 2 * F)),
            _const_spec((F, D)),
            _const_spec((half, blk)),
        ],
        out_specs=pl.BlockSpec((1, half, D), lambda b, s: (b, s, 0)),
        out_shape=jax.ShapeDtypeStruct((B, S // 2, D), jnp.float32),
        compiler_params=pltpu.CompilerParams(
            dimension_semantics=("parallel", "parallel")),
    )
    return ffn_fn(x, attn, layer['wo_r'], layer['ffn_norm'], layer['w13'],
                  layer['w2'], pool)


def conv_head(x, conv_p, head_p, cfg):
    B, S, D = x.shape
    K = cfg['kernel_size']
    target = cfg['target']
    fn = pl.pallas_call(
        functools.partial(conv_head_kernel, eps=cfg['eps'], ksize=K),
        grid=(B,),
        in_specs=[
            pl.BlockSpec((1, S, D), lambda b: (b, 0, 0)),
            _const_spec((1, D)),
            _const_spec((D, 2 * K)),
            _const_spec((1, 2)),
            _const_spec((K, S, S)),
            _const_spec((2 * K, 2)),
            _const_spec((S, 1)),
            _const_spec((S, target)),
        ],
        out_specs=pl.BlockSpec((1, 1, target), lambda b: (b, 0, 0)),
        out_shape=jax.ShapeDtypeStruct((B, 1, target), jnp.float32),
        compiler_params=pltpu.CompilerParams(
            dimension_semantics=("parallel",)),
    )
    out = fn(x, conv_p['norm'], conv_p['wcat'], conv_p['bias'],
             conv_p['shift'], conv_p['esum'], head_p['norm'], head_p['w_out'])
    return out[:, 0, :]


# ----------------------------------------------------------------------------
# Glue: RoPE tables / rotate-half matrix, parameter init
# ----------------------------------------------------------------------------
def precompute_rope(dim, n_heads, seq_len, theta=10000.0):
    dh = dim // n_heads
    half = dh // 2
    inv = 1.0 / (theta ** (np.arange(0, dh, 2, dtype=np.float32) / dh))
    t = np.arange(seq_len, dtype=np.float32)
    ang = np.outer(t, inv)                                 # (S, dh/2)
    cos_h = np.concatenate([np.cos(ang), np.cos(ang)], axis=-1)   # (S, dh)
    sin_h = np.concatenate([np.sin(ang), np.sin(ang)], axis=-1)
    cos = np.tile(cos_h, (1, n_heads))                     # (S, D)
    sin = np.tile(sin_h, (1, n_heads))
    # rotate-half as a block-diagonal +/-1 permutation matrix: q_rot = q @ R
    rot = np.zeros((dim, dim), np.float32)
    for h in range(n_heads):
        o = h * dh
        for j in range(half):
            rot[o + j + half, o + j] = -1.0
            rot[o + j, o + j + half] = 1.0
    return (jnp.asarray(cos, jnp.float32), jnp.asarray(sin, jnp.float32),
            jnp.asarray(rot, jnp.bfloat16))


def init_model(key, *, batch, seq_len, dim, n_heads, n_layers, vocab,
               ffn_hidden, num_target_classes, kernel_size=5, eps=1e-5):
    assert dim % n_heads == 0 and (dim // n_heads) % 2 == 0
    assert seq_len % (2 ** n_layers) == 0
    target = 1 if num_target_classes <= 2 else num_target_classes
    s_final = seq_len // (2 ** n_layers)
    cfg = dict(batch=batch, seq_len=seq_len, dim=dim, n_heads=n_heads,
               n_layers=n_layers, vocab=vocab, ffn_hidden=ffn_hidden,
               target=target, s_final=s_final, eps=eps,
               kernel_size=kernel_size)

    keys = iter(jax.random.split(key, 16 + 8 * n_layers))
    nrm = lambda k, shp, sc=0.02: (sc * jax.random.normal(k, shp)).astype(jnp.float32)

    params = {'embed': nrm(next(keys), (vocab, dim))}

    cos, sin, rot = precompute_rope(dim, n_heads, seq_len)
    params['rope_cos'], params['rope_sin'], params['rot'] = cos, sin, rot

    dh = dim // n_heads
    layers = []
    for _ in range(n_layers):
        wq = nrm(next(keys), (dim, dim))
        wk = nrm(next(keys), (dim, dim))
        wv = nrm(next(keys), (dim, dim))
        wo = nrm(next(keys), (dim, dim))
        w1 = nrm(next(keys), (dim, ffn_hidden))
        w3 = nrm(next(keys), (dim, ffn_hidden))
        w2 = nrm(next(keys), (ffn_hidden, dim))
        layers.append(dict(
            attn_norm=jnp.ones((1, dim), jnp.float32),
            wqkv=jnp.concatenate([wq, wk, wv], axis=1).astype(jnp.bfloat16),
            wo_r=wo.reshape(n_heads, dh, dim).astype(jnp.bfloat16),
            ffn_norm=jnp.ones((1, dim), jnp.float32),
            w13=jnp.concatenate([w1, w3], axis=1).astype(jnp.bfloat16),
            w2=w2.astype(jnp.bfloat16),
        ))
    params['layers'] = layers

    # GatedDilatedModule: in=dim, out=1, K=5, bias, dilation=1 (value + gate taps)
    Wv = nrm(next(keys), (kernel_size, dim), 0.1)          # (K, D)
    Wg = nrm(next(keys), (kernel_size, dim), 0.1)
    wcat = jnp.concatenate([Wv.T, Wg.T], axis=1).astype(jnp.bfloat16)   # (D, 2K)
    c = kernel_size // 2
    sh = np.zeros((kernel_size, s_final, s_final), np.float32)
    for kk in range(kernel_size):
        for s in range(s_final):
            sp = s + kk - c
            if 0 <= sp < s_final:
                sh[kk, s, sp] = 1.0
    esum = np.zeros((2 * kernel_size, 2), np.float32)
    esum[:kernel_size, 0] = 1.0
    esum[kernel_size:, 1] = 1.0
    params['conv'] = dict(norm=jnp.ones((1, dim), jnp.float32),
                          wcat=wcat,
                          bias=jnp.zeros((1, 2), jnp.float32),
                          shift=jnp.asarray(sh),
                          esum=jnp.asarray(esum))

    params['head'] = dict(norm=jnp.ones((s_final, 1), jnp.float32),
                          w_out=nrm(next(keys), (s_final, target), 0.1))
    return params, cfg


# ----------------------------------------------------------------------------
# Full forward (FullProcess.forward) + loss
# ----------------------------------------------------------------------------
def compute_loss(out, y, temporal_weight=1.0):
    # TODO(synk): exact `Loss` class not provided; stand-in = temporally weighted
    # BCE-with-logits on (WEEK_NUM, target) pairs, weighted-mean reduction.
    logits = out[:, 0]
    tgt = y[:, 1]
    week = y[:, 0]
    bce = jnp.maximum(logits, 0.0) - logits * tgt + jnp.log1p(
        jnp.exp(-jnp.abs(logits)))
    w = 1.0 + temporal_weight * week
    return {"loss": jnp.sum(w * bce) / jnp.sum(w)}


def full_process_forward(params, tokens, targets, cfg):
    # ---- InputPhase ----
    # TODO(synk): BPE text encoding + metadata-token replacement (Python dict /
    # string ops over MetaDataTokens) have no Pallas equivalent; token ids are
    # taken directly and the embedding gather is plain-JAX glue.
    x = jnp.take(params['embed'], tokens, axis=0).astype(jnp.float32)  # (B,S,D)

    # ---- IntermediateBlocks ----
    for l, layer in enumerate(params['layers']):
        S_l = cfg['seq_len'] // (2 ** l)
        cos = params['rope_cos'][:S_l]
        sin = params['rope_sin'][:S_l]
        x = encoder_layer(x, cos, sin, params['rot'], layer, cfg)  # (B,S_l/2,D)

    out = conv_head(x, params['conv'], params['head'], cfg)        # (B, target)

    if targets is None or targets.shape[0] == 0:
        return out, None
    y = targets.astype(out.dtype)
    return out, compute_loss(out=out, y=y)


# ----------------------------------------------------------------------------
if __name__ == "__main__":
    key = jax.random.PRNGKey(0)
    params, cfg = init_model(
        key, batch=2, seq_len=16, dim=32, n_heads=4, n_layers=2,
        vocab=64, ffn_hidden=64, num_target_classes=2)

    k_tok, k_tgt = jax.random.split(jax.random.PRNGKey(0))
    tokens = jax.random.randint(k_tok, (cfg['batch'], cfg['seq_len']), 0,
                                cfg['vocab'], dtype=jnp.int32)
    # targets: [[WEEK_NUM, target], ...]
    targets = jnp.stack(
        [jnp.arange(cfg['batch'], dtype=jnp.float32),
         jax.random.bernoulli(k_tgt, 0.5, (cfg['batch'],)).astype(jnp.float32)],
        axis=1)

    fwd = jax.jit(lambda p, tok, tgt: full_process_forward(p, tok, tgt, cfg))
    out, loss = fwd(params, tokens, targets)
    jax.block_until_ready(out)
    jax.block_until_ready(loss["loss"])
    assert out.shape == (cfg['batch'], cfg['target'])
    assert np.isfinite(np.asarray(out)).all()
    assert np.isfinite(float(loss["loss"]))
    print("KERNEL_OK")
</pallas_src>

<mosaic_0001>
module attributes {stable_mosaic.version = 11 : i64} {
  func.func @flash_attn_kernel(%arg0: i32, %arg1: i32, %arg2: i32, %arg3: i32, %arg4: memref<1x1x16x8xbf16, #tpu.memory_space<vmem>>, %arg5: memref<1x1x16x8xbf16, #tpu.memory_space<vmem>>, %arg6: memref<1x1x16x8xbf16, #tpu.memory_space<vmem>>, %arg7: memref<1x1x16x8xbf16, #tpu.memory_space<vmem>>, %arg8: memref<16x1xf32, #tpu.memory_space<vmem>>, %arg9: memref<16x1xf32, #tpu.memory_space<vmem>>, %arg10: memref<16x8xf32, #tpu.memory_space<vmem>>) attributes {dimension_semantics = [#tpu.dimension_semantics<parallel>, #tpu.dimension_semantics<parallel>, #tpu.dimension_semantics<parallel>, #tpu.dimension_semantics<arbitrary>], iteration_bounds = array<i64: 2, 4, 1, 1>, scalar_prefetch = 0 : i64, scratch_operands = 3 : i64, tpu.core_type = #tpu.core_type<tc>, window_params = [{transform_indices = @transform_0, window_bounds = array<i64: 1, 1, 16, 8>}, {transform_indices = @transform_1, window_bounds = array<i64: 1, 1, 16, 8>}, {transform_indices = @transform_2, window_bounds = array<i64: 1, 1, 16, 8>}, {transform_indices = @transform_3, window_bounds = array<i64: 1, 1, 16, 8>}]} {
    %c0_i32 = arith.constant 0 : i32
    %0 = arith.cmpi eq, %arg3, %c0_i32 : i32
    %1 = arith.extui %0 : i1 to i32
    %c0_i32_0 = arith.constant 0 : i32
    %2 = arith.cmpi ne, %1, %c0_i32_0 : i32
    scf.if %2 {
      %cst_30 = arith.constant 0xFF800000 : f32
      %38 = vector.broadcast %cst_30 : f32 to vector<16x1xf32>
      %c0_31 = arith.constant 0 : index
      %c0_32 = arith.constant 0 : index
      %39 = vector.load %arg8[%c0_31, %c0_32] : memref<16x1xf32, #tpu.memory_space<vmem>>, vector<16x1xf32>
      tpu.vector_store %arg8[%c0_31, %c0_32], %38 {strides = array<i32>} : memref<16x1xf32, #tpu.memory_space<vmem>>, vector<16x1xf32>,
      %cst_33 = arith.constant 0.000000e+00 : f32
      %40 = vector.broadcast %cst_33 : f32 to vector<16x1xf32>
      %c0_34 = arith.constant 0 : index
      %c0_35 = arith.constant 0 : index
      %41 = vector.load %arg9[%c0_34, %c0_35] : memref<16x1xf32, #tpu.memory_space<vmem>>, vector<16x1xf32>
      tpu.vector_store %arg9[%c0_34, %c0_35], %40 {strides = array<i32>} : memref<16x1xf32, #tpu.memory_space<vmem>>, vector<16x1xf32>,
      %cst_36 = arith.constant 0.000000e+00 : f32
      %42 = vector.broadcast %cst_36 : f32 to vector<16x8xf32>
      %c0_37 = arith.constant 0 : index
      %c0_38 = arith.constant 0 : index
      %43 = vector.load %arg10[%c0_37, %c0_38] : memref<16x8xf32, #tpu.memory_space<vmem>>, vector<16x8xf32>
      tpu.vector_store %arg10[%c0_37, %c0_38], %42 {strides = array<i32>} : memref<16x8xf32, #tpu.memory_space<vmem>>, vector<16x8xf32>,
    } else {
    }
    %c0 = arith.constant 0 : index
    %c0_1 = arith.constant 0 : index
    %c0_2 = arith.constant 0 : index
    %c0_3 = arith.constant 0 : index
    %3 = vector.load %arg4[%c0, %c0_1, %c0_2, %c0_3] : memref<1x1x16x8xbf16, #tpu.memory_space<vmem>>, vector<1x1x16x8xbf16>
    %4 = vector.shape_cast %3 : vector<1x1x16x8xbf16> to vector<16x8xbf16>
    %cst = arith.constant 3.535160e-01 : bf16
    %5 = vector.broadcast %cst : bf16 to vector<16x8xbf16>
    %6 = arith.mulf %4, %5 : vector<16x8xbf16>
    %c0_4 = arith.constant 0 : index
    %c0_5 = arith.constant 0 : index
    %c0_6 = arith.constant 0 : index
    %c0_7 = arith.constant 0 : index
    %7 = vector.load %arg5[%c0_4, %c0_5, %c0_6, %c0_7] : memref<1x1x16x8xbf16, #tpu.memory_space<vmem>>, vector<1x1x16x8xbf16>
    %8 = vector.shape_cast %7 : vector<1x1x16x8xbf16> to vector<16x8xbf16>
    %c0_8 = arith.constant 0 : index
    %c0_9 = arith.constant 0 : index
    %c0_10 = arith.constant 0 : index
    %c0_11 = arith.constant 0 : index
    %9 = vector.load %arg6[%c0_8, %c0_9, %c0_10, %c0_11] : memref<1x1x16x8xbf16, #tpu.memory_space<vmem>>, vector<1x1x16x8xbf16>
    %10 = vector.shape_cast %9 : vector<1x1x16x8xbf16> to vector<16x8xbf16>
    %cst_12 = arith.constant dense<0.000000e+00> : vector<16x16xf32>
    %11 = tpu.matmul %6, %8, %cst_12 {dimension_numbers = #tpu.dot_dimension_numbers<[1], [1], [0], [0], [0, 0, 1, 0], [], []>} : vector<16x8xbf16>, vector<16x8xbf16>, vector<16x16xf32> -> vector<16x16xf32>
    %c0_13 = arith.constant 0 : index
    %c0_14 = arith.constant 0 : index
    %12 = vector.load %arg8[%c0_13, %c0_14] : memref<16x1xf32, #tpu.memory_space<vmem>>, vector<16x1xf32>
    %cst_15 = arith.constant dense<0xFF800000> : vector<16xf32>
    %13 = vector.multi_reduction <maximumf>, %11, %cst_15 [1] : vector<16x16xf32> to vector<16xf32>
    %14 = vector.shape_cast %13 : vector<16xf32> to vector<16x1xf32>
    %15 = arith.maximumf %12, %14 : vector<16x1xf32>
    %16 = arith.subf %12, %15 : vector<16x1xf32>
    %17 = math.exp %16 : vector<16x1xf32>
    %18 = vector.broadcast %15 : vector<16x1xf32> to vector<16x16xf32>
    %19 = arith.subf %11, %18 : vector<16x16xf32>
    %20 = math.exp %19 : vector<16x16xf32>
    %c0_16 = arith.constant 0 : index
    %c0_17 = arith.constant 0 : index
    %21 = vector.load %arg9[%c0_16, %c0_17] : memref<16x1xf32, #tpu.memory_space<vmem>>, vector<16x1xf32>
    %22 = arith.mulf %17, %21 : vector<16x1xf32>
    %cst_18 = arith.constant dense<0.000000e+00> : vector<16xf32>
    %23 = vector.multi_reduction <add>, %20, %cst_18 [1] : vector<16x16xf32> to vector<16xf32>
    %24 = vector.shape_cast %23 : vector<16xf32> to vector<16x1xf32>
    %25 = arith.addf %22, %24 : vector<16x1xf32>
    %c0_19 = arith.constant 0 : index
    %c0_20 = arith.constant 0 : index
    %26 = vector.load %arg9[%c0_19, %c0_20] : memref<16x1xf32, #tpu.memory_space<vmem>>, vector<16x1xf32>
    tpu.vector_store %arg9[%c0_19, %c0_20], %25 {strides = array<i32>} : memref<16x1xf32, #tpu.memory_space<vmem>>, vector<16x1xf32>,
    %c0_21 = arith.constant 0 : index
    %c0_22 = arith.constant 0 : index
    %27 = vector.load %arg10[%c0_21, %c0_22] : memref<16x8xf32, #tpu.memory_space<vmem>>, vector<16x8xf32>
    %28 = vector.broadcast %17 : vector<16x1xf32> to vector<16x8xf32>
    %29 = arith.mulf %28, %27 : vector<16x8xf32>
    %30 = arith.truncf %20 : vector<16x16xf32> to vector<16x16xbf16>
    %cst_23 = arith.constant dense<0.000000e+00> : vector<16x8xf32>
    %31 = tpu.matmul %30, %10, %cst_23 {dimension_numbers = #tpu.dot_dimension_numbers<[1], [0], [0], [1], [0, 0, 1, 1], [], []>} : vector<16x16xbf16>, vector<16x8xbf16>, vector<16x8xf32> -> vector<16x8xf32>
    %32 = arith.addf %29, %31 : vector<16x8xf32>
    %c0_24 = arith.constant 0 : index
    %c0_25 = arith.constant 0 : index
    %33 = vector.load %arg10[%c0_24, %c0_25] : memref<16x8xf32, #tpu.memory_space<vmem>>, vector<16x8xf32>
    tpu.vector_store %arg10[%c0_24, %c0_25], %32 {strides = array<i32>} : memref<16x8xf32, #tpu.memory_space<vmem>>, vector<16x8xf32>,
    %c0_26 = arith.constant 0 : index
    %c0_27 = arith.constant 0 : index
    %34 = vector.load %arg8[%c0_26, %c0_27] : memref<16x1xf32, #tpu.memory_space<vmem>>, vector<16x1xf32>
    tpu.vector_store %arg8[%c0_26, %c0_27], %15 {strides = array<i32>} : memref<16x1xf32, #tpu.memory_space<vmem>>, vector<16x1xf32>,
    %c0_i32_28 = arith.constant 0 : i32
    %35 = arith.cmpi eq, %arg3, %c0_i32_28 : i32
    %36 = arith.extui %35 : i1 to i32
    %c0_i32_29 = arith.constant 0 : i32
    %37 = arith.cmpi ne, %36, %c0_i32_29 : i32
    scf.if %37 {
      %c0_30 = arith.constant 0 : index
      %c0_31 = arith.constant 0 : index
      %38 = vector.load %arg10[%c0_30, %c0_31] : memref<16x8xf32, #tpu.memory_space<vmem>>, vector<16x8xf32>
      %c0_32 = arith.constant 0 : index
      %c0_33 = arith.constant 0 : index
      %39 = vector.load %arg9[%c0_32, %c0_33] : memref<16x1xf32, #tpu.memory_space<vmem>>, vector<16x1xf32>
      %40 = tpu.reciprocal %39 {approx = true} : vector<16x1xf32> -> vector<16x1xf32>
      %41 = vector.broadcast %40 : vector<16x1xf32> to vector<16x8xf32>
      %42 = arith.mulf %38, %41 : vector<16x8xf32>
      %43 = arith.truncf %42 : vector<16x8xf32> to vector<16x8xbf16>
      %c0_34 = arith.constant 0 : index
      %c0_35 = arith.constant 0 : index
      %c0_36 = arith.constant 0 : index
      %c0_37 = arith.constant 0 : index
      %44 = vector.load %arg7[%c0_34, %c0_35, %c0_36, %c0_37] : memref<1x1x16x8xbf16, #tpu.memory_space<vmem>>, vector<1x1x16x8xbf16>
      %45 = vector.shape_cast %44 : vector<1x1x16x8xbf16> to vector<16x8xbf16>
      %46 = vector.shape_cast %43 : vector<16x8xbf16> to vector<1x1x16x8xbf16>
      tpu.vector_store %arg7[%c0_34, %c0_35, %c0_36, %c0_37], %46 {strides = array<i32>} : memref<1x1x16x8xbf16, #tpu.memory_space<vmem>>, vector<1x1x16x8xbf16>,
    } else {
    }
    return
  }
  func.func @transform_0(%arg0: i32, %arg1: i32, %arg2: i32, %arg3: i32) -> (i32, i32, i32, i32) {
    %c0_i32 = arith.constant 0 : i32
    %c0_i32_0 = arith.constant 0 : i32
    return %arg0, %arg1, %arg2, %c0_i32 : i32, i32, i32, i32
  }
  func.func @transform_1(%arg0: i32, %arg1: i32, %arg2: i32, %arg3: i32) -> (i32, i32, i32, i32) {
    %c0_i32 = arith.constant 0 : i32
    %c0_i32_0 = arith.constant 0 : i32
    return %arg0, %arg1, %arg3, %c0_i32 : i32, i32, i32, i32
  }
  func.func @transform_2(%arg0: i32, %arg1: i32, %arg2: i32, %arg3: i32) -> (i32, i32, i32, i32) {
    %c0_i32 = arith.constant 0 : i32
    %c0_i32_0 = arith.constant 0 : i32
    return %arg0, %arg1, %arg3, %c0_i32 : i32, i32, i32, i32
  }
  func.func @transform_3(%arg0: i32, %arg1: i32, %arg2: i32, %arg3: i32) -> (i32, i32, i32, i32) {
    %c0_i32 = arith.constant 0 : i32
    %c0_i32_0 = arith.constant 0 : i32
    return %arg0, %arg1, %arg2, %c0_i32 : i32, i32, i32, i32
  }
}

module attributes {stable_mosaic.version = 11 : i64} {
  func.func @qkv_rope_kernel(%arg0: i32, %arg1: i32, %arg2: memref<1x16x32xf32, #tpu.memory_space<vmem>>, %arg3: memref<1x32xf32, #tpu.memory_space<vmem>>, %arg4: memref<32x96xbf16, #tpu.memory_space<vmem>>, %arg5: memref<32x32xbf16, #tpu.memory_space<vmem>>, %arg6: memref<16x32xf32, #tpu.memory_space<vmem>>, %arg7: memref<16x32xf32, #tpu.memory_space<vmem>>, %arg8: memref<1x4x16x8xbf16, #tpu.memory_space<vmem>>, %arg9: memref<1x4x16x8xbf16, #tpu.memory_space<vmem>>, %arg10: memref<1x4x16x8xbf16, #tpu.memory_space<vmem>>) attributes {dimension_semantics = [#tpu.dimension_semantics<parallel>, #tpu.dimension_semantics<parallel>], iteration_bounds = array<i64: 2, 1>, scalar_prefetch = 0 : i64, scratch_operands = 0 : i64, tpu.core_type = #tpu.core_type<tc>, window_params = [{transform_indices = @transform_0, window_bounds = array<i64: 1, 16, 32>}, {pipeline_mode = #tpu.pipeline_mode<synchronous>, transform_indices = @transform_1, window_bounds = array<i64: 1, 32>}, {pipeline_mode = #tpu.pipeline_mode<synchronous>, transform_indices = @transform_2, window_bounds = array<i64: 32, 96>}, {pipeline_mode = #tpu.pipeline_mode<synchronous>, transform_indices = @transform_3, window_bounds = array<i64: 32, 32>}, {transform_indices = @transform_4, window_bounds = array<i64: 16, 32>}, {transform_indices = @transform_5, window_bounds = array<i64: 16, 32>}, {transform_indices = @transform_6, window_bounds = array<i64: 1, 4, 16, 8>}, {transform_indices = @transform_7, window_bounds = array<i64: 1, 4, 16, 8>}, {transform_indices = @transform_8, window_bounds = array<i64: 1, 4, 16, 8>}]} {
    %c0 = arith.constant 0 : index
    %c0_0 = arith.constant 0 : index
    %c0_1 = arith.constant 0 : index
    %0 = vector.load %arg2[%c0, %c0_0, %c0_1] : memref<1x16x32xf32, #tpu.memory_space<vmem>>, vector<1x16x32xf32>
    %1 = vector.shape_cast %0 : vector<1x16x32xf32> to vector<16x32xf32>
    %2 = arith.mulf %1, %1 : vector<16x32xf32>
    %cst = arith.constant dense<0.000000e+00> : vector<16xf32>
    %3 = vector.multi_reduction <add>, %2, %cst [1] : vector<16x32xf32> to vector<16xf32>
    %4 = vector.shape_cast %3 : vector<16xf32> to vector<16x1xf32>
    %cst_2 = arith.constant 3.200000e+01 : f32
    %5 = vector.broadcast %cst_2 : f32 to vector<16x1xf32>
    %6 = arith.divf %4, %5 : vector<16x1xf32>
    %cst_3 = arith.constant 9.99999974E-6 : f32
    %7 = vector.broadcast %cst_3 : f32 to vector<16x1xf32>
    %8 = arith.addf %6, %7 : vector<16x1xf32>
    %9 = math.rsqrt %8 : vector<16x1xf32>
    %10 = vector.broadcast %9 : vector<16x1xf32> to vector<16x32xf32>
    %11 = arith.mulf %1, %10 : vector<16x32xf32>
    %c0_4 = arith.constant 0 : index
    %c0_5 = arith.constant 0 : index
    %12 = vector.load %arg3[%c0_4, %c0_5] : memref<1x32xf32, #tpu.memory_space<vmem>>, vector<1x32xf32>
    %13 = vector.broadcast %12 : vector<1x32xf32> to vector<16x32xf32>
    %14 = arith.mulf %11, %13 : vector<16x32xf32>
    %15 = arith.truncf %14 : vector<16x32xf32> to vector<16x32xbf16>
    %c0_6 = arith.constant 0 : index
    %c0_7 = arith.constant 0 : index
    %16 = vector.load %arg4[%c0_6, %c0_7] : memref<32x96xbf16, #tpu.memory_space<vmem>>, vector<32x96xbf16>
    %cst_8 = arith.constant dense<0.000000e+00> : vector<16x96xf32>
    %17 = tpu.matmul %15, %16, %cst_8 {dimension_numbers = #tpu.dot_dimension_numbers<[1], [0], [0], [1], [0, 0, 1, 1], [], []>} : vector<16x32xbf16>, vector<32x96xbf16>, vector<16x96xf32> -> vector<16x96xf32>
    %18 = vector.extract_strided_slice %17 {offsets = [0, 0], sizes = [16, 32], strides = [1, 1]} : vector<16x96xf32> to vector<16x32xf32>
    %19 = vector.extract_strided_slice %17 {offsets = [0, 32], sizes = [16, 32], strides = [1, 1]} : vector<16x96xf32> to vector<16x32xf32>
    %20 = vector.extract_strided_slice %17 {offsets = [0, 64], sizes = [16, 32], strides = [1, 1]} : vector<16x96xf32> to vector<16x32xf32>
    %c0_9 = arith.constant 0 : index
    %c0_10 = arith.constant 0 : index
    %21 = vector.load %arg6[%c0_9, %c0_10] : memref<16x32xf32, #tpu.memory_space<vmem>>, vector<16x32xf32>
    %c0_11 = arith.constant 0 : index
    %c0_12 = arith.constant 0 : index
    %22 = vector.load %arg7[%c0_11, %c0_12] : memref<16x32xf32, #tpu.memory_space<vmem>>, vector<16x32xf32>
    %c0_13 = arith.constant 0 : index
    %c0_14 = arith.constant 0 : index
    %23 = vector.load %arg5[%c0_13, %c0_14] : memref<32x32xbf16, #tpu.memory_space<vmem>>, vector<32x32xbf16>
    %24 = arith.truncf %18 : vector<16x32xf32> to vector<16x32xbf16>
    %cst_15 = arith.constant dense<0.000000e+00> : vector<16x32xf32>
    %25 = tpu.matmul %24, %23, %cst_15 {dimension_numbers = #tpu.dot_dimension_numbers<[1], [0], [0], [1], [0, 0, 1, 1], [], []>} : vector<16x32xbf16>, vector<32x32xbf16>, vector<16x32xf32> -> vector<16x32xf32>
    %26 = arith.mulf %18, %21 : vector<16x32xf32>
    %27 = arith.mulf %25, %22 : vector<16x32xf32>
    %28 = arith.addf %26, %27 : vector<16x32xf32>
    %29 = arith.truncf %19 : vector<16x32xf32> to vector<16x32xbf16>
    %cst_16 = arith.constant dense<0.000000e+00> : vector<16x32xf32>
    %30 = tpu.matmul %29, %23, %cst_16 {dimension_numbers = #tpu.dot_dimension_numbers<[1], [0], [0], [1], [0, 0, 1, 1], [], []>} : vector<16x32xbf16>, vector<32x32xbf16>, vector<16x32xf32> -> vector<16x32xf32>
    %31 = arith.mulf %19, %21 : vector<16x32xf32>
    %32 = arith.mulf %30, %22 : vector<16x32xf32>
    %33 = arith.addf %31, %32 : vector<16x32xf32>
    %34 = vector.extract_strided_slice %28 {offsets = [0, 0], sizes = [16, 8], strides = [1, 1]} : vector<16x32xf32> to vector<16x8xf32>
    %35 = arith.truncf %34 : vector<16x8xf32> to vector<16x8xbf16>
    %c0_17 = arith.constant 0 : index
    %c0_18 = arith.constant 0 : index
    %c0_19 = arith.constant 0 : index
    %c0_20 = arith.constant 0 : index
    %36 = vector.load %arg8[%c0_17, %c0_18, %c0_19, %c0_20] : memref<1x4x16x8xbf16, #tpu.memory_space<vmem>>, vector<1x1x16x8xbf16>
    %37 = vector.shape_cast %36 : vector<1x1x16x8xbf16> to vector<16x8xbf16>
    %38 = vector.shape_cast %35 : vector<16x8xbf16> to vector<1x1x16x8xbf16>
    tpu.vector_store %arg8[%c0_17, %c0_18, %c0_19, %c0_20], %38 {strides = array<i32>} : memref<1x4x16x8xbf16, #tpu.memory_space<vmem>>, vector<1x1x16x8xbf16>,
    %39 = vector.extract_strided_slice %33 {offsets = [0, 0], sizes = [16, 8], strides = [1, 1]} : vector<16x32xf32> to vector<16x8xf32>
    %40 = arith.truncf %39 : vector<16x8xf32> to vector<16x8xbf16>
    %c0_21 = arith.constant 0 : index
    %c0_22 = arith.constant 0 : index
    %c0_23 = arith.constant 0 : index
    %c0_24 = arith.constant 0 : index
    %41 = vector.load %arg9[%c0_21, %c0_22, %c0_23, %c0_24] : memref<1x4x16x8xbf16, #tpu.memory_space<vmem>>, vector<1x1x16x8xbf16>
    %42 = vector.shape_cast %41 : vector<1x1x16x8xbf16> to vector<16x8xbf16>
    %43 = vector.shape_cast %40 : vector<16x8xbf16> to vector<1x1x16x8xbf16>
    tpu.vector_store %arg9[%c0_21, %c0_22, %c0_23, %c0_24], %43 {strides = array<i32>} : memref<1x4x16x8xbf16, #tpu.memory_space<vmem>>, vector<1x1x16x8xbf16>,
    %44 = vector.extract_strided_slice %20 {offsets = [0, 0], sizes = [16, 8], strides = [1, 1]} : vector<16x32xf32> to vector<16x8xf32>
    %45 = arith.truncf %44 : vector<16x8xf32> to vector<16x8xbf16>
    %c0_25 = arith.constant 0 : index
    %c0_26 = arith.constant 0 : index
    %c0_27 = arith.constant 0 : index
    %c0_28 = arith.constant 0 : index
    %46 = vector.load %arg10[%c0_25, %c0_26, %c0_27, %c0_28] : memref<1x4x16x8xbf16, #tpu.memory_space<vmem>>, vector<1x1x16x8xbf16>
    %47 = vector.shape_cast %46 : vector<1x1x16x8xbf16> to vector<16x8xbf16>
    %48 = vector.shape_cast %45 : vector<16x8xbf16> to vector<1x1x16x8xbf16>
    tpu.vector_store %arg10[%c0_25, %c0_26, %c0_27, %c0_28], %48 {strides = array<i32>} : memref<1x4x16x8xbf16, #tpu.memory_space<vmem>>, vector<1x1x16x8xbf16>,
    %49 = vector.extract_strided_slice %28 {offsets = [0, 8], sizes = [16, 8], strides = [1, 1]} : vector<16x32xf32> to vector<16x8xf32>
    %50 = arith.truncf %49 : vector<16x8xf32> to vector<16x8xbf16>
    %c0_29 = arith.constant 0 : index
    %c1 = arith.constant 1 : index
    %c0_30 = arith.constant 0 : index
    %c0_31 = arith.constant 0 : index
    %51 = vector.load %arg8[%c0_29, %c1, %c0_30, %c0_31] : memref<1x4x16x8xbf16, #tpu.memory_space<vmem>>, vector<1x1x16x8xbf16>
    %52 = vector.shape_cast %51 : vector<1x1x16x8xbf16> to vector<16x8xbf16>
    %53 = vector.shape_cast %50 : vector<16x8xbf16> to vector<1x1x16x8xbf16>
    tpu.vector_store %arg8[%c0_29, %c1, %c0_30, %c0_31], %53 {strides = array<i32>} : memref<1x4x16x8xbf16, #tpu.memory_space<vmem>>, vector<1x1x16x8xbf16>,
    %54 = vector.extract_strided_slice %33 {offsets = [0, 8], sizes = [16, 8], strides = [1, 1]} : vector<16x32xf32> to vector<16x8xf32>
    %55 = arith.truncf %54 : vector<16x8xf32> to vector<16x8xbf16>
    %c0_32 = arith.constant 0 : index
    %c1_33 = arith.constant 1 : index
    %c0_34 = arith.constant 0 : index
    %c0_35 = arith.constant 0 : index
    %56 = vector.load %arg9[%c0_32, %c1_33, %c0_34, %c0_35] : memref<1x4x16x8xbf16, #tpu.memory_space<vmem>>, vector<1x1x16x8xbf16>
    %57 = vector.shape_cast %56 : vector<1x1x16x8xbf16> to vector<16x8xbf16>
    %58 = vector.shape_cast %55 : vector<16x8xbf16> to vector<1x1x16x8xbf16>
    tpu.vector_store %arg9[%c0_32, %c1_33, %c0_34, %c0_35], %58 {strides = array<i32>} : memref<1x4x16x8xbf16, #tpu.memory_space<vmem>>, vector<1x1x16x8xbf16>,
    %59 = vector.extract_strided_slice %20 {offsets = [0, 8], sizes = [16, 8], strides = [1, 1]} : vector<16x32xf32> to vector<16x8xf32>
    %60 = arith.truncf %59 : vector<16x8xf32> to vector<16x8xbf16>
    %c0_36 = arith.constant 0 : index
    %c1_37 = arith.constant 1 : index
    %c0_38 = arith.constant 0 : index
    %c0_39 = arith.constant 0 : index
    %61 = vector.load %arg10[%c0_36, %c1_37, %c0_38, %c0_39] : memref<1x4x16x8xbf16, #tpu.memory_space<vmem>>, vector<1x1x16x8xbf16>
    %62 = vector.shape_cast %61 : vector<1x1x16x8xbf16> to vector<16x8xbf16>
    %63 = vector.shape_cast %60 : vector<16x8xbf16> to vector<1x1x16x8xbf16>
    tpu.vector_store %arg10[%c0_36, %c1_37, %c0_38, %c0_39], %63 {strides = array<i32>} : memref<1x4x16x8xbf16, #tpu.memory_space<vmem>>, vector<1x1x16x8xbf16>,
    %64 = vector.extract_strided_slice %28 {offsets = [0, 16], sizes = [16, 8], strides = [1, 1]} : vector<16x32xf32> to vector<16x8xf32>
    %65 = arith.truncf %64 : vector<16x8xf32> to vector<16x8xbf16>
    %c0_40 = arith.constant 0 : index
    %c2 = arith.constant 2 : index
    %c0_41 = arith.constant 0 : index
    %c0_42 = arith.constant 0 : index
    %66 = vector.load %arg8[%c0_40, %c2, %c0_41, %c0_42] : memref<1x4x16x8xbf16, #tpu.memory_space<vmem>>, vector<1x1x16x8xbf16>
    %67 = vector.shape_cast %66 : vector<1x1x16x8xbf16> to vector<16x8xbf16>
    %68 = vector.shape_cast %65 : vector<16x8xbf16> to vector<1x1x16x8xbf16>
    tpu.vector_store %arg8[%c0_40, %c2, %c0_41, %c0_42], %68 {strides = array<i32>} : memref<1x4x16x8xbf16, #tpu.memory_space<vmem>>, vector<1x1x16x8xbf16>,
    %69 = vector.extract_strided_slice %33 {offsets = [0, 16], sizes = [16, 8], strides = [1, 1]} : vector<16x32xf32> to vector<16x8xf32>
    %70 = arith.truncf %69 : vector<16x8xf32> to vector<16x8xbf16>
    %c0_43 = arith.constant 0 : index
    %c2_44 = arith.constant 2 : index
    %c0_45 = arith.constant 0 : index
    %c0_46 = arith.constant 0 : index
    %71 = vector.load %arg9[%c0_43, %c2_44, %c0_45, %c0_46] : memref<1x4x16x8xbf16, #tpu.memory_space<vmem>>, vector<1x1x16x8xbf16>
    %72 = vector.shape_cast %71 : vector<1x1x16x8xbf16> to vector<16x8xbf16>
    %73 = vector.shape_cast %70 : vector<16x8xbf16> to vector<1x1x16x8xbf16>
    tpu.vector_store %arg9[%c0_43, %c2_44, %c0_45, %c0_46], %73 {strides = array<i32>} : memref<1x4x16x8xbf16, #tpu.memory_space<vmem>>, vector<1x1x16x8xbf16>,
    %74 = vector.extract_strided_slice %20 {offsets = [0, 16], sizes = [16, 8], strides = [1, 1]} : vector<16x32xf32> to vector<16x8xf32>
    %75 = arith.truncf %74 : vector<16x8xf32> to vector<16x8xbf16>
    %c0_47 = arith.constant 0 : index
    %c2_48 = arith.constant 2 : index
    %c0_49 = arith.constant 0 : index
    %c0_50 = arith.constant 0 : index
    %76 = vector.load %arg10[%c0_47, %c2_48, %c0_49, %c0_50] : memref<1x4x16x8xbf16, #tpu.memory_space<vmem>>, vector<1x1x16x8xbf16>
    %77 = vector.shape_cast %76 : vector<1x1x16x8xbf16> to vector<16x8xbf16>
    %78 = vector.shape_cast %75 : vector<16x8xbf16> to vector<1x1x16x8xbf16>
    tpu.vector_store %arg10[%c0_47, %c2_48, %c0_49, %c0_50], %78 {strides = array<i32>} : memref<1x4x16x8xbf16, #tpu.memory_space<vmem>>, vector<1x1x16x8xbf16>,
    %79 = vector.extract_strided_slice %28 {offsets = [0, 24], sizes = [16, 8], strides = [1, 1]} : vector<16x32xf32> to vector<16x8xf32>
    %80 = arith.truncf %79 : vector<16x8xf32> to vector<16x8xbf16>
    %c0_51 = arith.constant 0 : index
    %c3 = arith.constant 3 : index
    %c0_52 = arith.constant 0 : index
    %c0_53 = arith.constant 0 : index
    %81 = vector.load %arg8[%c0_51, %c3, %c0_52, %c0_53] : memref<1x4x16x8xbf16, #tpu.memory_space<vmem>>, vector<1x1x16x8xbf16>
    %82 = vector.shape_cast %81 : vector<1x1x16x8xbf16> to vector<16x8xbf16>
    %83 = vector.shape_cast %80 : vector<16x8xbf16> to vector<1x1x16x8xbf16>
    tpu.vector_store %arg8[%c0_51, %c3, %c0_52, %c0_53], %83 {strides = array<i32>} : memref<1x4x16x8xbf16, #tpu.memory_space<vmem>>, vector<1x1x16x8xbf16>,
    %84 = vector.extract_strided_slice %33 {offsets = [0, 24], sizes = [16, 8], strides = [1, 1]} : vector<16x32xf32> to vector<16x8xf32>
    %85 = arith.truncf %84 : vector<16x8xf32> to vector<16x8xbf16>
    %c0_54 = arith.constant 0 : index
    %c3_55 = arith.constant 3 : index
    %c0_56 = arith.constant 0 : index
    %c0_57 = arith.constant 0 : index
    %86 = vector.load %arg9[%c0_54, %c3_55, %c0_56, %c0_57] : memref<1x4x16x8xbf16, #tpu.memory_space<vmem>>, vector<1x1x16x8xbf16>
    %87 = vector.shape_cast %86 : vector<1x1x16x8xbf16> to vector<16x8xbf16>
    %88 = vector.shape_cast %85 : vector<16x8xbf16> to vector<1x1x16x8xbf16>
    tpu.vector_store %arg9[%c0_54, %c3_55, %c0_56, %c0_57], %88 {strides = array<i32>} : memref<1x4x16x8xbf16, #tpu.memory_space<vmem>>, vector<1x1x16x8xbf16>,
    %89 = vector.extract_strided_slice %20 {offsets = [0, 24], sizes = [16, 8], strides = [1, 1]} : vector<16x32xf32> to vector<16x8xf32>
    %90 = arith.truncf %89 : vector<16x8xf32> to vector<16x8xbf16>
    %c0_58 = arith.constant 0 : index
    %c3_59 = arith.constant 3 : index
    %c0_60 = arith.constant 0 : index
    %c0_61 = arith.constant 0 : index
    %91 = vector.load %arg10[%c0_58, %c3_59, %c0_60, %c0_61] : memref<1x4x16x8xbf16, #tpu.memory_space<vmem>>, vector<1x1x16x8xbf16>
    %92 = vector.shape_cast %91 : vector<1x1x16x8xbf16> to vector<16x8xbf16>
    %93 = vector.shape_cast %90 : vector<16x8xbf16> to vector<1x1x16x8xbf16>
    tpu.vector_store %arg10[%c0_58, %c3_59, %c0_60, %c0_61], %93 {strides = array<i32>} : memref<1x4x16x8xbf16, #tpu.memory_space<vmem>>, vector<1x1x16x8xbf16>,
    return
  }
  func.func @transform_0(%arg0: i32, %arg1: i32) -> (i32, i32, i32) {
    %c0_i32 = arith.constant 0 : i32
    %c0_i32_0 = arith.constant 0 : i32
    return %arg0, %arg1, %c0_i32 : i32, i32, i32
  }
  func.func @transform_1(%arg0: i32, %arg1: i32) -> (i32, i32) {
    %c0_i32 = arith.constant 0 : i32
    %c0_i32_0 = arith.constant 0 : i32
    %c0_i32_1 = arith.constant 0 : i32
    return %c0_i32, %c0_i32_0 : i32, i32
  }
  func.func @transform_2(%arg0: i32, %arg1: i32) -> (i32, i32) {
    %c0_i32 = arith.constant 0 : i32
    %c0_i32_0 = arith.constant 0 : i32
    %c0_i32_1 = arith.constant 0 : i32
    return %c0_i32, %c0_i32_0 : i32, i32
  }
  func.func @transform_3(%arg0: i32, %arg1: i32) -> (i32, i32) {
    %c0_i32 = arith.constant 0 : i32
    %c0_i32_0 = arith.constant 0 : i32
    %c0_i32_1 = arith.constant 0 : i32
    return %c0_i32, %c0_i32_0 : i32, i32
  }
  func.func @transform_4(%arg0: i32, %arg1: i32) -> (i32, i32) {
    %c0_i32 = arith.constant 0 : i32
    %c0_i32_0 = arith.constant 0 : i32
    return %arg1, %c0_i32 : i32, i32
  }
  func.func @transform_5(%arg0: i32, %arg1: i32) -> (i32, i32) {
    %c0_i32 = arith.constant 0 : i32
    %c0_i32_0 = arith.constant 0 : i32
    return %arg1, %c0_i32 : i32, i32
  }
  func.func @transform_6(%arg0: i32, %arg1: i32) -> (i32, i32, i32, i32) {
    %c0_i32 = arith.constant 0 : i32
    %c0_i32_0 = arith.constant 0 : i32
    %c0_i32_1 = arith.constant 0 : i32
    return %arg0, %c0_i32, %arg1, %c0_i32_0 : i32, i32, i32, i32
  }
  func.func @transform_7(%arg0: i32, %arg1: i32) -> (i32, i32, i32, i32) {
    %c0_i32 = arith.constant 0 : i32
    %c0_i32_0 = arith.constant 0 : i32
    %c0_i32_1 = arith.constant 0 : i32
    return %arg0, %c0_i32, %arg1, %c0_i32_0 : i32, i32, i32, i32
  }
  func.func @transform_8(%arg0: i32, %arg1: i32) -> (i32, i32, i32, i32) {
    %c0_i32 = arith.constant 0 : i32
    %c0_i32_0 = arith.constant 0 : i32
    %c0_i32_1 = arith.constant 0 : i32
    return %arg0, %c0_i32, %arg1, %c0_i32_0 : i32, i32, i32, i32
  }
}

module attributes {stable_mosaic.version = 11 : i64} {
  func.func @qkv_rope_kernel(%arg0: i32, %arg1: i32, %arg2: memref<1x8x32xf32, #tpu.memory_space<vmem>>, %arg3: memref<1x32xf32, #tpu.memory_space<vmem>>, %arg4: memref<32x96xbf16, #tpu.memory_space<vmem>>, %arg5: memref<32x32xbf16, #tpu.memory_space<vmem>>, %arg6: memref<8x32xf32, #tpu.memory_space<vmem>>, %arg7: memref<8x32xf32, #tpu.memory_space<vmem>>, %arg8: memref<1x4x8x8xbf16, #tpu.memory_space<vmem>>, %arg9: memref<1x4x8x8xbf16, #tpu.memory_space<vmem>>, %arg10: memref<1x4x8x8xbf16, #tpu.memory_space<vmem>>) attributes {dimension_semantics = [#tpu.dimension_semantics<parallel>, #tpu.dimension_semantics<parallel>], iteration_bounds = array<i64: 2, 1>, scalar_prefetch = 0 : i64, scratch_operands = 0 : i64, tpu.core_type = #tpu.core_type<tc>, window_params = [{transform_indices = @transform_0, window_bounds = array<i64: 1, 8, 32>}, {pipeline_mode = #tpu.pipeline_mode<synchronous>, transform_indices = @transform_1, window_bounds = array<i64: 1, 32>}, {pipeline_mode = #tpu.pipeline_mode<synchronous>, transform_indices = @transform_2, window_bounds = array<i64: 32, 96>}, {pipeline_mode = #tpu.pipeline_mode<synchronous>, transform_indices = @transform_3, window_bounds = array<i64: 32, 32>}, {transform_indices = @transform_4, window_bounds = array<i64: 8, 32>}, {transform_indices = @transform_5, window_bounds = array<i64: 8, 32>}, {transform_indices = @transform_6, window_bounds = array<i64: 1, 4, 8, 8>}, {transform_indices = @transform_7, window_bounds = array<i64: 1, 4, 8, 8>}, {transform_indices = @transform_8, window_bounds = array<i64: 1, 4, 8, 8>}]} {
    %c0 = arith.constant 0 : index
    %c0_0 = arith.constant 0 : index
    %c0_1 = arith.constant 0 : index
    %0 = vector.load %arg2[%c0, %c0_0, %c0_1] : memref<1x8x32xf32, #tpu.memory_space<vmem>>, vector<1x8x32xf32>
    %1 = vector.shape_cast %0 : vector<1x8x32xf32> to vector<8x32xf32>
    %2 = arith.mulf %1, %1 : vector<8x32xf32>
    %cst = arith.constant dense<0.000000e+00> : vector<8xf32>
    %3 = vector.multi_reduction <add>, %2, %cst [1] : vector<8x32xf32> to vector<8xf32>
    %4 = vector.shape_cast %3 : vector<8xf32> to vector<8x1xf32>
    %cst_2 = arith.constant 3.200000e+01 : f32
    %5 = vector.broadcast %cst_2 : f32 to vector<8x1xf32>
    %6 = arith.divf %4, %5 : vector<8x1xf32>
    %cst_3 = arith.constant 9.99999974E-6 : f32
    %7 = vector.broadcast %cst_3 : f32 to vector<8x1xf32>
    %8 = arith.addf %6, %7 : vector<8x1xf32>
    %9 = math.rsqrt %8 : vector<8x1xf32>
    %10 = vector.broadcast %9 : vector<8x1xf32> to vector<8x32xf32>
    %11 = arith.mulf %1, %10 : vector<8x32xf32>
    %c0_4 = arith.constant 0 : index
    %c0_5 = arith.constant 0 : index
    %12 = vector.load %arg3[%c0_4, %c0_5] : memref<1x32xf32, #tpu.memory_space<vmem>>, vector<1x32xf32>
    %13 = vector.broadcast %12 : vector<1x32xf32> to vector<8x32xf32>
    %14 = arith.mulf %11, %13 : vector<8x32xf32>
    %15 = arith.truncf %14 : vector<8x32xf32> to vector<8x32xbf16>
    %c0_6 = arith.constant 0 : index
    %c0_7 = arith.constant 0 : index
    %16 = vector.load %arg4[%c0_6, %c0_7] : memref<32x96xbf16, #tpu.memory_space<vmem>>, vector<32x96xbf16>
    %cst_8 = arith.constant dense<0.000000e+00> : vector<8x96xf32>
    %17 = tpu.matmul %15, %16, %cst_8 {dimension_numbers = #tpu.dot_dimension_numbers<[1], [0], [0], [1], [0, 0, 1, 1], [], []>} : vector<8x32xbf16>, vector<32x96xbf16>, vector<8x96xf32> -> vector<8x96xf32>
    %18 = vector.extract_strided_slice %17 {offsets = [0, 0], sizes = [8, 32], strides = [1, 1]} : vector<8x96xf32> to vector<8x32xf32>
    %19 = vector.extract_strided_slice %17 {offsets = [0, 32], sizes = [8, 32], strides = [1, 1]} : vector<8x96xf32> to vector<8x32xf32>
    %20 = vector.extract_strided_slice %17 {offsets = [0, 64], sizes = [8, 32], strides = [1, 1]} : vector<8x96xf32> to vector<8x32xf32>
    %c0_9 = arith.constant 0 : index
    %c0_10 = arith.constant 0 : index
    %21 = vector.load %arg6[%c0_9, %c0_10] : memref<8x32xf32, #tpu.memory_space<vmem>>, vector<8x32xf32>
    %c0_11 = arith.constant 0 : index
    %c0_12 = arith.constant 0 : index
    %22 = vector.load %arg7[%c0_11, %c0_12] : memref<8x32xf32, #tpu.memory_space<vmem>>, vector<8x32xf32>
    %c0_13 = arith.constant 0 : index
    %c0_14 = arith.constant 0 : index
    %23 = vector.load %arg5[%c0_13, %c0_14] : memref<32x32xbf16, #tpu.memory_space<vmem>>, vector<32x32xbf16>
    %24 = arith.truncf %18 : vector<8x32xf32> to vector<8x32xbf16>
    %cst_15 = arith.constant dense<0.000000e+00> : vector<8x32xf32>
    %25 = tpu.matmul %24, %23, %cst_15 {dimension_numbers = #tpu.dot_dimension_numbers<[1], [0], [0], [1], [0, 0, 1, 1], [], []>} : vector<8x32xbf16>, vector<32x32xbf16>, vector<8x32xf32> -> vector<8x32xf32>
    %26 = arith.mulf %18, %21 : vector<8x32xf32>
    %27 = arith.mulf %25, %22 : vector<8x32xf32>
    %28 = arith.addf %26, %27 : vector<8x32xf32>
    %29 = arith.truncf %19 : vector<8x32xf32> to vector<8x32xbf16>
    %cst_16 = arith.constant dense<0.000000e+00> : vector<8x32xf32>
    %30 = tpu.matmul %29, %23, %cst_16 {dimension_numbers = #tpu.dot_dimension_numbers<[1], [0], [0], [1], [0, 0, 1, 1], [], []>} : vector<8x32xbf16>, vector<32x32xbf16>, vector<8x32xf32> -> vector<8x32xf32>
    %31 = arith.mulf %19, %21 : vector<8x32xf32>
    %32 = arith.mulf %30, %22 : vector<8x32xf32>
    %33 = arith.addf %31, %32 : vector<8x32xf32>
    %34 = vector.extract_strided_slice %28 {offsets = [0, 0], sizes = [8, 8], strides = [1, 1]} : vector<8x32xf32> to vector<8x8xf32>
    %35 = arith.truncf %34 : vector<8x8xf32> to vector<8x8xbf16>
    %c0_17 = arith.constant 0 : index
    %c0_18 = arith.constant 0 : index
    %c0_19 = arith.constant 0 : index
    %c0_20 = arith.constant 0 : index
    %36 = vector.load %arg8[%c0_17, %c0_18, %c0_19, %c0_20] : memref<1x4x8x8xbf16, #tpu.memory_space<vmem>>, vector<1x1x8x8xbf16>
    %37 = vector.shape_cast %36 : vector<1x1x8x8xbf16> to vector<8x8xbf16>
    %38 = vector.shape_cast %35 : vector<8x8xbf16> to vector<1x1x8x8xbf16>
    tpu.vector_store %arg8[%c0_17, %c0_18, %c0_19, %c0_20], %38 {strides = array<i32>} : memref<1x4x8x8xbf16, #tpu.memory_space<vmem>>, vector<1x1x8x8xbf16>,
    %39 = vector.extract_strided_slice %33 {offsets = [0, 0], sizes = [8, 8], strides = [1, 1]} : vector<8x32xf32> to vector<8x8xf32>
    %40 = arith.truncf %39 : vector<8x8xf32> to vector<8x8xbf16>
    %c0_21 = arith.constant 0 : index
    %c0_22 = arith.constant 0 : index
    %c0_23 = arith.constant 0 : index
    %c0_24 = arith.constant 0 : index
    %41 = vector.load %arg9[%c0_21, %c0_22, %c0_23, %c0_24] : memref<1x4x8x8xbf16, #tpu.memory_space<vmem>>, vector<1x1x8x8xbf16>
    %42 = vector.shape_cast %41 : vector<1x1x8x8xbf16> to vector<8x8xbf16>
    %43 = vector.shape_cast %40 : vector<8x8xbf16> to vector<1x1x8x8xbf16>
    tpu.vector_store %arg9[%c0_21, %c0_22, %c0_23, %c0_24], %43 {strides = array<i32>} : memref<1x4x8x8xbf16, #tpu.memory_space<vmem>>, vector<1x1x8x8xbf16>,
    %44 = vector.extract_strided_slice %20 {offsets = [0, 0], sizes = [8, 8], strides = [1, 1]} : vector<8x32xf32> to vector<8x8xf32>
    %45 = arith.truncf %44 : vector<8x8xf32> to vector<8x8xbf16>
    %c0_25 = arith.constant 0 : index
    %c0_26 = arith.constant 0 : index
    %c0_27 = arith.constant 0 : index
    %c0_28 = arith.constant 0 : index
    %46 = vector.load %arg10[%c0_25, %c0_26, %c0_27, %c0_28] : memref<1x4x8x8xbf16, #tpu.memory_space<vmem>>, vector<1x1x8x8xbf16>
    %47 = vector.shape_cast %46 : vector<1x1x8x8xbf16> to vector<8x8xbf16>
    %48 = vector.shape_cast %45 : vector<8x8xbf16> to vector<1x1x8x8xbf16>
    tpu.vector_store %arg10[%c0_25, %c0_26, %c0_27, %c0_28], %48 {strides = array<i32>} : memref<1x4x8x8xbf16, #tpu.memory_space<vmem>>, vector<1x1x8x8xbf16>,
    %49 = vector.extract_strided_slice %28 {offsets = [0, 8], sizes = [8, 8], strides = [1, 1]} : vector<8x32xf32> to vector<8x8xf32>
    %50 = arith.truncf %49 : vector<8x8xf32> to vector<8x8xbf16>
    %c0_29 = arith.constant 0 : index
    %c1 = arith.constant 1 : index
    %c0_30 = arith.constant 0 : index
    %c0_31 = arith.constant 0 : index
    %51 = vector.load %arg8[%c0_29, %c1, %c0_30, %c0_31] : memref<1x4x8x8xbf16, #tpu.memory_space<vmem>>, vector<1x1x8x8xbf16>
    %52 = vector.shape_cast %51 : vector<1x1x8x8xbf16> to vector<8x8xbf16>
    %53 = vector.shape_cast %50 : vector<8x8xbf16> to vector<1x1x8x8xbf16>
    tpu.vector_store %arg8[%c0_29, %c1, %c0_30, %c0_31], %53 {strides = array<i32>} : memref<1x4x8x8xbf16, #tpu.memory_space<vmem>>, vector<1x1x8x8xbf16>,
    %54 = vector.extract_strided_slice %33 {offsets = [0, 8], sizes = [8, 8], strides = [1, 1]} : vector<8x32xf32> to vector<8x8xf32>
    %55 = arith.truncf %54 : vector<8x8xf32> to vector<8x8xbf16>
    %c0_32 = arith.constant 0 : index
    %c1_33 = arith.constant 1 : index
    %c0_34 = arith.constant 0 : index
    %c0_35 = arith.constant 0 : index
    %56 = vector.load %arg9[%c0_32, %c1_33, %c0_34, %c0_35] : memref<1x4x8x8xbf16, #tpu.memory_space<vmem>>, vector<1x1x8x8xbf16>
    %57 = vector.shape_cast %56 : vector<1x1x8x8xbf16> to vector<8x8xbf16>
    %58 = vector.shape_cast %55 : vector<8x8xbf16> to vector<1x1x8x8xbf16>
    tpu.vector_store %arg9[%c0_32, %c1_33, %c0_34, %c0_35], %58 {strides = array<i32>} : memref<1x4x8x8xbf16, #tpu.memory_space<vmem>>, vector<1x1x8x8xbf16>,
    %59 = vector.extract_strided_slice %20 {offsets = [0, 8], sizes = [8, 8], strides = [1, 1]} : vector<8x32xf32> to vector<8x8xf32>
    %60 = arith.truncf %59 : vector<8x8xf32> to vector<8x8xbf16>
    %c0_36 = arith.constant 0 : index
    %c1_37 = arith.constant 1 : index
    %c0_38 = arith.constant 0 : index
    %c0_39 = arith.constant 0 : index
    %61 = vector.load %arg10[%c0_36, %c1_37, %c0_38, %c0_39] : memref<1x4x8x8xbf16, #tpu.memory_space<vmem>>, vector<1x1x8x8xbf16>
    %62 = vector.shape_cast %61 : vector<1x1x8x8xbf16> to vector<8x8xbf16>
    %63 = vector.shape_cast %60 : vector<8x8xbf16> to vector<1x1x8x8xbf16>
    tpu.vector_store %arg10[%c0_36, %c1_37, %c0_38, %c0_39], %63 {strides = array<i32>} : memref<1x4x8x8xbf16, #tpu.memory_space<vmem>>, vector<1x1x8x8xbf16>,
    %64 = vector.extract_strided_slice %28 {offsets = [0, 16], sizes = [8, 8], strides = [1, 1]} : vector<8x32xf32> to vector<8x8xf32>
    %65 = arith.truncf %64 : vector<8x8xf32> to vector<8x8xbf16>
    %c0_40 = arith.constant 0 : index
    %c2 = arith.constant 2 : index
    %c0_41 = arith.constant 0 : index
    %c0_42 = arith.constant 0 : index
    %66 = vector.load %arg8[%c0_40, %c2, %c0_41, %c0_42] : memref<1x4x8x8xbf16, #tpu.memory_space<vmem>>, vector<1x1x8x8xbf16>
    %67 = vector.shape_cast %66 : vector<1x1x8x8xbf16> to vector<8x8xbf16>
    %68 = vector.shape_cast %65 : vector<8x8xbf16> to vector<1x1x8x8xbf16>
    tpu.vector_store %arg8[%c0_40, %c2, %c0_41, %c0_42], %68 {strides = array<i32>} : memref<1x4x8x8xbf16, #tpu.memory_space<vmem>>, vector<1x1x8x8xbf16>,
    %69 = vector.extract_strided_slice %33 {offsets = [0, 16], sizes = [8, 8], strides = [1, 1]} : vector<8x32xf32> to vector<8x8xf32>
    %70 = arith.truncf %69 : vector<8x8xf32> to vector<8x8xbf16>
    %c0_43 = arith.constant 0 : index
    %c2_44 = arith.constant 2 : index
    %c0_45 = arith.constant 0 : index
    %c0_46 = arith.constant 0 : index
    %71 = vector.load %arg9[%c0_43, %c2_44, %c0_45, %c0_46] : memref<1x4x8x8xbf16, #tpu.memory_space<vmem>>, vector<1x1x8x8xbf16>
    %72 = vector.shape_cast %71 : vector<1x1x8x8xbf16> to vector<8x8xbf16>
    %73 = vector.shape_cast %70 : vector<8x8xbf16> to vector<1x1x8x8xbf16>
    tpu.vector_store %arg9[%c0_43, %c2_44, %c0_45, %c0_46], %73 {strides = array<i32>} : memref<1x4x8x8xbf16, #tpu.memory_space<vmem>>, vector<1x1x8x8xbf16>,
    %74 = vector.extract_strided_slice %20 {offsets = [0, 16], sizes = [8, 8], strides = [1, 1]} : vector<8x32xf32> to vector<8x8xf32>
    %75 = arith.truncf %74 : vector<8x8xf32> to vector<8x8xbf16>
    %c0_47 = arith.constant 0 : index
    %c2_48 = arith.constant 2 : index
    %c0_49 = arith.constant 0 : index
    %c0_50 = arith.constant 0 : index
    %76 = vector.load %arg10[%c0_47, %c2_48, %c0_49, %c0_50] : memref<1x4x8x8xbf16, #tpu.memory_space<vmem>>, vector<1x1x8x8xbf16>
    %77 = vector.shape_cast %76 : vector<1x1x8x8xbf16> to vector<8x8xbf16>
    %78 = vector.shape_cast %75 : vector<8x8xbf16> to vector<1x1x8x8xbf16>
    tpu.vector_store %arg10[%c0_47, %c2_48, %c0_49, %c0_50], %78 {strides = array<i32>} : memref<1x4x8x8xbf16, #tpu.memory_space<vmem>>, vector<1x1x8x8xbf16>,
    %79 = vector.extract_strided_slice %28 {offsets = [0, 24], sizes = [8, 8], strides = [1, 1]} : vector<8x32xf32> to vector<8x8xf32>
    %80 = arith.truncf %79 : vector<8x8xf32> to vector<8x8xbf16>
    %c0_51 = arith.constant 0 : index
    %c3 = arith.constant 3 : index
    %c0_52 = arith.constant 0 : index
    %c0_53 = arith.constant 0 : index
    %81 = vector.load %arg8[%c0_51, %c3, %c0_52, %c0_53] : memref<1x4x8x8xbf16, #tpu.memory_space<vmem>>, vector<1x1x8x8xbf16>
    %82 = vector.shape_cast %81 : vector<1x1x8x8xbf16> to vector<8x8xbf16>
    %83 = vector.shape_cast %80 : vector<8x8xbf16> to vector<1x1x8x8xbf16>
    tpu.vector_store %arg8[%c0_51, %c3, %c0_52, %c0_53], %83 {strides = array<i32>} : memref<1x4x8x8xbf16, #tpu.memory_space<vmem>>, vector<1x1x8x8xbf16>,
    %84 = vector.extract_strided_slice %33 {offsets = [0, 24], sizes = [8, 8], strides = [1, 1]} : vector<8x32xf32> to vector<8x8xf32>
    %85 = arith.truncf %84 : vector<8x8xf32> to vector<8x8xbf16>
    %c0_54 = arith.constant 0 : index
    %c3_55 = arith.constant 3 : index
    %c0_56 = arith.constant 0 : index
    %c0_57 = arith.constant 0 : index
    %86 = vector.load %arg9[%c0_54, %c3_55, %c0_56, %c0_57] : memref<1x4x8x8xbf16, #tpu.memory_space<vmem>>, vector<1x1x8x8xbf16>
    %87 = vector.shape_cast %86 : vector<1x1x8x8xbf16> to vector<8x8xbf16>
    %88 = vector.shape_cast %85 : vector<8x8xbf16> to vector<1x1x8x8xbf16>
    tpu.vector_store %arg9[%c0_54, %c3_55, %c0_56, %c0_57], %88 {strides = array<i32>} : memref<1x4x8x8xbf16, #tpu.memory_space<vmem>>, vector<1x1x8x8xbf16>,
    %89 = vector.extract_strided_slice %20 {offsets = [0, 24], sizes = [8, 8], strides = [1, 1]} : vector<8x32xf32> to vector<8x8xf32>
    %90 = arith.truncf %89 : vector<8x8xf32> to vector<8x8xbf16>
    %c0_58 = arith.constant 0 : index
    %c3_59 = arith.constant 3 : index
    %c0_60 = arith.constant 0 : index
    %c0_61 = arith.constant 0 : index
    %91 = vector.load %arg10[%c0_58, %c3_59, %c0_60, %c0_61] : memref<1x4x8x8xbf16, #tpu.memory_space<vmem>>, vector<1x1x8x8xbf16>
    %92 = vector.shape_cast %91 : vector<1x1x8x8xbf16> to vector<8x8xbf16>
    %93 = vector.shape_cast %90 : vector<8x8xbf16> to vector<1x1x8x8xbf16>
    tpu.vector_store %arg10[%c0_58, %c3_59, %c0_60, %c0_61], %93 {strides = array<i32>} : memref<1x4x8x8xbf16, #tpu.memory_space<vmem>>, vector<1x1x8x8xbf16>,
    return
  }
  func.func @transform_0(%arg0: i32, %arg1: i32) -> (i32, i32, i32) {
    %c0_i32 = arith.constant 0 : i32
    %c0_i32_0 = arith.constant 0 : i32
    return %arg0, %arg1, %c0_i32 : i32, i32, i32
  }
  func.func @transform_1(%arg0: i32, %arg1: i32) -> (i32, i32) {
    %c0_i32 = arith.constant 0 : i32
    %c0_i32_0 = arith.constant 0 : i32
    %c0_i32_1 = arith.constant 0 : i32
    return %c0_i32, %c0_i32_0 : i32, i32
  }
  func.func @transform_2(%arg0: i32, %arg1: i32) -> (i32, i32) {
    %c0_i32 = arith.constant 0 : i32
    %c0_i32_0 = arith.constant 0 : i32
    %c0_i32_1 = arith.constant 0 : i32
    return %c0_i32, %c0_i32_0 : i32, i32
  }
  func.func @transform_3(%arg0: i32, %arg1: i32) -> (i32, i32) {
    %c0_i32 = arith.constant 0 : i32
    %c0_i32_0 = arith.constant 0 : i32
    %c0_i32_1 = arith.constant 0 : i32
    return %c0_i32, %c0_i32_0 : i32, i32
  }
  func.func @transform_4(%arg0: i32, %arg1: i32) -> (i32, i32) {
    %c0_i32 = arith.constant 0 : i32
    %c0_i32_0 = arith.constant 0 : i32
    return %arg1, %c0_i32 : i32, i32
  }
  func.func @transform_5(%arg0: i32, %arg1: i32) -> (i32, i32) {
    %c0_i32 = arith.constant 0 : i32
    %c0_i32_0 = arith.constant 0 : i32
    return %arg1, %c0_i32 : i32, i32
  }
  func.func @transform_6(%arg0: i32, %arg1: i32) -> (i32, i32, i32, i32) {
    %c0_i32 = arith.constant 0 : i32
    %c0_i32_0 = arith.constant 0 : i32
    %c0_i32_1 = arith.constant 0 : i32
    return %arg0, %c0_i32, %arg1, %c0_i32_0 : i32, i32, i32, i32
  }
  func.func @transform_7(%arg0: i32, %arg1: i32) -> (i32, i32, i32, i32) {
    %c0_i32 = arith.constant 0 : i32
    %c0_i32_0 = arith.constant 0 : i32
    %c0_i32_1 = arith.constant 0 : i32
    return %arg0, %c0_i32, %arg1, %c0_i32_0 : i32, i32, i32, i32
  }
  func.func @transform_8(%arg0: i32, %arg1: i32) -> (i32, i32, i32, i32) {
    %c0_i32 = arith.constant 0 : i32
    %c0_i32_0 = arith.constant 0 : i32
    %c0_i32_1 = arith.constant 0 : i32
    return %arg0, %c0_i32, %arg1, %c0_i32_0 : i32, i32, i32, i32
  }
}

module attributes {stable_mosaic.version = 11 : i64} {
  func.func @oproj_ffn_pool_kernel(%arg0: i32, %arg1: i32, %arg2: memref<1x16x32xf32, #tpu.memory_space<vmem>>, %arg3: memref<1x4x16x8xbf16, #tpu.memory_space<vmem>>, %arg4: memref<4x8x32xbf16, #tpu.memory_space<vmem>>, %arg5: memref<1x32xf32, #tpu.memory_space<vmem>>, %arg6: memref<32x128xbf16, #tpu.memory_space<vmem>>, %arg7: memref<64x32xbf16, #tpu.memory_space<vmem>>, %arg8: memref<8x16xf32, #tpu.memory_space<vmem>>, %arg9: memref<1x8x32xf32, #tpu.memory_space<vmem>>) attributes {dimension_semantics = [#tpu.dimension_semantics<parallel>, #tpu.dimension_semantics<parallel>], iteration_bounds = array<i64: 2, 1>, scalar_prefetch = 0 : i64, scratch_operands = 0 : i64, tpu.core_type = #tpu.core_type<tc>, window_params = [{transform_indices = @transform_0, window_bounds = array<i64: 1, 16, 32>}, {transform_indices = @transform_1, window_bounds = array<i64: 1, 4, 16, 8>}, {pipeline_mode = #tpu.pipeline_mode<synchronous>, transform_indices = @transform_2, window_bounds = array<i64: 4, 8, 32>}, {pipeline_mode = #tpu.pipeline_mode<synchronous>, transform_indices = @transform_3, window_bounds = array<i64: 1, 32>}, {pipeline_mode = #tpu.pipeline_mode<synchronous>, transform_indices = @transform_4, window_bounds = array<i64: 32, 128>}, {pipeline_mode = #tpu.pipeline_mode<synchronous>, transform_indices = @transform_5, window_bounds = array<i64: 64, 32>}, {pipeline_mode = #tpu.pipeline_mode<synchronous>, transform_indices = @transform_6, window_bounds = array<i64: 8, 16>}, {transform_indices = @transform_7, window_bounds = array<i64: 1, 8, 32>}]} {
    %c0 = arith.constant 0 : index
    %c0_0 = arith.constant 0 : index
    %c0_1 = arith.constant 0 : index
    %0 = vector.load %arg2[%c0, %c0_0, %c0_1] : memref<1x16x32xf32, #tpu.memory_space<vmem>>, vector<1x16x32xf32>
    %1 = vector.shape_cast %0 : vector<1x16x32xf32> to vector<16x32xf32>
    %cst = arith.constant 0.000000e+00 : f32
    %2 = vector.broadcast %cst : f32 to vector<16x32xf32>
    %c0_2 = arith.constant 0 : index
    %c0_3 = arith.constant 0 : index
    %c0_4 = arith.constant 0 : index
    %c0_5 = arith.constant 0 : index
    %3 = vector.load %arg3[%c0_2, %c0_3, %c0_4, %c0_5] : memref<1x4x16x8xbf16, #tpu.memory_space<vmem>>, vector<1x1x16x8xbf16>
    %4 = vector.shape_cast %3 : vector<1x1x16x8xbf16> to vector<16x8xbf16>
    %c0_6 = arith.constant 0 : index
    %c0_7 = arith.constant 0 : index
    %c0_8 = arith.constant 0 : index
    %5 = vector.load %arg4[%c0_6, %c0_7, %c0_8] : memref<4x8x32xbf16, #tpu.memory_space<vmem>>, vector<1x8x32xbf16>
    %6 = vector.shape_cast %5 : vector<1x8x32xbf16> to vector<8x32xbf16>
    %cst_9 = arith.constant dense<0.000000e+00> : vector<16x32xf32>
    %7 = tpu.matmul %4, %6, %cst_9 {dimension_numbers = #tpu.dot_dimension_numbers<[1], [0], [0], [1], [0, 0, 1, 1], [], []>} : vector<16x8xbf16>, vector<8x32xbf16>, vector<16x32xf32> -> vector<16x32xf32>
    %8 = arith.addf %2, %7 : vector<16x32xf32>
    %c0_10 = arith.constant 0 : index
    %c1 = arith.constant 1 : index
    %c0_11 = arith.constant 0 : index
    %c0_12 = arith.constant 0 : index
    %9 = vector.load %arg3[%c0_10, %c1, %c0_11, %c0_12] : memref<1x4x16x8xbf16, #tpu.memory_space<vmem>>, vector<1x1x16x8xbf16>
    %10 = vector.shape_cast %9 : vector<1x1x16x8xbf16> to vector<16x8xbf16>
    %c1_13 = arith.constant 1 : index
    %c0_14 = arith.constant 0 : index
    %c0_15 = arith.constant 0 : index
    %11 = vector.load %arg4[%c1_13, %c0_14, %c0_15] : memref<4x8x32xbf16, #tpu.memory_space<vmem>>, vector<1x8x32xbf16>
    %12 = vector.shape_cast %11 : vector<1x8x32xbf16> to vector<8x32xbf16>
    %cst_16 = arith.constant dense<0.000000e+00> : vector<16x32xf32>
    %13 = tpu.matmul %10, %12, %cst_16 {dimension_numbers = #tpu.dot_dimension_numbers<[1], [0], [0], [1], [0, 0, 1, 1], [], []>} : vector<16x8xbf16>, vector<8x32xbf16>, vector<16x32xf32> -> vector<16x32xf32>
    %14 = arith.addf %8, %13 : vector<16x32xf32>
    %c0_17 = arith.constant 0 : index
    %c2 = arith.constant 2 : index
    %c0_18 = arith.constant 0 : index
    %c0_19 = arith.constant 0 : index
    %15 = vector.load %arg3[%c0_17, %c2, %c0_18, %c0_19] : memref<1x4x16x8xbf16, #tpu.memory_space<vmem>>, vector<1x1x16x8xbf16>
    %16 = vector.shape_cast %15 : vector<1x1x16x8xbf16> to vector<16x8xbf16>
    %c2_20 = arith.constant 2 : index
    %c0_21 = arith.constant 0 : index
    %c0_22 = arith.constant 0 : index
    %17 = vector.load %arg4[%c2_20, %c0_21, %c0_22] : memref<4x8x32xbf16, #tpu.memory_space<vmem>>, vector<1x8x32xbf16>
    %18 = vector.shape_cast %17 : vector<1x8x32xbf16> to vector<8x32xbf16>
    %cst_23 = arith.constant dense<0.000000e+00> : vector<16x32xf32>
    %19 = tpu.matmul %16, %18, %cst_23 {dimension_numbers = #tpu.dot_dimension_numbers<[1], [0], [0], [1], [0, 0, 1, 1], [], []>} : vector<16x8xbf16>, vector<8x32xbf16>, vector<16x32xf32> -> vector<16x32xf32>
    %20 = arith.addf %14, %19 : vector<16x32xf32>
    %c0_24 = arith.constant 0 : index
    %c3 = arith.constant 3 : index
    %c0_25 = arith.constant 0 : index
    %c0_26 = arith.constant 0 : index
    %21 = vector.load %arg3[%c0_24, %c3, %c0_25, %c0_26] : memref<1x4x16x8xbf16, #tpu.memory_space<vmem>>, vector<1x1x16x8xbf16>
    %22 = vector.shape_cast %21 : vector<1x1x16x8xbf16> to vector<16x8xbf16>
    %c3_27 = arith.constant 3 : index
    %c0_28 = arith.constant 0 : index
    %c0_29 = arith.constant 0 : index
    %23 = vector.load %arg4[%c3_27, %c0_28, %c0_29] : memref<4x8x32xbf16, #tpu.memory_space<vmem>>, vector<1x8x32xbf16>
    %24 = vector.shape_cast %23 : vector<1x8x32xbf16> to vector<8x32xbf16>
    %cst_30 = arith.constant dense<0.000000e+00> : vector<16x32xf32>
    %25 = tpu.matmul %22, %24, %cst_30 {dimension_numbers = #tpu.dot_dimension_numbers<[1], [0], [0], [1], [0, 0, 1, 1], [], []>} : vector<16x8xbf16>, vector<8x32xbf16>, vector<16x32xf32> -> vector<16x32xf32>
    %26 = arith.addf %20, %25 : vector<16x32xf32>
    %27 = arith.addf %1, %26 : vector<16x32xf32>
    %28 = arith.mulf %27, %27 : vector<16x32xf32>
    %cst_31 = arith.constant dense<0.000000e+00> : vector<16xf32>
    %29 = vector.multi_reduction <add>, %28, %cst_31 [1] : vector<16x32xf32> to vector<16xf32>
    %30 = vector.shape_cast %29 : vector<16xf32> to vector<16x1xf32>
    %cst_32 = arith.constant 3.200000e+01 : f32
    %31 = vector.broadcast %cst_32 : f32 to vector<16x1xf32>
    %32 = arith.divf %30, %31 : vector<16x1xf32>
    %cst_33 = arith.constant 9.99999974E-6 : f32
    %33 = vector.broadcast %cst_33 : f32 to vector<16x1xf32>
    %34 = arith.addf %32, %33 : vector<16x1xf32>
    %35 = math.rsqrt %34 : vector<16x1xf32>
    %36 = vector.broadcast %35 : vector<16x1xf32> to vector<16x32xf32>
    %37 = arith.mulf %27, %36 : vector<16x32xf32>
    %c0_34 = arith.constant 0 : index
    %c0_35 = arith.constant 0 : index
    %38 = vector.load %arg5[%c0_34, %c0_35] : memref<1x32xf32, #tpu.memory_space<vmem>>, vector<1x32xf32>
    %39 = vector.broadcast %38 : vector<1x32xf32> to vector<16x32xf32>
    %40 = arith.mulf %37, %39 : vector<16x32xf32>
    %41 = arith.truncf %40 : vector<16x32xf32> to vector<16x32xbf16>
    %c0_36 = arith.constant 0 : index
    %c0_37 = arith.constant 0 : index
    %42 = vector.load %arg6[%c0_36, %c0_37] : memref<32x128xbf16, #tpu.memory_space<vmem>>, vector<32x128xbf16>
    %cst_38 = arith.constant dense<0.000000e+00> : vector<16x128xf32>
    %43 = tpu.matmul %41, %42, %cst_38 {dimension_numbers = #tpu.dot_dimension_numbers<[1], [0], [0], [1], [0, 0, 1, 1], [], []>} : vector<16x32xbf16>, vector<32x128xbf16>, vector<16x128xf32> -> vector<16x128xf32>
    %44 = vector.extract_strided_slice %43 {offsets = [0, 0], sizes = [16, 64], strides = [1, 1]} : vector<16x128xf32> to vector<16x64xf32>
    %45 = vector.extract_strided_slice %43 {offsets = [0, 64], sizes = [16, 64], strides = [1, 1]} : vector<16x128xf32> to vector<16x64xf32>
    %46 = arith.negf %44 : vector<16x64xf32>
    %47 = math.exp %46 : vector<16x64xf32>
    %cst_39 = arith.constant 1.000000e+00 : f32
    %48 = vector.broadcast %cst_39 : f32 to vector<16x64xf32>
    %49 = arith.addf %48, %47 : vector<16x64xf32>
    %50 = arith.divf %48, %49 : vector<16x64xf32>
    %51 = arith.mulf %44, %50 : vector<16x64xf32>
    %52 = arith.mulf %51, %45 : vector<16x64xf32>
    %53 = arith.truncf %52 : vector<16x64xf32> to vector<16x64xbf16>
    %c0_40 = arith.constant 0 : index
    %c0_41 = arith.constant 0 : index
    %54 = vector.load %arg7[%c0_40, %c0_41] : memref<64x32xbf16, #tpu.memory_space<vmem>>, vector<64x32xbf16>
    %cst_42 = arith.constant dense<0.000000e+00> : vector<16x32xf32>
    %55 = tpu.matmul %53, %54, %cst_42 {dimension_numbers = #tpu.dot_dimension_numbers<[1], [0], [0], [1], [0, 0, 1, 1], [], []>} : vector<16x64xbf16>, vector<64x32xbf16>, vector<16x32xf32> -> vector<16x32xf32>
    %56 = arith.addf %27, %55 : vector<16x32xf32>
    %c0_43 = arith.constant 0 : index
    %c0_44 = arith.constant 0 : index
    %57 = vector.load %arg8[%c0_43, %c0_44] : memref<8x16xf32, #tpu.memory_space<vmem>>, vector<8x16xf32>
    %cst_45 = arith.constant dense<0.000000e+00> : vector<8x32xf32>
    %58 = tpu.matmul %57, %56, %cst_45 {dimension_numbers = #tpu.dot_dimension_numbers<[1], [0], [0], [1], [0, 0, 1, 1], [], []>} : vector<8x16xf32>, vector<16x32xf32>, vector<8x32xf32> -> vector<8x32xf32>
    %c0_46 = arith.constant 0 : index
    %c0_47 = arith.constant 0 : index
    %c0_48 = arith.constant 0 : index
    %59 = vector.load %arg9[%c0_46, %c0_47, %c0_48] : memref<1x8x32xf32, #tpu.memory_space<vmem>>, vector<1x8x32xf32>
    %60 = vector.shape_cast %59 : vector<1x8x32xf32> to vector<8x32xf32>
    %61 = vector.shape_cast %58 : vector<8x32xf32> to vector<1x8x32xf32>
    tpu.vector_store %arg9[%c0_46, %c0_47, %c0_48], %61 {strides = array<i32>} : memref<1x8x32xf32, #tpu.memory_space<vmem>>, vector<1x8x32xf32>,
    return
  }
  func.func @transform_0(%arg0: i32, %arg1: i32) -> (i32, i32, i32) {
    %c0_i32 = arith.constant 0 : i32
    %c0_i32_0 = arith.constant 0 : i32
    return %arg0, %arg1, %c0_i32 : i32, i32, i32
  }
  func.func @transform_1(%arg0: i32, %arg1: i32) -> (i32, i32, i32, i32) {
    %c0_i32 = arith.constant 0 : i32
    %c0_i32_0 = arith.constant 0 : i32
    %c0_i32_1 = arith.constant 0 : i32
    return %arg0, %c0_i32, %arg1, %c0_i32_0 : i32, i32, i32, i32
  }
  func.func @transform_2(%arg0: i32, %arg1: i32) -> (i32, i32, i32) {
    %c0_i32 = arith.constant 0 : i32
    %c0_i32_0 = arith.constant 0 : i32
    %c0_i32_1 = arith.constant 0 : i32
    %c0_i32_2 = arith.constant 0 : i32
    return %c0_i32, %c0_i32_0, %c0_i32_1 : i32, i32, i32
  }
  func.func @transform_3(%arg0: i32, %arg1: i32) -> (i32, i32) {
    %c0_i32 = arith.constant 0 : i32
    %c0_i32_0 = arith.constant 0 : i32
    %c0_i32_1 = arith.constant 0 : i32
    return %c0_i32, %c0_i32_0 : i32, i32
  }
  func.func @transform_4(%arg0: i32, %arg1: i32) -> (i32, i32) {
    %c0_i32 = arith.constant 0 : i32
    %c0_i32_0 = arith.constant 0 : i32
    %c0_i32_1 = arith.constant 0 : i32
    return %c0_i32, %c0_i32_0 : i32, i32
  }
  func.func @transform_5(%arg0: i32, %arg1: i32) -> (i32, i32) {
    %c0_i32 = arith.constant 0 : i32
    %c0_i32_0 = arith.constant 0 : i32
    %c0_i32_1 = arith.constant 0 : i32
    return %c0_i32, %c0_i32_0 : i32, i32
  }
  func.func @transform_6(%arg0: i32, %arg1: i32) -> (i32, i32) {
    %c0_i32 = arith.constant 0 : i32
    %c0_i32_0 = arith.constant 0 : i32
    %c0_i32_1 = arith.constant 0 : i32
    return %c0_i32, %c0_i32_0 : i32, i32
  }
  func.func @transform_7(%arg0: i32, %arg1: i32) -> (i32, i32, i32) {
    %c0_i32 = arith.constant 0 : i32
    %c0_i32_0 = arith.constant 0 : i32
    return %arg0, %arg1, %c0_i32 : i32, i32, i32
  }
}

module attributes {stable_mosaic.version = 11 : i64} {
  func.func @flash_attn_kernel(%arg0: i32, %arg1: i32, %arg2: i32, %arg3: i32, %arg4: memref<1x1x8x8xbf16, #tpu.memory_space<vmem>>, %arg5: memref<1x1x8x8xbf16, #tpu.memory_space<vmem>>, %arg6: memref<1x1x8x8xbf16, #tpu.memory_space<vmem>>, %arg7: memref<1x1x8x8xbf16, #tpu.memory_space<vmem>>, %arg8: memref<8x1xf32, #tpu.memory_space<vmem>>, %arg9: memref<8x1xf32, #tpu.memory_space<vmem>>, %arg10: memref<8x8xf32, #tpu.memory_space<vmem>>) attributes {dimension_semantics = [#tpu.dimension_semantics<parallel>, #tpu.dimension_semantics<parallel>, #tpu.dimension_semantics<parallel>, #tpu.dimension_semantics<arbitrary>], iteration_bounds = array<i64: 2, 4, 1, 1>, scalar_prefetch = 0 : i64, scratch_operands = 3 : i64, tpu.core_type = #tpu.core_type<tc>, window_params = [{transform_indices = @transform_0, window_bounds = array<i64: 1, 1, 8, 8>}, {transform_indices = @transform_1, window_bounds = array<i64: 1, 1, 8, 8>}, {transform_indices = @transform_2, window_bounds = array<i64: 1, 1, 8, 8>}, {transform_indices = @transform_3, window_bounds = array<i64: 1, 1, 8, 8>}]} {
    %c0_i32 = arith.constant 0 : i32
    %0 = arith.cmpi eq, %arg3, %c0_i32 : i32
    %1 = arith.extui %0 : i1 to i32
    %c0_i32_0 = arith.constant 0 : i32
    %2 = arith.cmpi ne, %1, %c0_i32_0 : i32
    scf.if %2 {
      %cst_30 = arith.constant 0xFF800000 : f32
      %38 = vector.broadcast %cst_30 : f32 to vector<8x1xf32>
      %c0_31 = arith.constant 0 : index
      %c0_32 = arith.constant 0 : index
      %39 = vector.load %arg8[%c0_31, %c0_32] : memref<8x1xf32, #tpu.memory_space<vmem>>, vector<8x1xf32>
      tpu.vector_store %arg8[%c0_31, %c0_32], %38 {strides = array<i32>} : memref<8x1xf32, #tpu.memory_space<vmem>>, vector<8x1xf32>,
      %cst_33 = arith.constant 0.000000e+00 : f32
      %40 = vector.broadcast %cst_33 : f32 to vector<8x1xf32>
      %c0_34 = arith.constant 0 : index
      %c0_35 = arith.constant 0 : index
      %41 = vector.load %arg9[%c0_34, %c0_35] : memref<8x1xf32, #tpu.memory_space<vmem>>, vector<8x1xf32>
      tpu.vector_store %arg9[%c0_34, %c0_35], %40 {strides = array<i32>} : memref<8x1xf32, #tpu.memory_space<vmem>>, vector<8x1xf32>,
      %cst_36 = arith.constant 0.000000e+00 : f32
      %42 = vector.broadcast %cst_36 : f32 to vector<8x8xf32>
      %c0_37 = arith.constant 0 : index
      %c0_38 = arith.constant 0 : index
      %43 = vector.load %arg10[%c0_37, %c0_38] : memref<8x8xf32, #tpu.memory_space<vmem>>, vector<8x8xf32>
      tpu.vector_store %arg10[%c0_37, %c0_38], %42 {strides = array<i32>} : memref<8x8xf32, #tpu.memory_space<vmem>>, vector<8x8xf32>,
    } else {
    }
    %c0 = arith.constant 0 : index
    %c0_1 = arith.constant 0 : index
    %c0_2 = arith.constant 0 : index
    %c0_3 = arith.constant 0 : index
    %3 = vector.load %arg4[%c0, %c0_1, %c0_2, %c0_3] : memref<1x1x8x8xbf16, #tpu.memory_space<vmem>>, vector<1x1x8x8xbf16>
    %4 = vector.shape_cast %3 : vector<1x1x8x8xbf16> to vector<8x8xbf16>
    %cst = arith.constant 3.535160e-01 : bf16
    %5 = vector.broadcast %cst : bf16 to vector<8x8xbf16>
    %6 = arith.mulf %4, %5 : vector<8x8xbf16>
    %c0_4 = arith.constant 0 : index
    %c0_5 = arith.constant 0 : index
    %c0_6 = arith.constant 0 : index
    %c0_7 = arith.constant 0 : index
    %7 = vector.load %arg5[%c0_4, %c0_5, %c0_6, %c0_7] : memref<1x1x8x8xbf16, #tpu.memory_space<vmem>>, vector<1x1x8x8xbf16>
    %8 = vector.shape_cast %7 : vector<1x1x8x8xbf16> to vector<8x8xbf16>
    %c0_8 = arith.constant 0 : index
    %c0_9 = arith.constant 0 : index
    %c0_10 = arith.constant 0 : index
    %c0_11 = arith.constant 0 : index
    %9 = vector.load %arg6[%c0_8, %c0_9, %c0_10, %c0_11] : memref<1x1x8x8xbf16, #tpu.memory_space<vmem>>, vector<1x1x8x8xbf16>
    %10 = vector.shape_cast %9 : vector<1x1x8x8xbf16> to vector<8x8xbf16>
    %cst_12 = arith.constant dense<0.000000e+00> : vector<8x8xf32>
    %11 = tpu.matmul %6, %8, %cst_12 {dimension_numbers = #tpu.dot_dimension_numbers<[1], [1], [0], [0], [0, 0, 1, 0], [], []>} : vector<8x8xbf16>, vector<8x8xbf16>, vector<8x8xf32> -> vector<8x8xf32>
    %c0_13 = arith.constant 0 : index
    %c0_14 = arith.constant 0 : index
    %12 = vector.load %arg8[%c0_13, %c0_14] : memref<8x1xf32, #tpu.memory_space<vmem>>, vector<8x1xf32>
    %cst_15 = arith.constant dense<0xFF800000> : vector<8xf32>
    %13 = vector.multi_reduction <maximumf>, %11, %cst_15 [1] : vector<8x8xf32> to vector<8xf32>
    %14 = vector.shape_cast %13 : vector<8xf32> to vector<8x1xf32>
    %15 = arith.maximumf %12, %14 : vector<8x1xf32>
    %16 = arith.subf %12, %15 : vector<8x1xf32>
    %17 = math.exp %16 : vector<8x1xf32>
    %18 = vector.broadcast %15 : vector<8x1xf32> to vector<8x8xf32>
    %19 = arith.subf %11, %18 : vector<8x8xf32>
    %20 = math.exp %19 : vector<8x8xf32>
    %c0_16 = arith.constant 0 : index
    %c0_17 = arith.constant 0 : index
    %21 = vector.load %arg9[%c0_16, %c0_17] : memref<8x1xf32, #tpu.memory_space<vmem>>, vector<8x1xf32>
    %22 = arith.mulf %17, %21 : vector<8x1xf32>
    %cst_18 = arith.constant dense<0.000000e+00> : vector<8xf32>
    %23 = vector.multi_reduction <add>, %20, %cst_18 [1] : vector<8x8xf32> to vector<8xf32>
    %24 = vector.shape_cast %23 : vector<8xf32> to vector<8x1xf32>
    %25 = arith.addf %22, %24 : vector<8x1xf32>
    %c0_19 = arith.constant 0 : index
    %c0_20 = arith.constant 0 : index
    %26 = vector.load %arg9[%c0_19, %c0_20] : memref<8x1xf32, #tpu.memory_space<vmem>>, vector<8x1xf32>
    tpu.vector_store %arg9[%c0_19, %c0_20], %25 {strides = array<i32>} : memref<8x1xf32, #tpu.memory_space<vmem>>, vector<8x1xf32>,
    %c0_21 = arith.constant 0 : index
    %c0_22 = arith.constant 0 : index
    %27 = vector.load %arg10[%c0_21, %c0_22] : memref<8x8xf32, #tpu.memory_space<vmem>>, vector<8x8xf32>
    %28 = vector.broadcast %17 : vector<8x1xf32> to vector<8x8xf32>
    %29 = arith.mulf %28, %27 : vector<8x8xf32>
    %30 = arith.truncf %20 : vector<8x8xf32> to vector<8x8xbf16>
    %cst_23 = arith.constant dense<0.000000e+00> : vector<8x8xf32>
    %31 = tpu.matmul %30, %10, %cst_23 {dimension_numbers = #tpu.dot_dimension_numbers<[1], [0], [0], [1], [0, 0, 1, 1], [], []>} : vector<8x8xbf16>, vector<8x8xbf16>, vector<8x8xf32> -> vector<8x8xf32>
    %32 = arith.addf %29, %31 : vector<8x8xf32>
    %c0_24 = arith.constant 0 : index
    %c0_25 = arith.constant 0 : index
    %33 = vector.load %arg10[%c0_24, %c0_25] : memref<8x8xf32, #tpu.memory_space<vmem>>, vector<8x8xf32>
    tpu.vector_store %arg10[%c0_24, %c0_25], %32 {strides = array<i32>} : memref<8x8xf32, #tpu.memory_space<vmem>>, vector<8x8xf32>,
    %c0_26 = arith.constant 0 : index
    %c0_27 = arith.constant 0 : index
    %34 = vector.load %arg8[%c0_26, %c0_27] : memref<8x1xf32, #tpu.memory_space<vmem>>, vector<8x1xf32>
    tpu.vector_store %arg8[%c0_26, %c0_27], %15 {strides = array<i32>} : memref<8x1xf32, #tpu.memory_space<vmem>>, vector<8x1xf32>,
    %c0_i32_28 = arith.constant 0 : i32
    %35 = arith.cmpi eq, %arg3, %c0_i32_28 : i32
    %36 = arith.extui %35 : i1 to i32
    %c0_i32_29 = arith.constant 0 : i32
    %37 = arith.cmpi ne, %36, %c0_i32_29 : i32
    scf.if %37 {
      %c0_30 = arith.constant 0 : index
      %c0_31 = arith.constant 0 : index
      %38 = vector.load %arg10[%c0_30, %c0_31] : memref<8x8xf32, #tpu.memory_space<vmem>>, vector<8x8xf32>
      %c0_32 = arith.constant 0 : index
      %c0_33 = arith.constant 0 : index
      %39 = vector.load %arg9[%c0_32, %c0_33] : memref<8x1xf32, #tpu.memory_space<vmem>>, vector<8x1xf32>
      %40 = tpu.reciprocal %39 {approx = true} : vector<8x1xf32> -> vector<8x1xf32>
      %41 = vector.broadcast %40 : vector<8x1xf32> to vector<8x8xf32>
      %42 = arith.mulf %38, %41 : vector<8x8xf32>
      %43 = arith.truncf %42 : vector<8x8xf32> to vector<8x8xbf16>
      %c0_34 = arith.constant 0 : index
      %c0_35 = arith.constant 0 : index
      %c0_36 = arith.constant 0 : index
      %c0_37 = arith.constant 0 : index
      %44 = vector.load %arg7[%c0_34, %c0_35, %c0_36, %c0_37] : memref<1x1x8x8xbf16, #tpu.memory_space<vmem>>, vector<1x1x8x8xbf16>
      %45 = vector.shape_cast %44 : vector<1x1x8x8xbf16> to vector<8x8xbf16>
      %46 = vector.shape_cast %43 : vector<8x8xbf16> to vector<1x1x8x8xbf16>
      tpu.vector_store %arg7[%c0_34, %c0_35, %c0_36, %c0_37], %46 {strides = array<i32>} : memref<1x1x8x8xbf16, #tpu.memory_space<vmem>>, vector<1x1x8x8xbf16>,
    } else {
    }
    return
  }
  func.func @transform_0(%arg0: i32, %arg1: i32, %arg2: i32, %arg3: i32) -> (i32, i32, i32, i32) {
    %c0_i32 = arith.constant 0 : i32
    %c0_i32_0 = arith.constant 0 : i32
    return %arg0, %arg1, %arg2, %c0_i32 : i32, i32, i32, i32
  }
  func.func @transform_1(%arg0: i32, %arg1: i32, %arg2: i32, %arg3: i32) -> (i32, i32, i32, i32) {
    %c0_i32 = arith.constant 0 : i32
    %c0_i32_0 = arith.constant 0 : i32
    return %arg0, %arg1, %arg3, %c0_i32 : i32, i32, i32, i32
  }
  func.func @transform_2(%arg0: i32, %arg1: i32, %arg2: i32, %arg3: i32) -> (i32, i32, i32, i32) {
    %c0_i32 = arith.constant 0 : i32
    %c0_i32_0 = arith.constant 0 : i32
    return %arg0, %arg1, %arg3, %c0_i32 : i32, i32, i32, i32
  }
  func.func @transform_3(%arg0: i32, %arg1: i32, %arg2: i32, %arg3: i32) -> (i32, i32, i32, i32) {
    %c0_i32 = arith.constant 0 : i32
    %c0_i32_0 = arith.constant 0 : i32
    return %arg0, %arg1, %arg2, %c0_i32 : i32, i32, i32, i32
  }
}

module attributes {stable_mosaic.version = 11 : i64} {
  func.func @oproj_ffn_pool_kernel(%arg0: i32, %arg1: i32, %arg2: memref<1x8x32xf32, #tpu.memory_space<vmem>>, %arg3: memref<1x4x8x8xbf16, #tpu.memory_space<vmem>>, %arg4: memref<4x8x32xbf16, #tpu.memory_space<vmem>>, %arg5: memref<1x32xf32, #tpu.memory_space<vmem>>, %arg6: memref<32x128xbf16, #tpu.memory_space<vmem>>, %arg7: memref<64x32xbf16, #tpu.memory_space<vmem>>, %arg8: memref<4x8xf32, #tpu.memory_space<vmem>>, %arg9: memref<1x4x32xf32, #tpu.memory_space<vmem>>) attributes {dimension_semantics = [#tpu.dimension_semantics<parallel>, #tpu.dimension_semantics<parallel>], iteration_bounds = array<i64: 2, 1>, scalar_prefetch = 0 : i64, scratch_operands = 0 : i64, tpu.core_type = #tpu.core_type<tc>, window_params = [{transform_indices = @transform_0, window_bounds = array<i64: 1, 8, 32>}, {transform_indices = @transform_1, window_bounds = array<i64: 1, 4, 8, 8>}, {pipeline_mode = #tpu.pipeline_mode<synchronous>, transform_indices = @transform_2, window_bounds = array<i64: 4, 8, 32>}, {pipeline_mode = #tpu.pipeline_mode<synchronous>, transform_indices = @transform_3, window_bounds = array<i64: 1, 32>}, {pipeline_mode = #tpu.pipeline_mode<synchronous>, transform_indices = @transform_4, window_bounds = array<i64: 32, 128>}, {pipeline_mode = #tpu.pipeline_mode<synchronous>, transform_indices = @transform_5, window_bounds = array<i64: 64, 32>}, {pipeline_mode = #tpu.pipeline_mode<synchronous>, transform_indices = @transform_6, window_bounds = array<i64: 4, 8>}, {transform_indices = @transform_7, window_bounds = array<i64: 1, 4, 32>}]} {
    %c0 = arith.constant 0 : index
    %c0_0 = arith.constant 0 : index
    %c0_1 = arith.constant 0 : index
    %0 = vector.load %arg2[%c0, %c0_0, %c0_1] : memref<1x8x32xf32, #tpu.memory_space<vmem>>, vector<1x8x32xf32>
    %1 = vector.shape_cast %0 : vector<1x8x32xf32> to vector<8x32xf32>
    %cst = arith.constant 0.000000e+00 : f32
    %2 = vector.broadcast %cst : f32 to vector<8x32xf32>
    %c0_2 = arith.constant 0 : index
    %c0_3 = arith.constant 0 : index
    %c0_4 = arith.constant 0 : index
    %c0_5 = arith.constant 0 : index
    %3 = vector.load %arg3[%c0_2, %c0_3, %c0_4, %c0_5] : memref<1x4x8x8xbf16, #tpu.memory_space<vmem>>, vector<1x1x8x8xbf16>
    %4 = vector.shape_cast %3 : vector<1x1x8x8xbf16> to vector<8x8xbf16>
    %c0_6 = arith.constant 0 : index
    %c0_7 = arith.constant 0 : index
    %c0_8 = arith.constant 0 : index
    %5 = vector.load %arg4[%c0_6, %c0_7, %c0_8] : memref<4x8x32xbf16, #tpu.memory_space<vmem>>, vector<1x8x32xbf16>
    %6 = vector.shape_cast %5 : vector<1x8x32xbf16> to vector<8x32xbf16>
    %cst_9 = arith.constant dense<0.000000e+00> : vector<8x32xf32>
    %7 = tpu.matmul %4, %6, %cst_9 {dimension_numbers = #tpu.dot_dimension_numbers<[1], [0], [0], [1], [0, 0, 1, 1], [], []>} : vector<8x8xbf16>, vector<8x32xbf16>, vector<8x32xf32> -> vector<8x32xf32>
    %8 = arith.addf %2, %7 : vector<8x32xf32>
    %c0_10 = arith.constant 0 : index
    %c1 = arith.constant 1 : index
    %c0_11 = arith.constant 0 : index
    %c0_12 = arith.constant 0 : index
    %9 = vector.load %arg3[%c0_10, %c1, %c0_11, %c0_12] : memref<1x4x8x8xbf16, #tpu.memory_space<vmem>>, vector<1x1x8x8xbf16>
    %10 = vector.shape_cast %9 : vector<1x1x8x8xbf16> to vector<8x8xbf16>
    %c1_13 = arith.constant 1 : index
    %c0_14 = arith.constant 0 : index
    %c0_15 = arith.constant 0 : index
    %11 = vector.load %arg4[%c1_13, %c0_14, %c0_15] : memref<4x8x32xbf16, #tpu.memory_space<vmem>>, vector<1x8x32xbf16>
    %12 = vector.shape_cast %11 : vector<1x8x32xbf16> to vector<8x32xbf16>
    %cst_16 = arith.constant dense<0.000000e+00> : vector<8x32xf32>
    %13 = tpu.matmul %10, %12, %cst_16 {dimension_numbers = #tpu.dot_dimension_numbers<[1], [0], [0], [1], [0, 0, 1, 1], [], []>} : vector<8x8xbf16>, vector<8x32xbf16>, vector<8x32xf32> -> vector<8x32xf32>
    %14 = arith.addf %8, %13 : vector<8x32xf32>
    %c0_17 = arith.constant 0 : index
    %c2 = arith.constant 2 : index
    %c0_18 = arith.constant 0 : index
    %c0_19 = arith.constant 0 : index
    %15 = vector.load %arg3[%c0_17, %c2, %c0_18, %c0_19] : memref<1x4x8x8xbf16, #tpu.memory_space<vmem>>, vector<1x1x8x8xbf16>
    %16 = vector.shape_cast %15 : vector<1x1x8x8xbf16> to vector<8x8xbf16>
    %c2_20 = arith.constant 2 : index
    %c0_21 = arith.constant 0 : index
    %c0_22 = arith.constant 0 : index
    %17 = vector.load %arg4[%c2_20, %c0_21, %c0_22] : memref<4x8x32xbf16, #tpu.memory_space<vmem>>, vector<1x8x32xbf16>
    %18 = vector.shape_cast %17 : vector<1x8x32xbf16> to vector<8x32xbf16>
    %cst_23 = arith.constant dense<0.000000e+00> : vector<8x32xf32>
    %19 = tpu.matmul %16, %18, %cst_23 {dimension_numbers = #tpu.dot_dimension_numbers<[1], [0], [0], [1], [0, 0, 1, 1], [], []>} : vector<8x8xbf16>, vector<8x32xbf16>, vector<8x32xf32> -> vector<8x32xf32>
    %20 = arith.addf %14, %19 : vector<8x32xf32>
    %c0_24 = arith.constant 0 : index
    %c3 = arith.constant 3 : index
    %c0_25 = arith.constant 0 : index
    %c0_26 = arith.constant 0 : index
    %21 = vector.load %arg3[%c0_24, %c3, %c0_25, %c0_26] : memref<1x4x8x8xbf16, #tpu.memory_space<vmem>>, vector<1x1x8x8xbf16>
    %22 = vector.shape_cast %21 : vector<1x1x8x8xbf16> to vector<8x8xbf16>
    %c3_27 = arith.constant 3 : index
    %c0_28 = arith.constant 0 : index
    %c0_29 = arith.constant 0 : index
    %23 = vector.load %arg4[%c3_27, %c0_28, %c0_29] : memref<4x8x32xbf16, #tpu.memory_space<vmem>>, vector<1x8x32xbf16>
    %24 = vector.shape_cast %23 : vector<1x8x32xbf16> to vector<8x32xbf16>
    %cst_30 = arith.constant dense<0.000000e+00> : vector<8x32xf32>
    %25 = tpu.matmul %22, %24, %cst_30 {dimension_numbers = #tpu.dot_dimension_numbers<[1], [0], [0], [1], [0, 0, 1, 1], [], []>} : vector<8x8xbf16>, vector<8x32xbf16>, vector<8x32xf32> -> vector<8x32xf32>
    %26 = arith.addf %20, %25 : vector<8x32xf32>
    %27 = arith.addf %1, %26 : vector<8x32xf32>
    %28 = arith.mulf %27, %27 : vector<8x32xf32>
    %cst_31 = arith.constant dense<0.000000e+00> : vector<8xf32>
    %29 = vector.multi_reduction <add>, %28, %cst_31 [1] : vector<8x32xf32> to vector<8xf32>
    %30 = vector.shape_cast %29 : vector<8xf32> to vector<8x1xf32>
    %cst_32 = arith.constant 3.200000e+01 : f32
    %31 = vector.broadcast %cst_32 : f32 to vector<8x1xf32>
    %32 = arith.divf %30, %31 : vector<8x1xf32>
    %cst_33 = arith.constant 9.99999974E-6 : f32
    %33 = vector.broadcast %cst_33 : f32 to vector<8x1xf32>
    %34 = arith.addf %32, %33 : vector<8x1xf32>
    %35 = math.rsqrt %34 : vector<8x1xf32>
    %36 = vector.broadcast %35 : vector<8x1xf32> to vector<8x32xf32>
    %37 = arith.mulf %27, %36 : vector<8x32xf32>
    %c0_34 = arith.constant 0 : index
    %c0_35 = arith.constant 0 : index
    %38 = vector.load %arg5[%c0_34, %c0_35] : memref<1x32xf32, #tpu.memory_space<vmem>>, vector<1x32xf32>
    %39 = vector.broadcast %38 : vector<1x32xf32> to vector<8x32xf32>
    %40 = arith.mulf %37, %39 : vector<8x32xf32>
    %41 = arith.truncf %40 : vector<8x32xf32> to vector<8x32xbf16>
    %c0_36 = arith.constant 0 : index
    %c0_37 = arith.constant 0 : index
    %42 = vector.load %arg6[%c0_36, %c0_37] : memref<32x128xbf16, #tpu.memory_space<vmem>>, vector<32x128xbf16>
    %cst_38 = arith.constant dense<0.000000e+00> : vector<8x128xf32>
    %43 = tpu.matmul %41, %42, %cst_38 {dimension_numbers = #tpu.dot_dimension_numbers<[1], [0], [0], [1], [0, 0, 1, 1], [], []>} : vector<8x32xbf16>, vector<32x128xbf16>, vector<8x128xf32> -> vector<8x128xf32>
    %44 = vector.extract_strided_slice %43 {offsets = [0, 0], sizes = [8, 64], strides = [1, 1]} : vector<8x128xf32> to vector<8x64xf32>
    %45 = vector.extract_strided_slice %43 {offsets = [0, 64], sizes = [8, 64], strides = [1, 1]} : vector<8x128xf32> to vector<8x64xf32>
    %46 = arith.negf %44 : vector<8x64xf32>
    %47 = math.exp %46 : vector<8x64xf32>
    %cst_39 = arith.constant 1.000000e+00 : f32
    %48 = vector.broadcast %cst_39 : f32 to vector<8x64xf32>
    %49 = arith.addf %48, %47 : vector<8x64xf32>
    %50 = arith.divf %48, %49 : vector<8x64xf32>
    %51 = arith.mulf %44, %50 : vector<8x64xf32>
    %52 = arith.mulf %51, %45 : vector<8x64xf32>
    %53 = arith.truncf %52 : vector<8x64xf32> to vector<8x64xbf16>
    %c0_40 = arith.constant 0 : index
    %c0_41 = arith.constant 0 : index
    %54 = vector.load %arg7[%c0_40, %c0_41] : memref<64x32xbf16, #tpu.memory_space<vmem>>, vector<64x32xbf16>
    %cst_42 = arith.constant dense<0.000000e+00> : vector<8x32xf32>
    %55 = tpu.matmul %53, %54, %cst_42 {dimension_numbers = #tpu.dot_dimension_numbers<[1], [0], [0], [1], [0, 0, 1, 1], [], []>} : vector<8x64xbf16>, vector<64x32xbf16>, vector<8x32xf32> -> vector<8x32xf32>
    %56 = arith.addf %27, %55 : vector<8x32xf32>
    %c0_43 = arith.constant 0 : index
    %c0_44 = arith.constant 0 : index
    %57 = vector.load %arg8[%c0_43, %c0_44] : memref<4x8xf32, #tpu.memory_space<vmem>>, vector<4x8xf32>
    %cst_45 = arith.constant dense<0.000000e+00> : vector<4x32xf32>
    %58 = tpu.matmul %57, %56, %cst_45 {dimension_numbers = #tpu.dot_dimension_numbers<[1], [0], [0], [1], [0, 0, 1, 1], [], []>} : vector<4x8xf32>, vector<8x32xf32>, vector<4x32xf32> -> vector<4x32xf32>
    %c0_46 = arith.constant 0 : index
    %c0_47 = arith.constant 0 : index
    %c0_48 = arith.constant 0 : index
    %59 = vector.load %arg9[%c0_46, %c0_47, %c0_48] : memref<1x4x32xf32, #tpu.memory_space<vmem>>, vector<1x4x32xf32>
    %60 = vector.shape_cast %59 : vector<1x4x32xf32> to vector<4x32xf32>
    %61 = vector.shape_cast %58 : vector<4x32xf32> to vector<1x4x32xf32>
    tpu.vector_store %arg9[%c0_46, %c0_47, %c0_48], %61 {strides = array<i32>} : memref<1x4x32xf32, #tpu.memory_space<vmem>>, vector<1x4x32xf32>,
    return
  }
  func.func @transform_0(%arg0: i32, %arg1: i32) -> (i32, i32, i32) {
    %c0_i32 = arith.constant 0 : i32
    %c0_i32_0 = arith.constant 0 : i32
    return %arg0, %arg1, %c0_i32 : i32, i32, i32
  }
  func.func @transform_1(%arg0: i32, %arg1: i32) -> (i32, i32, i32, i32) {
    %c0_i32 = arith.constant 0 : i32
    %c0_i32_0 = arith.constant 0 : i32
    %c0_i32_1 = arith.constant 0 : i32
    return %arg0, %c0_i32, %arg1, %c0_i32_0 : i32, i32, i32, i32
  }
  func.func @transform_2(%arg0: i32, %arg1: i32) -> (i32, i32, i32) {
    %c0_i32 = arith.constant 0 : i32
    %c0_i32_0 = arith.constant 0 : i32
    %c0_i32_1 = arith.constant 0 : i32
    %c0_i32_2 = arith.constant 0 : i32
    return %c0_i32, %c0_i32_0, %c0_i32_1 : i32, i32, i32
  }
  func.func @transform_3(%arg0: i32, %arg1: i32) -> (i32, i32) {
    %c0_i32 = arith.constant 0 : i32
    %c0_i32_0 = arith.constant 0 : i32
    %c0_i32_1 = arith.constant 0 : i32
    return %c0_i32, %c0_i32_0 : i32, i32
  }
  func.func @transform_4(%arg0: i32, %arg1: i32) -> (i32, i32) {
    %c0_i32 = arith.constant 0 : i32
    %c0_i32_0 = arith.constant 0 : i32
    %c0_i32_1 = arith.constant 0 : i32
    return %c0_i32, %c0_i32_0 : i32, i32
  }
  func.func @transform_5(%arg0: i32, %arg1: i32) -> (i32, i32) {
    %c0_i32 = arith.constant 0 : i32
    %c0_i32_0 = arith.constant 0 : i32
    %c0_i32_1 = arith.constant 0 : i32
    return %c0_i32, %c0_i32_0 : i32, i32
  }
  func.func @transform_6(%arg0: i32, %arg1: i32) -> (i32, i32) {
    %c0_i32 = arith.constant 0 : i32
    %c0_i32_0 = arith.constant 0 : i32
    %c0_i32_1 = arith.constant 0 : i32
    return %c0_i32, %c0_i32_0 : i32, i32
  }
  func.func @transform_7(%arg0: i32, %arg1: i32) -> (i32, i32, i32) {
    %c0_i32 = arith.constant 0 : i32
    %c0_i32_0 = arith.constant 0 : i32
    return %arg0, %arg1, %c0_i32 : i32, i32, i32
  }
}

module attributes {stable_mosaic.version = 11 : i64} {
  func.func @conv_head_kernel(%arg0: i32, %arg1: memref<1x4x32xf32, #tpu.memory_space<vmem>>, %arg2: memref<1x32xf32, #tpu.memory_space<vmem>>, %arg3: memref<32x10xbf16, #tpu.memory_space<vmem>>, %arg4: memref<1x2xf32, #tpu.memory_space<vmem>>, %arg5: memref<5x4x4xf32, #tpu.memory_space<vmem>>, %arg6: memref<10x2xf32, #tpu.memory_space<vmem>>, %arg7: memref<4x1xf32, #tpu.memory_space<vmem>>, %arg8: memref<4x1xf32, #tpu.memory_space<vmem>>, %arg9: memref<1x1x1xf32, #tpu.memory_space<vmem>>) attributes {dimension_semantics = [#tpu.dimension_semantics<parallel>], iteration_bounds = array<i64: 2>, scalar_prefetch = 0 : i64, scratch_operands = 0 : i64, tpu.core_type = #tpu.core_type<tc>, window_params = [{transform_indices = @transform_0, window_bounds = array<i64: 1, 4, 32>}, {pipeline_mode = #tpu.pipeline_mode<synchronous>, transform_indices = @transform_1, window_bounds = array<i64: 1, 32>}, {pipeline_mode = #tpu.pipeline_mode<synchronous>, transform_indices = @transform_2, window_bounds = array<i64: 32, 10>}, {pipeline_mode = #tpu.pipeline_mode<synchronous>, transform_indices = @transform_3, window_bounds = array<i64: 1, 2>}, {pipeline_mode = #tpu.pipeline_mode<synchronous>, transform_indices = @transform_4, window_bounds = array<i64: 5, 4, 4>}, {pipeline_mode = #tpu.pipeline_mode<synchronous>, transform_indices = @transform_5, window_bounds = array<i64: 10, 2>}, {pipeline_mode = #tpu.pipeline_mode<synchronous>, transform_indices = @transform_6, window_bounds = array<i64: 4, 1>}, {pipeline_mode = #tpu.pipeline_mode<synchronous>, transform_indices = @transform_7, window_bounds = array<i64: 4, 1>}, {transform_indices = @transform_8, window_bounds = array<i64: 1, 1, 1>}]} {
    %c0 = arith.constant 0 : index
    %c0_0 = arith.constant 0 : index
    %c0_1 = arith.constant 0 : index
    %0 = vector.load %arg1[%c0, %c0_0, %c0_1] : memref<1x4x32xf32, #tpu.memory_space<vmem>>, vector<1x4x32xf32>
    %1 = vector.shape_cast %0 : vector<1x4x32xf32> to vector<4x32xf32>
    %2 = arith.mulf %1, %1 : vector<4x32xf32>
    %cst = arith.constant dense<0.000000e+00> : vector<4xf32>
    %3 = vector.multi_reduction <add>, %2, %cst [1] : vector<4x32xf32> to vector<4xf32>
    %4 = vector.shape_cast %3 : vector<4xf32> to vector<4x1xf32>
    %cst_2 = arith.constant 3.200000e+01 : f32
    %5 = vector.broadcast %cst_2 : f32 to vector<4x1xf32>
    %6 = arith.divf %4, %5 : vector<4x1xf32>
    %cst_3 = arith.constant 9.99999974E-6 : f32
    %7 = vector.broadcast %cst_3 : f32 to vector<4x1xf32>
    %8 = arith.addf %6, %7 : vector<4x1xf32>
    %9 = math.rsqrt %8 : vector<4x1xf32>
    %10 = vector.broadcast %9 : vector<4x1xf32> to vector<4x32xf32>
    %11 = arith.mulf %1, %10 : vector<4x32xf32>
    %c0_4 = arith.constant 0 : index
    %c0_5 = arith.constant 0 : index
    %12 = vector.load %arg2[%c0_4, %c0_5] : memref<1x32xf32, #tpu.memory_space<vmem>>, vector<1x32xf32>
    %13 = vector.broadcast %12 : vector<1x32xf32> to vector<4x32xf32>
    %14 = arith.mulf %11, %13 : vector<4x32xf32>
    %15 = arith.truncf %14 : vector<4x32xf32> to vector<4x32xbf16>
    %c0_6 = arith.constant 0 : index
    %c0_7 = arith.constant 0 : index
    %16 = vector.load %arg3[%c0_6, %c0_7] : memref<32x10xbf16, #tpu.memory_space<vmem>>, vector<32x10xbf16>
    %cst_8 = arith.constant dense<0.000000e+00> : vector<4x10xf32>
    %17 = tpu.matmul %15, %16, %cst_8 {dimension_numbers = #tpu.dot_dimension_numbers<[1], [0], [0], [1], [0, 0, 1, 1], [], []>} : vector<4x32xbf16>, vector<32x10xbf16>, vector<4x10xf32> -> vector<4x10xf32>
    %18 = tpu.iota {dimensions = array<i32: 1>} : vector<4x10xi32>
    %cst_9 = arith.constant 0.000000e+00 : f32
    %19 = vector.broadcast %cst_9 : f32 to vector<4x10xf32>
    %c0_i32 = arith.constant 0 : i32
    %20 = vector.broadcast %c0_i32 : i32 to vector<4x10xi32>
    %21 = arith.cmpi eq, %18, %20 : vector<4x10xi32>
    %c5_i32 = arith.constant 5 : i32
    %22 = vector.broadcast %c5_i32 : i32 to vector<4x10xi32>
    %23 = arith.cmpi eq, %18, %22 : vector<4x10xi32>
    %24 = arith.ori %21, %23 : vector<4x10xi1>
    %25 = arith.extui %24 : vector<4x10xi1> to vector<4x10xi32>
    %26 = arith.sitofp %25 : vector<4x10xi32> to vector<4x10xf32>
    %c0_10 = arith.constant 0 : index
    %c0_11 = arith.constant 0 : index
    %c0_12 = arith.constant 0 : index
    %27 = vector.load %arg5[%c0_10, %c0_11, %c0_12] : memref<5x4x4xf32, #tpu.memory_space<vmem>>, vector<1x4x4xf32>
    %28 = vector.shape_cast %27 : vector<1x4x4xf32> to vector<4x4xf32>
    %29 = arith.mulf %17, %26 : vector<4x10xf32>
    %cst_13 = arith.constant dense<0.000000e+00> : vector<4x10xf32>
    %30 = tpu.matmul %28, %29, %cst_13 {dimension_numbers = #tpu.dot_dimension_numbers<[1], [0], [0], [1], [0, 0, 1, 1], [], []>} : vector<4x4xf32>, vector<4x10xf32>, vector<4x10xf32> -> vector<4x10xf32>
    %31 = arith.addf %19, %30 : vector<4x10xf32>
    %c1_i32 = arith.constant 1 : i32
    %32 = vector.broadcast %c1_i32 : i32 to vector<4x10xi32>
    %33 = arith.cmpi eq, %18, %32 : vector<4x10xi32>
    %c6_i32 = arith.constant 6 : i32
    %34 = vector.broadcast %c6_i32 : i32 to vector<4x10xi32>
    %35 = arith.cmpi eq, %18, %34 : vector<4x10xi32>
    %36 = arith.ori %33, %35 : vector<4x10xi1>
    %37 = arith.extui %36 : vector<4x10xi1> to vector<4x10xi32>
    %38 = arith.sitofp %37 : vector<4x10xi32> to vector<4x10xf32>
    %c1 = arith.constant 1 : index
    %c0_14 = arith.constant 0 : index
    %c0_15 = arith.constant 0 : index
    %39 = vector.load %arg5[%c1, %c0_14, %c0_15] : memref<5x4x4xf32, #tpu.memory_space<vmem>>, vector<1x4x4xf32>
    %40 = vector.shape_cast %39 : vector<1x4x4xf32> to vector<4x4xf32>
    %41 = arith.mulf %17, %38 : vector<4x10xf32>
    %cst_16 = arith.constant dense<0.000000e+00> : vector<4x10xf32>
    %42 = tpu.matmul %40, %41, %cst_16 {dimension_numbers = #tpu.dot_dimension_numbers<[1], [0], [0], [1], [0, 0, 1, 1], [], []>} : vector<4x4xf32>, vector<4x10xf32>, vector<4x10xf32> -> vector<4x10xf32>
    %43 = arith.addf %31, %42 : vector<4x10xf32>
    %c2_i32 = arith.constant 2 : i32
    %44 = vector.broadcast %c2_i32 : i32 to vector<4x10xi32>
    %45 = arith.cmpi eq, %18, %44 : vector<4x10xi32>
    %c7_i32 = arith.constant 7 : i32
    %46 = vector.broadcast %c7_i32 : i32 to vector<4x10xi32>
    %47 = arith.cmpi eq, %18, %46 : vector<4x10xi32>
    %48 = arith.ori %45, %47 : vector<4x10xi1>
    %49 = arith.extui %48 : vector<4x10xi1> to vector<4x10xi32>
    %50 = arith.sitofp %49 : vector<4x10xi32> to vector<4x10xf32>
    %c2 = arith.constant 2 : index
    %c0_17 = arith.constant 0 : index
    %c0_18 = arith.constant 0 : index
    %51 = vector.load %arg5[%c2, %c0_17, %c0_18] : memref<5x4x4xf32, #tpu.memory_space<vmem>>, vector<1x4x4xf32>
    %52 = vector.shape_cast %51 : vector<1x4x4xf32> to vector<4x4xf32>
    %53 = arith.mulf %17, %50 : vector<4x10xf32>
    %cst_19 = arith.constant dense<0.000000e+00> : vector<4x10xf32>
    %54 = tpu.matmul %52, %53, %cst_19 {dimension_numbers = #tpu.dot_dimension_numbers<[1], [0], [0], [1], [0, 0, 1, 1], [], []>} : vector<4x4xf32>, vector<4x10xf32>, vector<4x10xf32> -> vector<4x10xf32>
    %55 = arith.addf %43, %54 : vector<4x10xf32>
    %c3_i32 = arith.constant 3 : i32
    %56 = vector.broadcast %c3_i32 : i32 to vector<4x10xi32>
    %57 = arith.cmpi eq, %18, %56 : vector<4x10xi32>
    %c8_i32 = arith.constant 8 : i32
    %58 = vector.broadcast %c8_i32 : i32 to vector<4x10xi32>
    %59 = arith.cmpi eq, %18, %58 : vector<4x10xi32>
    %60 = arith.ori %57, %59 : vector<4x10xi1>
    %61 = arith.extui %60 : vector<4x10xi1> to vector<4x10xi32>
    %62 = arith.sitofp %61 : vector<4x10xi32> to vector<4x10xf32>
    %c3 = arith.constant 3 : index
    %c0_20 = arith.constant 0 : index
    %c0_21 = arith.constant 0 : index
    %63 = vector.load %arg5[%c3, %c0_20, %c0_21] : memref<5x4x4xf32, #tpu.memory_space<vmem>>, vector<1x4x4xf32>
    %64 = vector.shape_cast %63 : vector<1x4x4xf32> to vector<4x4xf32>
    %65 = arith.mulf %17, %62 : vector<4x10xf32>
    %cst_22 = arith.constant dense<0.000000e+00> : vector<4x10xf32>
    %66 = tpu.matmul %64, %65, %cst_22 {dimension_numbers = #tpu.dot_dimension_numbers<[1], [0], [0], [1], [0, 0, 1, 1], [], []>} : vector<4x4xf32>, vector<4x10xf32>, vector<4x10xf32> -> vector<4x10xf32>
    %67 = arith.addf %55, %66 : vector<4x10xf32>
    %c4_i32 = arith.constant 4 : i32
    %68 = vector.broadcast %c4_i32 : i32 to vector<4x10xi32>
    %69 = arith.cmpi eq, %18, %68 : vector<4x10xi32>
    %c9_i32 = arith.constant 9 : i32
    %70 = vector.broadcast %c9_i32 : i32 to vector<4x10xi32>
    %71 = arith.cmpi eq, %18, %70 : vector<4x10xi32>
    %72 = arith.ori %69, %71 : vector<4x10xi1>
    %73 = arith.extui %72 : vector<4x10xi1> to vector<4x10xi32>
    %74 = arith.sitofp %73 : vector<4x10xi32> to vector<4x10xf32>
    %c4 = arith.constant 4 : index
    %c0_23 = arith.constant 0 : index
    %c0_24 = arith.constant 0 : index
    %75 = vector.load %arg5[%c4, %c0_23, %c0_24] : memref<5x4x4xf32, #tpu.memory_space<vmem>>, vector<1x4x4xf32>
    %76 = vector.shape_cast %75 : vector<1x4x4xf32> to vector<4x4xf32>
    %77 = arith.mulf %17, %74 : vector<4x10xf32>
    %cst_25 = arith.constant dense<0.000000e+00> : vector<4x10xf32>
    %78 = tpu.matmul %76, %77, %cst_25 {dimension_numbers = #tpu.dot_dimension_numbers<[1], [0], [0], [1], [0, 0, 1, 1], [], []>} : vector<4x4xf32>, vector<4x10xf32>, vector<4x10xf32> -> vector<4x10xf32>
    %79 = arith.addf %67, %78 : vector<4x10xf32>
    %c0_26 = arith.constant 0 : index
    %c0_27 = arith.constant 0 : index
    %80 = vector.load %arg6[%c0_26, %c0_27] : memref<10x2xf32, #tpu.memory_space<vmem>>, vector<10x2xf32>
    %cst_28 = arith.constant dense<0.000000e+00> : vector<4x2xf32>
    %81 = tpu.matmul %79, %80, %cst_28 {dimension_numbers = #tpu.dot_dimension_numbers<[1], [0], [0], [1], [0, 0, 1, 1], [], []>} : vector<4x10xf32>, vector<10x2xf32>, vector<4x2xf32> -> vector<4x2xf32>
    %c0_29 = arith.constant 0 : index
    %c0_30 = arith.constant 0 : index
    %82 = vector.load %arg4[%c0_29, %c0_30] : memref<1x2xf32, #tpu.memory_space<vmem>>, vector<1x2xf32>
    %83 = vector.broadcast %82 : vector<1x2xf32> to vector<4x2xf32>
    %84 = arith.addf %81, %83 : vector<4x2xf32>
    %85 = vector.extract_strided_slice %84 {offsets = [0, 0], sizes = [4, 1], strides = [1, 1]} : vector<4x2xf32> to vector<4x1xf32>
    %86 = vector.extract_strided_slice %84 {offsets = [0, 1], sizes = [4, 1], strides = [1, 1]} : vector<4x2xf32> to vector<4x1xf32>
    %87 = arith.negf %86 : vector<4x1xf32>
    %88 = math.exp %87 : vector<4x1xf32>
    %cst_31 = arith.constant 1.000000e+00 : f32
    %89 = vector.broadcast %cst_31 : f32 to vector<4x1xf32>
    %90 = arith.addf %89, %88 : vector<4x1xf32>
    %91 = arith.divf %89, %90 : vector<4x1xf32>
    %92 = arith.mulf %85, %91 : vector<4x1xf32>
    %93 = arith.negf %92 : vector<4x1xf32>
    %94 = math.exp %93 : vector<4x1xf32>
    %cst_32 = arith.constant 1.000000e+00 : f32
    %95 = vector.broadcast %cst_32 : f32 to vector<4x1xf32>
    %96 = arith.addf %95, %94 : vector<4x1xf32>
    %97 = arith.divf %95, %96 : vector<4x1xf32>
    %98 = arith.mulf %92, %97 : vector<4x1xf32>
    %99 = arith.mulf %98, %98 : vector<4x1xf32>
    %cst_33 = arith.constant dense<0.000000e+00> : vector<1xf32>
    %100 = vector.multi_reduction <add>, %99, %cst_33 [0] : vector<4x1xf32> to vector<1xf32>
    %101 = vector.shape_cast %100 : vector<1xf32> to vector<1x1xf32>
    %cst_34 = arith.constant 4.000000e+00 : f32
    %102 = vector.broadcast %cst_34 : f32 to vector<1x1xf32>
    %103 = arith.divf %101, %102 : vector<1x1xf32>
    %cst_35 = arith.constant 9.99999974E-6 : f32
    %104 = vector.broadcast %cst_35 : f32 to vector<1x1xf32>
    %105 = arith.addf %103, %104 : vector<1x1xf32>
    %106 = math.rsqrt %105 : vector<1x1xf32>
    %107 = vector.broadcast %106 : vector<1x1xf32> to vector<4x1xf32>
    %108 = arith.mulf %98, %107 : vector<4x1xf32>
    %c0_36 = arith.constant 0 : index
    %c0_37 = arith.constant 0 : index
    %109 = vector.load %arg7[%c0_36, %c0_37] : memref<4x1xf32, #tpu.memory_space<vmem>>, vector<4x1xf32>
    %110 = arith.mulf %108, %109 : vector<4x1xf32>
    %c0_38 = arith.constant 0 : index
    %c0_39 = arith.constant 0 : index
    %111 = vector.load %arg8[%c0_38, %c0_39] : memref<4x1xf32, #tpu.memory_space<vmem>>, vector<4x1xf32>
    %112 = arith.mulf %110, %111 : vector<4x1xf32>
    %cst_40 = arith.constant dense<0.000000e+00> : vector<1xf32>
    %113 = vector.multi_reduction <add>, %112, %cst_40 [0] : vector<4x1xf32> to vector<1xf32>
    %114 = vector.shape_cast %113 : vector<1xf32> to vector<1x1xf32>
    %c0_41 = arith.constant 0 : index
    %c0_42 = arith.constant 0 : index
    %c0_43 = arith.constant 0 : index
    %115 = vector.load %arg9[%c0_41, %c0_42, %c0_43] : memref<1x1x1xf32, #tpu.memory_space<vmem>>, vector<1x1x1xf32>
    %116 = vector.shape_cast %115 : vector<1x1x1xf32> to vector<1x1xf32>
    %117 = vector.shape_cast %114 : vector<1x1xf32> to vector<1x1x1xf32>
    tpu.vector_store %arg9[%c0_41, %c0_42, %c0_43], %117 {strides = array<i32>} : memref<1x1x1xf32, #tpu.memory_space<vmem>>, vector<1x1x1xf32>,
    return
  }
  func.func @transform_0(%arg0: i32) -> (i32, i32, i32) {
    %c0_i32 = arith.constant 0 : i32
    %c0_i32_0 = arith.constant 0 : i32
    %c0_i32_1 = arith.constant 0 : i32
    return %arg0, %c0_i32, %c0_i32_0 : i32, i32, i32
  }
  func.func @transform_1(%arg0: i32) -> (i32, i32) {
    %c0_i32 = arith.constant 0 : i32
    %c0_i32_0 = arith.constant 0 : i32
    %c0_i32_1 = arith.constant 0 : i32
    return %c0_i32, %c0_i32_0 : i32, i32
  }
  func.func @transform_2(%arg0: i32) -> (i32, i32) {
    %c0_i32 = arith.constant 0 : i32
    %c0_i32_0 = arith.constant 0 : i32
    %c0_i32_1 = arith.constant 0 : i32
    return %c0_i32, %c0_i32_0 : i32, i32
  }
  func.func @transform_3(%arg0: i32) -> (i32, i32) {
    %c0_i32 = arith.constant 0 : i32
    %c0_i32_0 = arith.constant 0 : i32
    %c0_i32_1 = arith.constant 0 : i32
    return %c0_i32, %c0_i32_0 : i32, i32
  }
  func.func @transform_4(%arg0: i32) -> (i32, i32, i32) {
    %c0_i32 = arith.constant 0 : i32
    %c0_i32_0 = arith.constant 0 : i32
    %c0_i32_1 = arith.constant 0 : i32
    %c0_i32_2 = arith.constant 0 : i32
    return %c0_i32, %c0_i32_0, %c0_i32_1 : i32, i32, i32
  }
  func.func @transform_5(%arg0: i32) -> (i32, i32) {
    %c0_i32 = arith.constant 0 : i32
    %c0_i32_0 = arith.constant 0 : i32
    %c0_i32_1 = arith.constant 0 : i32
    return %c0_i32, %c0_i32_0 : i32, i32
  }
  func.func @transform_6(%arg0: i32) -> (i32, i32) {
    %c0_i32 = arith.constant 0 : i32
    %c0_i32_0 = arith.constant 0 : i32
    %c0_i32_1 = arith.constant 0 : i32
    return %c0_i32, %c0_i32_0 : i32, i32
  }
  func.func @transform_7(%arg0: i32) -> (i32, i32) {
    %c0_i32 = arith.constant 0 : i32
    %c0_i32_0 = arith.constant 0 : i32
    %c0_i32_1 = arith.constant 0 : i32
    return %c0_i32, %c0_i32_0 : i32, i32
  }
  func.func @transform_8(%arg0: i32) -> (i32, i32, i32) {
    %c0_i32 = arith.constant 0 : i32
    %c0_i32_0 = arith.constant 0 : i32
    %c0_i32_1 = arith.constant 0 : i32
    return %arg0, %c0_i32, %c0_i32_0 : i32, i32, i32
  }
}

</mosaic_0001>

<bundles_post_ra>
// kernel: _lambda_.8
= control target key start
LH: loop header
LB: loop body
LE: loop exit
PB: predicated region body
PF: predicated region fallthrough
CT: control target
= control target key end

     0   :  { %s913_s12 = smov 0   ;;  %s915_s13 = smov 0   ;;  %s995_s0 = inlined_call_operand.vmem [shape: bf16[2,4,16,8], index: 0, kind: input, shape index: {}]   ;;  %s996_s1 = inlined_call_operand.vmem [shape: bf16[2,4,16,8], index: 1, kind: input, shape index: {}]   ;;  %s997_s2 = inlined_call_operand.vmem [shape: bf16[2,4,16,8], index: 2, kind: input, shape index: {}]   ;;  %s998_s3 = inlined_call_operand.vmem [shape: bf16[2,4,16,8], index: 3, kind: output, shape index: {}]  }
   0x1   :  { %s917_s14 = smov 0   ;;  %s919_s15 = smov 0  }
   0x2   :  { %s921_s16 = smov 0  }
   0x3 LB: > { %s35_s17 = sadd.s32 1, %s879_s14  ;;  %s39_s18 = sadd.s32 1, %s883_s15  ;;  %s887_s16 = sphi %s921_s16, %s13_s16   ;;  %s883_s15 = sphi %s919_s15, %s1002_s15   ;;  %s879_s14 = sphi %s917_s14, %s1001_s14   ;;  %s875_s13 = sphi %s915_s13, %s1000_s13   ;;  %s871_s12 = sphi %s913_s12, %s999_s12  }
   0x4   : > { %p37_p0 = scmp.ge.s32.totalorder %s35_s17, 4  ;;  %p749_p1 = scmp.ge.s32.totalorder %s887_s16, 1 }
   0x5   : > { %p226_p2 = scmp.lt.s32.totalorder %s887_s16, 9 }
   0x6   : > { %s1004_s17 = smov (%p37_p0, %s35_s17), 0  ;;  %s1006_s18 = smov (!%p37_p0, %s39_s18), %s883_s15 }
   0x7   : > { %p227_p3 = pnand %p749_p1, %p226_p2  ;;  %p41_p4 = scmp.ge.s32.totalorder %s1006_s18, 2 }
   0x8   : > { %p293_p5 = scmp.lt.s32.totalorder (!%p227_p3), %s875_s13, 1  ;;  %p295_p6 = scmp.lt.s32.totalorder (!%p227_p3), %s871_s12, 3  ;;  %vm359_vm0 = vcmask (!%p227_p3), 64512   ;;  %v889_v0 = vmov (!%p227_p3), 0.0   ;;  %vm890_vm1 = vmmov (!%p227_p3), 0   ;;  %vm354_vm2 = vcmask (!%p227_p3), 7168  }
   0x9   : > { %s1008_s18 = smov (%p41_p4, %s1006_s18), 0  ;;  %230 = sbr.rel (%p227_p3) target bundleno = 831 (0x33f), region = 32 }
   0xa   : > { %777 = vmatprep.subr.bf16.mxu0 (!%p227_p3), %v889_v0  ;;  %360 = vst.msk [vmem:[#allocation4] sm:$0xff] (!%p227_p3), %vm359_vm0, %v889_v0  ;;  %361 = vst.msk [vmem:[#allocation4 + $0x8] sm:$0xff] (!%p227_p3), %vm359_vm0, %v889_v0  ;;  %779 = vmatprep.mubr.msk.bf16.mxu0 (!%p227_p3), %vm890_vm1, %v889_v0  ;;  %v891_v8 = vmov (!%p227_p3), -inf   ;;  %vm430_vm3 = vcmask (!%p227_p3), 130048   ;;  %v892_v15 = vmov (!%p227_p3), 0   ;;  %vm576_vm4 = vcmask (!%p227_p3), 60416  }
   0xb   : > { %783 = vmatprep.subr.bf16.mxu1 (!%p227_p3), %v889_v0  ;;  %785 = vmatprep.mubr.msk.bf16.mxu1 (!%p227_p3), %vm890_vm1, %v889_v0  ;;  %355 = vst.msk [vmem:[#allocation2] sm:$0xff] (!%p227_p3), %vm354_vm2, %v891_v8  ;;  %356 = vst.msk [vmem:[#allocation2 + $0x8] sm:$0xff] (!%p227_p3), %vm354_vm2, %v891_v8 }
   0xc   : > { %357 = vst.msk [vmem:[#allocation3] sm:$0xff] (!%p227_p3), %vm354_vm2, %v889_v0  ;;  %358 = vst.msk [vmem:[#allocation3 + $0x8] sm:$0xff] (!%p227_p3), %vm354_vm2, %v889_v0  ;;  %833 = vset.pattern.permute.xlu1 (!%p227_p3), %v892_v15  ;;  %834 = vset.pattern.permute.xlu0 (!%p227_p3), %v892_v15 }
  0x10   : > { %s1010_s13 = smov (!%p293_p5, %s875_s13), 1  ;;  %s1012_s12 = smov (!%p295_p6, %s871_s12), 3 }
  0x11   : > { %s751_s19 = sshll.u32 %s1010_s13, 3  ;;  %s750_s20 = sshll.u32 %s1012_s12, 1  ;;  %v476_v52 = vld [vmem:[#allocation4] sm:$0xff]  ;;  %v477_v54 = vld [vmem:[#allocation4 + $0x8] sm:$0xff] }
  0x12   : > { %s302_s21 = sadd.s32 %s751_s19, %s750_s20  ;;  %v428_v16 = vld [vmem:[#allocation2] sm:$0xff]  ;;  %v429_v19 = vld [vmem:[#allocation2 + $0x8] sm:$0xff] }
  0x13   : > { %s945_s22 = sshll.u32 %s302_s21, 2  ;;  %v461_v40 = vld [vmem:[#allocation3] sm:$0xff]  ;;  %v462_v43 = vld [vmem:[#allocation3 + $0x8] sm:$0xff] }
  0x14   : > { %s318_s25 = scalar_lea.vmem %s996_s1, %s945_s22  ;;  %s304_s28 = scalar_lea.vmem %s995_s0, %s945_s22 }
  0x15   : > { %v835_v1 = vld [vmem:[%s318_s25] sm:$0xff]   ;;  %s332_s4 = scalar_lea.vmem %s997_s2, %s945_s22  ;;  %s346_s7 = scalar_lea.vmem %s998_s3, %s945_s22 }
  0x16   : > { %v362_v2 = vld [vmem:[%s304_s28] sm:$0xf]  ;;  %v363_v3 = vld [vmem:[%s304_s28 + $0x4] sm:$0xf]  ;;  %v385_v4 = vsel %vm359_vm0, %v835_v1, 0 }
  0x17   : > { %v364_v5 = vmul.bf16 1052065461, %v362_v2  ;;  %v365_v6 = vmul.bf16 1052065461, %v363_v3  ;;  %778 = vmatpush3.bf16.xpose.msra.mxu0 %v385_v4  ;;  %v836_v24 = vld [vmem:[%s332_s4] sm:$0xff]  }
  0x18   : > { %784 = vmatpush3.bf16.msra.mxu1 %v836_v24 }
  0x19   : > { %v762_v7 = vcombine.low %v364_v5, %v365_v6 }
  0x1e   : > { %780 = vmatmul.mubr.msk.bf16.vlgmr.msra.gmra.mrb[0].mxu0 %vm359_vm0, %v762_v7 }
  0xf1   : > { %v421_v9 = vpop.f32.mrb[0].mxu0 }
  0xf2   : > { %v781_v10 = vpop.f32.mrb[1].mxu0  ;;  %v431_v11 = vsel %vm430_vm3, %v421_v9, -inf }
  0xf3   : > { %432 = vmax.xlane.f32.xlu0 %v431_v11  ;;  %v424_v12 = vpop.f32.mrb[2].mxu0 }
  0xf4   : > { %v782_v13 = vpop.f32.mrb[3].mxu0  ;;  %v434_v14 = vsel %vm430_vm3, %v424_v12, -inf }
  0xf7   : > { %435 = vmax.xlane.f32.xlu0 %v434_v14 }
 0x180   : > { %v433_v17 = vpop.xlane.xlu0 %432 }
 0x181   : > { %v437_v18 = vmax.f32 %v428_v16, %v433_v17 }
 0x183   : > { %v439_v20 = vsub.f32 %v428_v16, %v437_v18  ;;  %545 = vst.msk [vmem:[#allocation2] sm:$0xff] %vm354_vm2, %v437_v18  ;;  %447 = vperm.xlu1 %833, %v437_v18  }
 0x184   : > { %v436_v21 = vpop.xlane.xlu0 %435 }
 0x185   : > { %v438_v22 = vmax.f32 %v429_v19, %v436_v21  ;;  %v441_v37 = vmul.f32 1.442695, %v439_v20 }
 0x187   : > { %v440_v23 = vsub.f32 %v429_v19, %v438_v22  ;;  %546 = vst.msk [vmem:[#allocation2 + $0x8] sm:$0xff] %vm354_vm2, %v438_v22  ;;  %452 = vperm.xlu1 %833, %v438_v22  }
 0x189   : > { %v443_v36 = vmul.f32 1.442695, %v440_v23 }
 0x202   : > { %v448_v25 = vpop.permute.xlu1 %447 }
 0x203   : > { %v455_v26 = vsub.f32 %v421_v9, %v448_v25 }
 0x205   : > { %v457_v27 = vmul.f32 1.442695, %v455_v26 }
 0x206   : > { %v453_v28 = vpop.permute.xlu1 %452 }
 0x207   : > { %837 = vpow2.f32 %v457_v27  ;;  %v456_v29 = vsub.f32 %v424_v12, %v453_v28 }
 0x209   : > { %v459_v30 = vmul.f32 1.442695, %v456_v29 }
 0x20b   : > { %839 = vpow2.f32 %v459_v30 }
 0x20c   : > { %841 = vpow2.f32 %v443_v36 }
 0x20d   : > { %843 = vpow2.f32 %v441_v37 }
 0x211   : > { %v838_v31 = vpop.eup %837 }
 0x212   : > { %v465_v32 = vsel %vm430_vm3, %v838_v31, 0.0 }
 0x213   : > { %466 = vadd.xlane.f32.xlu0 %v465_v32 }
 0x215   : > { %v840_v33 = vpop.eup %839 }
 0x216   : > { %v468_v34 = vsel %vm430_vm3, %v840_v33, 0.0  ;;  %v490_v35 = vpack.c.bf16 %v840_v33, %v838_v31  ;;  %v842_v38 = vpop.eup %841 }
 0x217   : > { %469 = vadd.xlane.f32.xlu1 %v468_v34  ;;  %v844_v39 = vpop.eup %843  ;;  %v464_v45 = vmul.f32 %v842_v38, %v462_v43 }
 0x218   : > { %786 = vmatmul.mubr.msk.bf16.vlgmr.msra.gmra.mrb[0].mxu1 %vm430_vm3, %v490_v35  ;;  %v463_v41 = vmul.f32 %v844_v39, %v461_v40 }
 0x228   : > { %485 = vperm.xlu1 %833, %v842_v38  }
 0x229   : > { %480 = vperm.xlu0 %834, %v844_v39  }
 0x2a0   : > { %v467_v42 = vpop.xlane.xlu0 %466 }
 0x2a1   : > { %v471_v44 = vadd.f32 %v467_v42, %v463_v41 }
 0x2a3   : > { %474 = vst.msk [vmem:[#allocation3] sm:$0xff] %vm354_vm2, %v471_v44 }
 0x2a4   : > { %v470_v46 = vpop.xlane.xlu1 %469 }
 0x2a5   : > { %v472_v47 = vadd.f32 %v470_v46, %v464_v45 }
 0x2a7   : > { %475 = vst.msk [vmem:[#allocation3 + $0x8] sm:$0xff] %vm354_vm2, %v472_v47 }
 0x2a8   : > { %v481_v53 = vpop.permute.xlu0 %480  ;;  %v486_v55 = vpop.permute.xlu1 %485 }
 0x2a9   : > { %v488_v56 = vmul.f32 %v481_v53, %v476_v52  ;;  %v489_v58 = vmul.f32 %v486_v55, %v477_v54 }
 0x2aa   : > { %v552_v48 = vld [vmem:[#allocation3] sm:$0xff] }
 0x2ab   : > { %845 = vrcp.f32 %v552_v48 }
 0x2ae   : > { %v553_v49 = vld [vmem:[#allocation3 + $0x8] sm:$0xff] }
 0x2af   : > { %847 = vrcp.f32 %v553_v49 }
 0x2b5   : > { %v846_v50 = vpop.eup %845 }
 0x2b6   : > { %558 = vperm.xlu0 %834, %v846_v50  }
 0x2b9   : > { %v848_v51 = vpop.eup %847 }
 0x2ba   : > { %563 = vperm.xlu0 %834, %v848_v51  }
 0x2eb   : > { %v534_v57 = vpop.f32.mrb[0].mxu1 }
 0x2ec   : > { %v541_v59 = vadd.f32 %v534_v57, %v488_v56  ;;  %v787_v60 = vpop.f32.mrb[1].mxu1 }
 0x2ed   : > { %v537_v61 = vpop.f32.mrb[2].mxu1 }
 0x2ee   : > { %543 = vst.msk [vmem:[#allocation4] sm:$0xff] %vm359_vm0, %v541_v59  ;;  %v542_v62 = vadd.f32 %v537_v61, %v489_v58  ;;  %v788_v63 = vpop.f32.mrb[3].mxu1 }
 0x2f0   : > { %544 = vst.msk [vmem:[#allocation4 + $0x8] sm:$0xff] %vm359_vm0, %v542_v62 }
 0x2f5   : > { %v550_v0 = vld [vmem:[#allocation4] sm:$0xff] }
 0x2f7   : > { %v551_v4 = vld [vmem:[#allocation4 + $0x8] sm:$0xff] }
 0x335   : > { %v559_v1 = vpop.permute.xlu0 %558 }
 0x336   : > { %v566_v2 = vmul.f32 %v559_v1, %v550_v0 }
 0x338   : > { %v771_v3 = vpack.c.bf16 %v566_v2, %v566_v2 }
 0x339   : > { %v564_v5 = vpop.permute.xlu0 %563 }
 0x33a   : > { %577 = vst.msk [vmem:[%s346_s7] sm:$0xf] %vm576_vm4, %v771_v3  ;;  %v567_v6 = vmul.f32 %v564_v5, %v551_v4 }
 0x33c   : > { %v772_v7 = vpack.c.bf16 %v567_v6, %v567_v6 }
 0x33e   : > { %578 = vst.msk [vmem:[%s346_s7 + $0x4] sm:$0xf] %vm576_vm4, %v772_v7 }
 0x33f PF: > { %s13_s16 = sadd.s32 1, %s887_s16   ;;  %s999_s12 = smov %s879_s14 }
 0x340   : > { %p10_p7 = scmp.ge.s32.totalorder %s13_s16, 10   ;;  %s1000_s13 = smov %s883_s15 }
 0x341   : > { %s1001_s14 = smov %s1004_s17  ;;  %s1002_s15 = smov %s1008_s18 }
 0x342   :  { %12 = sbr.rel (!%p10_p7) target bundleno = 3 (0x3), region = 76 }

// kernel: _lambda_.7
= control target key start
LH: loop header
LB: loop body
LE: loop exit
PB: predicated region body
PF: predicated region fallthrough
CT: control target
= control target key end

     0   :  { %s1223_s27 = smov 0   ;;  %s1225_s28 = smov 0   ;;  %s1387_s0 = inlined_call_operand.vmem [shape: f32[2,16,32], index: 0, kind: input, shape index: {}]   ;;  %s1388_s1 = inlined_call_operand.vmem [shape: f32[1,32], index: 1, kind: input, shape index: {}]   ;;  %s1389_s2 = inlined_call_operand.vmem [shape: bf16[32,96], index: 2, kind: input, shape index: {}]   ;;  %s1390_s3 = inlined_call_operand.vmem [shape: bf16[32,32], index: 3, kind: input, shape index: {}]   ;;  %s1391_s4 = inlined_call_operand.vmem [shape: f32[16,32], index: 4, kind: input, shape index: {}]   ;;  %s1392_s5 = inlined_call_operand.vmem [shape: f32[16,32], index: 5, kind: input, shape index: {}]   ;;  %s1393_s6 = inlined_call_operand.vmem [shape: bf16[2,4,16,8], index: 6, kind: output, shape index: {0}]   ;;  %s1394_s7 = inlined_call_operand.vmem [shape: bf16[2,4,16,8], index: 7, kind: output, shape index: {1}]   ;;  %s1395_s8 = inlined_call_operand.vmem [shape: bf16[2,4,16,8], index: 8, kind: output, shape index: {2}]  }
   0x1   :  { %s1227_s29 = smov 0  }
   0x2 LB: > { %s31_s30 = sadd.s32 1, %s1158_s28  ;;  %p1008_p0 = scmp.ge.s32.totalorder %s1162_s29, 1  ;;  %s1162_s29 = sphi %s1227_s29, %s19_s29   ;;  %s1158_s28 = sphi %s1225_s28, %s1397_s28   ;;  %s1154_s27 = sphi %s1223_s27, %s1396_s27  }
   0x3   : > { %p33_p1 = scmp.ge.s32.totalorder %s31_s30, 2  ;;  %p314_p2 = scmp.lt.s32.totalorder %s1162_s29, 3 }
   0x5   : > { %s1399_s30 = smov (%p33_p1, %s31_s30), 0  ;;  %p315_p3 = pnand %p1008_p0, %p314_p2 }
   0x6   : > { %p385_p4 = scmp.lt.s32.totalorder (!%p315_p3), %s1154_s27, 1  ;;  %vm441_vm0 = vcmask (!%p315_p3), 261120   ;;  %v1132_v6 = vld [vmem:[%s1389_s2] sm:$0xff] (!%p315_p3)   ;;  %v1164_v7 = vmov (!%p315_p3), 0.0   ;;  %vm1165_vm1 = vmmov (!%p315_p3), 0   ;;  %v1133_v8 = vld [vmem:[%s1389_s2 + $0x8] sm:$0xff] (!%p315_p3)  }
   0x7   : > { %318 = sbr.rel (%p315_p3) target bundleno = 988 (0x3dc), region = 44  ;;  %1070 = vmatprep.subr.bf16.mxu0 (!%p315_p3), %v1164_v7  ;;  %1074 = vmatprep.mubr.msk.bf16.mxu0 (!%p315_p3), %vm1165_vm1, %v1164_v7  ;;  %v528_v9 = vld [vmem:[%s1391_s4 + $0x8] sm:$0xff] (!%p315_p3)  ;;  %v1134_v10 = vld [vmem:[%s1390_s3] sm:$0xff] (!%p315_p3)   ;;  %s1166_s21 = smov (!%p315_p3), 32   ;;  %vm675_vm2 = vcmask (!%p315_p3), 60416  }
   0x8   : > { %1071 = vmatpush3.bf16.msra.mxu0 (!%p315_p3), %v1132_v6  ;;  %1078 = vmatprep.subr.bf16.mxu1 (!%p315_p3), %v1164_v7  ;;  %v1017_v20 = vld [vmem:[%s1388_s1] ss:$0 sm:$0xff] (!%p315_p3)  ;;  %v1135_v25 = vld [vmem:[%s1390_s3 + $0x8] sm:$0xff] (!%p315_p3)   ;;  %s1167_s10 = smov (!%p315_p3), 96   ;;  %s1169_s19 = smov (!%p315_p3), 56  }
   0x9   : > { %1072 = vmatprep.subr.bf16.mxu0 (!%p315_p3), %v1164_v7  ;;  %1082 = vmatprep.mubr.msk.bf16.mxu1 (!%p315_p3), %vm1165_vm1, %v1164_v7  ;;  %v527_v26 = vld [vmem:[%s1391_s4] sm:$0xff] (!%p315_p3)  ;;  %v530_v36 = vld [vmem:[%s1392_s5 + $0x8] sm:$0xff] (!%p315_p3)  ;;  %s1170_s20 = smov (!%p315_p3), 112   ;;  %s1171_s22 = smov (!%p315_p3), 48  }
   0xa   : > { %1079 = vmatpush3.bf16.msra.mxu1 (!%p315_p3), %v1134_v10  ;;  %v529_v34 = vld [vmem:[%s1392_s5] sm:$0xff] (!%p315_p3)  ;;  %s1172_s23 = smov (!%p315_p3), 104   ;;  %s1175_s11 = smov (!%p315_p3), 80  }
   0xb   : > { %1080 = vmatprep.subr.bf16.mxu1 (!%p315_p3), %v1164_v7  ;;  %s1177_s13 = smov (!%p315_p3), 40  }
   0xc   : > { %1073 = vmatpush3.bf16.msra.mxu0 (!%p315_p3), %v1133_v8 }
   0xd   : > { %1086 = vmatprep.subr.bf16.mxu0 (!%p315_p3), %v1164_v7 }
   0xe   : > { %s1401_s27 = smov (!%p385_p4, %s1154_s27), 1  ;;  %1081 = vmatpush3.bf16.msra.mxu1 %v1135_v25 }
   0xf   : > { %s1051_s9 = sshll.u32 %s1401_s27, 4  ;;  %s1293_s15 = sshll.u32 %s1401_s27, 5 }
  0x10   : > { %s392_s12 = scalar_lea.vmem %s1387_s0, %s1051_s9  ;;  %s1300_s18 = scalar_lea.vmem %s1393_s6, %s1293_s15 }
  0x11   : > { %v437_v0 = vld [vmem:[%s392_s12] sm:$0xff]  ;;  %v438_v1 = vld [vmem:[%s392_s12 + $0x8] sm:$0xff]  ;;  %s1168_s27 = smov 120   ;;  %s1325_s26 = scalar_lea.vmem %s1395_s8, %s1293_s15 }
  0x12   : > { %v439_v2 = vmul.f32 %v437_v0, %v437_v0  ;;  %v440_v3 = vmul.f32 %v438_v1, %v438_v1  ;;  %s1173_s9 = smov 64   ;;  %s1176_s12 = smov 72  }
  0x13   : > { %s424_s16 = scalar_lea.vmem %s1394_s7, %s1293_s15 }
  0x14   : > { %v442_v4 = vsel %vm441_vm0, %v439_v2, 0.0  ;;  %v445_v5 = vsel %vm441_vm0, %v440_v3, 0.0 }
  0x15   : > { %443 = vadd.xlane.f32.xlu0 %v442_v4 }
  0x19   : > { %446 = vadd.xlane.f32.xlu0 %v445_v5 }
  0x2f   : > { %649 = vrot.lane.b32.xlu0 %v528_v9, %s1166_s21 }
  0xa2   : > { %v444_v11 = vpop.xlane.xlu0 %443 }
  0xa3   : > { %v449_v12 = vmul.f32 0.03125, %v444_v11 }
  0xa5   : > { %v451_v13 = vadd.f32 1e-05, %v449_v12 }
  0xa6   : > { %v447_v14 = vpop.xlane.xlu0 %446 }
  0xa7   : > { %1136 = vrsqrt.f32 %v451_v13  ;;  %v450_v15 = vmul.f32 0.03125, %v447_v14 }
  0xa9   : > { %v452_v16 = vadd.f32 1e-05, %v450_v15 }
  0xaa   : > { %v650_v51 = vpop.permute.xlu0 %649 }
  0xab   : > { %1138 = vrsqrt.f32 %v452_v16 }
  0xb1   : > { %v1137_v17 = vpop.eup %1136 }
  0xb2   : > { %v455_v18 = vmul.f32 %v1137_v17, %v437_v0 }
  0xb4   : > { %v464_v22 = vmul.f32 %v1017_v20, %v455_v18 }
  0xb5   : > { %v1139_v19 = vpop.eup %1138 }
  0xb6   : > { %v456_v21 = vmul.f32 %v1139_v19, %v438_v1 }
  0xb8   : > { %v465_v23 = vmul.f32 %v1017_v20, %v456_v21 }
  0xba   : > { %v466_v24 = vpack.c.bf16 %v465_v23, %v464_v22 }
  0xbc   : > { %1075 = vmatmul.mubr.msk.bf16.vlgmr.msra.gmra.mrb[0].mxu0 %vm441_vm0, %v466_v24 }
  0xbd   : > { %1087 = vmatpush3.bf16.msra.mxu0 %v1134_v10  ;;  %1090 = vmatprep.mubr.msk.bf16.mxu0 %vm1165_vm1, %v1164_v7 }
  0xbe   : > { %1088 = vmatprep.subr.bf16.mxu0 %v1164_v7 }
  0xc1   : > { %1089 = vmatpush3.bf16.msra.mxu0 %v1135_v25 }
 0x18f   : > { %v1275_v27 = vpop.f32.mrb[0].mxu0 }
 0x190   : > { %v1076_v28 = vpop.f32.mrb[1].mxu0  ;;  %v592_v29 = vmul.f32 %v527_v26, %v1275_v27  ;;  %v1307_v47 = vpack.c.bf16 %v1275_v27, %v1275_v27 }
 0x191   : > { %v1278_v30 = vpop.f32.mrb[2].mxu0 }
 0x192   : > { %v1077_v31 = vpop.f32.mrb[3].mxu0  ;;  %v535_v32 = vpack.c.bf16 %v1278_v30, %v1275_v27  ;;  %v593_v41 = vmul.f32 %v528_v9, %v1278_v30  ;;  %v1060_v57 = vpack.c.bf16 %v1278_v30, %v1278_v30  ;;  %v654_v1 = vmul.f32 %v650_v51, %v1278_v30 }
 0x194   : > { %599 = vrot.lane.b32.xlu1 %v535_v32, %s1167_s10  ;;  %1083 = vmatmul.mubr.msk.bf16.vlgmr.msra.gmra.mrb[0].mxu1 %vm441_vm0, %v535_v32 }
 0x198   : > { %647 = vrot.lane.b32.xlu1 %v527_v26, %s1166_s21 }
 0x206   : > { %v600_v33 = vpop.permute.xlu1 %599 }
 0x207   : > { %1091 = vmatmul.mubr.msk.bf16.vlgmr.msra.gmra.mrb[4].mxu0 %vm441_vm0, %v600_v33 }
 0x20a   : > { %v648_v61 = vpop.permute.xlu1 %647 }
 0x20b   : > { %v653_v62 = vmul.f32 %v648_v61, %v1275_v27 }
 0x267   : > { %v585_v35 = vpop.f32.mrb[0].mxu1 }
 0x268   : > { %v594_v37 = vmul.f32 %v585_v35, %v529_v34  ;;  %v1084_v38 = vpop.f32.mrb[1].mxu1 }
 0x269   : > { %v588_v39 = vpop.f32.mrb[2].mxu1 }
 0x26a   : > { %v596_v40 = vadd.f32 %v594_v37, %v592_v29  ;;  %v595_v42 = vmul.f32 %v588_v39, %v530_v36  ;;  %v1085_v43 = vpop.f32.mrb[3].mxu1 }
 0x26c   : > { %v1055_v44 = vpack.c.bf16 %v596_v40, %v596_v40  ;;  %v597_v45 = vadd.f32 %v595_v42, %v593_v41 }
 0x26e   : > { %676 = vst.msk [vmem:[%s1300_s18] sm:$0xf] %vm675_vm2, %v1055_v44  ;;  %v1056_v46 = vpack.c.bf16 %v597_v45, %v597_v45  ;;  %704 = vrot.lane.b32.xlu0 %v1055_v44, %s1168_s27 }
 0x270   : > { %677 = vst.msk [vmem:[%s1300_s18 + $0x4] sm:$0xf] %vm675_vm2, %v1056_v46 }
 0x272   : > { %722 = vrot.lane.b32.xlu0 %v1307_v47, %s1169_s19 }
 0x276   : > { %731 = vrot.lane.b32.xlu0 %v1055_v44, %s1170_s20 }
 0x27a   : > { %749 = vrot.lane.b32.xlu0 %v1307_v47, %s1171_s22 }
 0x27e   : > { %758 = vrot.lane.b32.xlu0 %v1055_v44, %s1172_s23 }
 0x2da   : > { %v638_v48 = vpop.f32.mrb[4].mxu0 }
 0x2db   : > { %v655_v49 = vmul.f32 %v638_v48, %v529_v34  ;;  %v1092_v50 = vpop.f32.mrb[5].mxu0 }
 0x2dc   : > { %v641_v52 = vpop.f32.mrb[6].mxu0 }
 0x2dd   : > { %659 = vrot.lane.b32.xlu1 %v655_v49, %s1166_s21  ;;  %v1093_v53 = vpop.f32.mrb[7].mxu0  ;;  %v656_v54 = vmul.f32 %v641_v52, %v530_v36 }
 0x2e0   : > { %v705_v55 = vpop.permute.xlu0 %704 }
 0x2e1   : > { %1031 = vst.msk [vmem:[%s1300_s18 + $0x8] sm:$0xf] %vm675_vm2, %v705_v55  ;;  %661 = vrot.lane.b32.xlu1 %v656_v54, %s1166_s21  ;;  %s1174_s21 = smov 88  }
 0x2e4   : > { %v723_v56 = vpop.permute.xlu0 %722 }
 0x2e5   : > { %1035 = vst.msk [vmem:[%s1325_s26 + $0x8] sm:$0xf] %vm675_vm2, %v723_v56  ;;  %696 = vrot.lane.b32.xlu1 %v1307_v47, %s1173_s9 }
 0x2e8   : > { %v732_v58 = vpop.permute.xlu0 %731 }
 0x2e9   : > { %1037 = vst.msk [vmem:[%s1300_s18 + $0x10] sm:$0xf] %vm675_vm2, %v732_v58  ;;  %698 = vrot.lane.b32.xlu1 %v1060_v57, %s1173_s9 }
 0x2ec   : > { %v750_v59 = vpop.permute.xlu0 %749 }
 0x2ed   : > { %1041 = vst.msk [vmem:[%s1325_s26 + $0x10] sm:$0xf] %vm675_vm2, %v750_v59  ;;  %706 = vrot.lane.b32.xlu1 %v1056_v46, %s1168_s27 }
 0x2f0   : > { %v759_v60 = vpop.permute.xlu0 %758 }
 0x2f1   : > { %1043 = vst.msk [vmem:[%s1300_s18 + $0x18] sm:$0xf] %vm675_vm2, %v759_v60  ;;  %724 = vrot.lane.b32.xlu1 %v1060_v57, %s1169_s19 }
 0x2f5   : > { %733 = vrot.lane.b32.xlu1 %v1056_v46, %s1170_s20 }
 0x2f9   : > { %751 = vrot.lane.b32.xlu1 %v1060_v57, %s1171_s22 }
 0x2fd   : > { %760 = vrot.lane.b32.xlu1 %v1056_v46, %s1172_s23 }
 0x34f   : > { %v660_v63 = vpop.permute.xlu1 %659 }
 0x350   : > { %v665_v0 = vadd.f32 %v660_v63, %v653_v62 }
 0x352   : > { %v1057_v2 = vpack.c.bf16 %v665_v0, %v665_v0 }
 0x353   : > { %v662_v3 = vpop.permute.xlu1 %661 }
 0x354   : > { %v666_v4 = vadd.f32 %v662_v3, %v654_v1  ;;  %713 = vrot.lane.b32.xlu0 %v1057_v2, %s1174_s21  ;;  %684 = vrot.lane.b32.xlu1 %v1057_v2, %s1167_s10 }
 0x356   : > { %v1058_v5 = vpack.c.bf16 %v666_v4, %v666_v4 }
 0x357   : > { %v697_v6 = vpop.permute.xlu1 %696 }
 0x358   : > { %702 = vst.msk [vmem:[%s1325_s26] sm:$0xf] %vm675_vm2, %v697_v6  ;;  %740 = vrot.lane.b32.xlu0 %v1057_v2, %s1175_s11  ;;  %686 = vrot.lane.b32.xlu1 %v1058_v5, %s1167_s10 }
 0x35b   : > { %v699_v7 = vpop.permute.xlu1 %698 }
 0x35c   : > { %703 = vst.msk [vmem:[%s1325_s26 + $0x4] sm:$0xf] %vm675_vm2, %v699_v7  ;;  %767 = vrot.lane.b32.xlu0 %v1057_v2, %s1176_s12  ;;  %715 = vrot.lane.b32.xlu1 %v1058_v5, %s1174_s21 }
 0x35f   : > { %v707_v8 = vpop.permute.xlu1 %706 }
 0x360   : > { %1032 = vst.msk [vmem:[%s1300_s18 + $0xc] sm:$0xf] %vm675_vm2, %v707_v8  ;;  %776 = vrot.lane.b32.xlu0 %v1307_v47, %s1177_s13  ;;  %742 = vrot.lane.b32.xlu1 %v1058_v5, %s1175_s11 }
 0x363   : > { %v725_v9 = vpop.permute.xlu1 %724 }
 0x364   : > { %1036 = vst.msk [vmem:[%s1325_s26 + $0xc] sm:$0xf] %vm675_vm2, %v725_v9  ;;  %769 = vrot.lane.b32.xlu1 %v1058_v5, %s1176_s12 }
 0x367   : > { %v734_v10 = vpop.permute.xlu1 %733 }
 0x368   : > { %1038 = vst.msk [vmem:[%s1300_s18 + $0x14] sm:$0xf] %vm675_vm2, %v734_v10  ;;  %778 = vrot.lane.b32.xlu1 %v1060_v57, %s1177_s13 }
 0x36b   : > { %v752_v11 = vpop.permute.xlu1 %751 }
 0x36c   : > { %1042 = vst.msk [vmem:[%s1325_s26 + $0x14] sm:$0xf] %vm675_vm2, %v752_v11 }
 0x36f   : > { %v761_v12 = vpop.permute.xlu1 %760 }
 0x370   : > { %1044 = vst.msk [vmem:[%s1300_s18 + $0x1c] sm:$0xf] %vm675_vm2, %v761_v12 }
 0x3c6   : > { %v685_v13 = vpop.permute.xlu1 %684  ;;  %v714_v14 = vpop.permute.xlu0 %713 }
 0x3c7   : > { %690 = vst.msk [vmem:[%s424_s16] sm:$0xf] %vm675_vm2, %v685_v13  ;;  %1033 = vst.msk [vmem:[%s424_s16 + $0x8] sm:$0xf] %vm675_vm2, %v714_v14 }
 0x3ca   : > { %v687_v15 = vpop.permute.xlu1 %686  ;;  %v741_v16 = vpop.permute.xlu0 %740 }
 0x3cb   : > { %691 = vst.msk [vmem:[%s424_s16 + $0x4] sm:$0xf] %vm675_vm2, %v687_v15  ;;  %1039 = vst.msk [vmem:[%s424_s16 + $0x10] sm:$0xf] %vm675_vm2, %v741_v16 }
 0x3ce   : > { %v716_v17 = vpop.permute.xlu1 %715  ;;  %v768_v18 = vpop.permute.xlu0 %767 }
 0x3cf   : > { %1034 = vst.msk [vmem:[%s424_s16 + $0xc] sm:$0xf] %vm675_vm2, %v716_v17  ;;  %1045 = vst.msk [vmem:[%s424_s16 + $0x18] sm:$0xf] %vm675_vm2, %v768_v18 }
 0x3d2   : > { %v743_v19 = vpop.permute.xlu1 %742  ;;  %v777_v20 = vpop.permute.xlu0 %776 }
 0x3d3   : > { %1040 = vst.msk [vmem:[%s424_s16 + $0x14] sm:$0xf] %vm675_vm2, %v743_v19  ;;  %1047 = vst.msk [vmem:[%s1325_s26 + $0x18] sm:$0xf] %vm675_vm2, %v777_v20 }
 0x3d6   : > { %v770_v21 = vpop.permute.xlu1 %769 }
 0x3d7   : > { %1046 = vst.msk [vmem:[%s424_s16 + $0x1c] sm:$0xf] %vm675_vm2, %v770_v21 }
 0x3da   : > { %v779_v22 = vpop.permute.xlu1 %778 }
 0x3db   : > { %1048 = vst.msk [vmem:[%s1325_s26 + $0x1c] sm:$0xf] %vm675_vm2, %v779_v22 }
 0x3dc PF: > { %s19_s29 = sadd.s32 1, %s1162_s29   ;;  %s1396_s27 = smov %s1158_s28 }
 0x3dd   : > { %p16_p5 = scmp.ge.s32.totalorder %s19_s29, 4   ;;  %s1397_s28 = smov %s1399_s30 }
 0x3df   :  { %18 = sbr.rel (!%p16_p5) target bundleno = 2 (0x2), region = 113 }

// kernel: _lambda_.10
= control target key start
LH: loop header
LB: loop body
LE: loop exit
PB: predicated region body
PF: predicated region fallthrough
CT: control target
= control target key end

     0   :  { %s1083_s27 = smov 0   ;;  %s1085_s28 = smov 0   ;;  %s1195_s0 = inlined_call_operand.vmem [shape: f32[2,8,32], index: 0, kind: input, shape index: {}]   ;;  %s1196_s1 = inlined_call_operand.vmem [shape: f32[1,32], index: 1, kind: input, shape index: {}]   ;;  %s1197_s2 = inlined_call_operand.vmem [shape: bf16[32,96], index: 2, kind: input, shape index: {}]   ;;  %s1198_s3 = inlined_call_operand.vmem [shape: bf16[32,32], index: 3, kind: input, shape index: {}]   ;;  %s1199_s4 = inlined_call_operand.vmem [shape: f32[8,32], index: 4, kind: input, shape index: {}]   ;;  %s1200_s5 = inlined_call_operand.vmem [shape: f32[8,32], index: 5, kind: input, shape index: {}]   ;;  %s1201_s6 = inlined_call_operand.vmem [shape: bf16[2,4,8,8], index: 6, kind: output, shape index: {0}]   ;;  %s1202_s7 = inlined_call_operand.vmem [shape: bf16[2,4,8,8], index: 7, kind: output, shape index: {1}]   ;;  %s1203_s8 = inlined_call_operand.vmem [shape: bf16[2,4,8,8], index: 8, kind: output, shape index: {2}]  }
   0x1   :  { %s1087_s29 = smov 0  }
   0x2 LB: > { %s31_s30 = sadd.s32 1, %s1018_s28  ;;  %p887_p0 = scmp.ge.s32.totalorder %s1022_s29, 1  ;;  %s1022_s29 = sphi %s1087_s29, %s19_s29   ;;  %s1018_s28 = sphi %s1085_s28, %s1205_s28   ;;  %s1014_s27 = sphi %s1083_s27, %s1204_s27  }
   0x3   : > { %p33_p1 = scmp.ge.s32.totalorder %s31_s30, 2  ;;  %p307_p2 = scmp.lt.s32.totalorder %s1022_s29, 3 }
   0x5   : > { %s1207_s30 = smov (%p33_p1, %s31_s30), 0  ;;  %p308_p3 = pnand %p887_p0, %p307_p2 }
   0x6   : > { %p370_p4 = scmp.lt.s32.totalorder (!%p308_p3), %s1014_s27, 1  ;;  %vm412_vm0 = vcmask (!%p308_p3), 261120   ;;  %v994_v3 = vld [vmem:[%s1197_s2] sm:$0xff] (!%p308_p3)   ;;  %v1024_v4 = vmov (!%p308_p3), 0.0   ;;  %vm1025_vm1 = vmmov (!%p308_p3), 0   ;;  %v995_v5 = vld [vmem:[%s1197_s2 + $0x8] sm:$0xff] (!%p308_p3)  }
   0x7   : > { %311 = sbr.rel (%p308_p3) target bundleno = 974 (0x3ce), region = 44  ;;  %932 = vmatprep.subr.bf16.mxu0 (!%p308_p3), %v1024_v4  ;;  %936 = vmatprep.mubr.msk.bf16.mxu0 (!%p308_p3), %vm1025_vm1, %v1024_v4  ;;  %v489_v6 = vld [vmem:[%s1199_s4] sm:$0xff] (!%p308_p3)  ;;  %s1026_s21 = smov (!%p308_p3), 32   ;;  %v997_v16 = vld [vmem:[%s1198_s3 + $0x8] sm:$0xff] (!%p308_p3)   ;;  %vm612_vm2 = vcmask (!%p308_p3), 60416  }
   0x8   : > { %933 = vmatpush3.bf16.msra.mxu0 (!%p308_p3), %v994_v3  ;;  %940 = vmatprep.subr.bf16.mxu1 (!%p308_p3), %v1024_v4  ;;  %v996_v7 = vld [vmem:[%s1198_s3] sm:$0xff] (!%p308_p3)   ;;  %s1027_s26 = smov (!%p308_p3), 96   ;;  %s1028_s15 = smov (!%p308_p3), 112  }
   0x9   : > { %934 = vmatprep.subr.bf16.mxu0 (!%p308_p3), %v1024_v4  ;;  %944 = vmatprep.mubr.msk.bf16.mxu1 (!%p308_p3), %vm1025_vm1, %v1024_v4  ;;  %v895_v12 = vld [vmem:[%s1196_s1] ss:$0 sm:$0xff] (!%p308_p3)  ;;  %s1030_s16 = smov (!%p308_p3), 64   ;;  %s1031_s20 = smov (!%p308_p3), 120  }
   0xa   : > { %601 = vrot.lane.b32.xlu1 (!%p308_p3), %v489_v6, %s1026_s21  ;;  %941 = vmatpush3.bf16.msra.mxu1 (!%p308_p3), %v996_v7  ;;  %v490_v23 = vld [vmem:[%s1200_s5] sm:$0xff] (!%p308_p3)  ;;  %s1033_s22 = smov (!%p308_p3), 104   ;;  %s1034_s23 = smov (!%p308_p3), 72  }
   0xb   : > { %942 = vmatprep.subr.bf16.mxu1 (!%p308_p3), %v1024_v4  ;;  %s1035_s24 = smov (!%p308_p3), 88   ;;  %s1036_s25 = smov (!%p308_p3), 80  }
   0xc   : > { %935 = vmatpush3.bf16.msra.mxu0 (!%p308_p3), %v995_v5 }
   0xd   : > { %948 = vmatprep.subr.bf16.mxu0 (!%p308_p3), %v1024_v4 }
   0xe   : > { %s1209_s27 = smov (!%p370_p4, %s1014_s27), 1  ;;  %943 = vmatpush3.bf16.msra.mxu1 %v997_v16 }
   0xf   : > { %s888_s9 = sshll.u32 %s1209_s27, 3  ;;  %s1142_s11 = sshll.u32 %s1209_s27, 4 }
  0x10   : > { %s376_s12 = scalar_lea.vmem %s1195_s0, %s888_s9  ;;  %s1148_s14 = scalar_lea.vmem %s1201_s6, %s1142_s11 }
  0x11   : > { %v410_v0 = vld [vmem:[%s376_s12] sm:$0xff]  ;;  %s1029_s27 = smov 48   ;;  %s1161_s19 = scalar_lea.vmem %s1203_s8, %s1142_s11 }
  0x12   : > { %v411_v1 = vmul.f32 %v410_v0, %v410_v0  ;;  %s1037_s9 = smov 40  }
  0x14   : > { %v413_v2 = vsel %vm412_vm0, %v411_v1, 0.0 }
  0x15   : > { %414 = vadd.xlane.f32.xlu0 %v413_v2 }
  0x7c   : > { %v602_v39 = vpop.permute.xlu1 %601 }
  0xa2   : > { %v415_v8 = vpop.xlane.xlu0 %414 }
  0xa3   : > { %v417_v9 = vmul.f32 0.03125, %v415_v8 }
  0xa5   : > { %v418_v10 = vadd.f32 1e-05, %v417_v9 }
  0xa7   : > { %998 = vrsqrt.f32 %v418_v10 }
  0xb1   : > { %v999_v11 = vpop.eup %998 }
  0xb2   : > { %v420_v13 = vmul.f32 %v999_v11, %v410_v0 }
  0xb4   : > { %v428_v14 = vmul.f32 %v895_v12, %v420_v13 }
  0xb6   : > { %v429_v15 = vpack.c.bf16 %v428_v14, %v428_v14 }
  0xb8   : > { %937 = vmatmul.mubr.msk.bf16.vlgmr.msra.gmra.mrb[0].mxu0 %vm412_vm0, %v429_v15 }
  0xb9   : > { %949 = vmatpush3.bf16.msra.mxu0 %v996_v7  ;;  %952 = vmatprep.mubr.msk.bf16.mxu0 %vm1025_vm1, %v1024_v4 }
  0xba   : > { %950 = vmatprep.subr.bf16.mxu0 %v1024_v4 }
  0xbd   : > { %951 = vmatpush3.bf16.msra.mxu0 %v997_v16 }
 0x18b   : > { %v483_v17 = vpop.f32.mrb[0].mxu0 }
 0x18c   : > { %v1131_v18 = vpack.c.bf16 %v483_v17, %v483_v17  ;;  %v938_v19 = vpop.f32.mrb[1].mxu0  ;;  %v551_v25 = vmul.f32 %v489_v6, %v483_v17  ;;  %v604_v40 = vmul.f32 %v602_v39, %v483_v17 }
 0x18d   : > { %v486_v20 = vpop.f32.mrb[2].mxu0 }
 0x18e   : > { %555 = vrot.lane.b32.xlu0 %v1131_v18, %s1027_s26  ;;  %v939_v21 = vpop.f32.mrb[3].mxu0  ;;  %945 = vmatmul.mubr.msk.bf16.vlgmr.msra.gmra.mrb[0].mxu1 %vm412_vm0, %v1131_v18 }
 0x200   : > { %v556_v22 = vpop.permute.xlu0 %555 }
 0x201   : > { %953 = vmatmul.mubr.msk.bf16.vlgmr.msra.gmra.mrb[4].mxu0 %vm412_vm0, %v556_v22 }
 0x261   : > { %v545_v24 = vpop.f32.mrb[0].mxu1 }
 0x262   : > { %v552_v26 = vmul.f32 %v545_v24, %v490_v23  ;;  %v946_v27 = vpop.f32.mrb[1].mxu1 }
 0x263   : > { %v548_v28 = vpop.f32.mrb[2].mxu1 }
 0x264   : > { %v553_v29 = vadd.f32 %v552_v26, %v551_v25  ;;  %v947_v30 = vpop.f32.mrb[3].mxu1 }
 0x266   : > { %v611_v31 = vpack.c.bf16 %v553_v29, %v553_v29 }
 0x268   : > { %646 = vrot.lane.b32.xlu0 %v611_v31, %s1028_s15  ;;  %613 = vst.msk [vmem:[%s1148_s14] sm:$0xf] %vm612_vm2, %v611_v31 }
 0x26c   : > { %656 = vrot.lane.b32.xlu0 %v1131_v18, %s1029_s27 }
 0x2d4   : > { %v594_v32 = vpop.f32.mrb[4].mxu0 }
 0x2d5   : > { %v605_v33 = vmul.f32 %v594_v32, %v490_v23  ;;  %v954_v34 = vpop.f32.mrb[5].mxu0 }
 0x2d6   : > { %v597_v35 = vpop.f32.mrb[6].mxu0 }
 0x2d7   : > { %607 = vrot.lane.b32.xlu1 %v605_v33, %s1026_s21  ;;  %v955_v36 = vpop.f32.mrb[7].mxu0  ;;  %s1032_s21 = smov 56  }
 0x2da   : > { %v647_v37 = vpop.permute.xlu0 %646 }
 0x2db   : > { %909 = vst.msk [vmem:[%s1148_s14 + $0x8] sm:$0xf] %vm612_vm2, %v647_v37  ;;  %624 = vrot.lane.b32.xlu1 %v1131_v18, %s1030_s16 }
 0x2de   : > { %v657_v38 = vpop.permute.xlu0 %656 }
 0x2df   : > { %911 = vst.msk [vmem:[%s1161_s19 + $0x8] sm:$0xf] %vm612_vm2, %v657_v38  ;;  %631 = vrot.lane.b32.xlu1 %v611_v31, %s1031_s20 }
 0x2e3   : > { %641 = vrot.lane.b32.xlu1 %v1131_v18, %s1032_s21 }
 0x2e7   : > { %661 = vrot.lane.b32.xlu1 %v611_v31, %s1033_s22 }
 0x349   : > { %v608_v41 = vpop.permute.xlu1 %607 }
 0x34a   : > { %v610_v42 = vadd.f32 %v608_v41, %v604_v40 }
 0x34c   : > { %v920_v43 = vpack.c.bf16 %v610_v42, %v610_v42 }
 0x34d   : > { %v625_v44 = vpop.permute.xlu1 %624 }
 0x34e   : > { %627 = vst.msk [vmem:[%s1161_s19] sm:$0xf] %vm612_vm2, %v625_v44  ;;  %666 = vrot.lane.b32.xlu0 %v920_v43, %s1034_s23  ;;  %618 = vrot.lane.b32.xlu1 %v920_v43, %s1027_s26  ;;  %s400_s26 = scalar_lea.vmem %s1202_s7, %s1142_s11 }
 0x351   : > { %v632_v45 = vpop.permute.xlu1 %631 }
 0x352   : > { %906 = vst.msk [vmem:[%s1148_s14 + $0x4] sm:$0xf] %vm612_vm2, %v632_v45  ;;  %636 = vrot.lane.b32.xlu1 %v920_v43, %s1035_s24 }
 0x355   : > { %v642_v46 = vpop.permute.xlu1 %641 }
 0x356   : > { %908 = vst.msk [vmem:[%s1161_s19 + $0x4] sm:$0xf] %vm612_vm2, %v642_v46  ;;  %651 = vrot.lane.b32.xlu1 %v920_v43, %s1036_s25 }
 0x359   : > { %v662_v47 = vpop.permute.xlu1 %661 }
 0x35a   : > { %912 = vst.msk [vmem:[%s1148_s14 + $0xc] sm:$0xf] %vm612_vm2, %v662_v47  ;;  %671 = vrot.lane.b32.xlu1 %v1131_v18, %s1037_s9 }
 0x3c0   : > { %v667_v48 = vpop.permute.xlu0 %666  ;;  %v619_v49 = vpop.permute.xlu1 %618 }
 0x3c1   : > { %913 = vst.msk [vmem:[%s400_s26 + $0xc] sm:$0xf] %vm612_vm2, %v667_v48  ;;  %621 = vst.msk [vmem:[%s400_s26] sm:$0xf] %vm612_vm2, %v619_v49 }
 0x3c4   : > { %v637_v50 = vpop.permute.xlu1 %636 }
 0x3c5   : > { %907 = vst.msk [vmem:[%s400_s26 + $0x4] sm:$0xf] %vm612_vm2, %v637_v50 }
 0x3c8   : > { %v652_v51 = vpop.permute.xlu1 %651 }
 0x3c9   : > { %910 = vst.msk [vmem:[%s400_s26 + $0x8] sm:$0xf] %vm612_vm2, %v652_v51 }
 0x3cc   : > { %v672_v52 = vpop.permute.xlu1 %671 }
 0x3cd   : > { %914 = vst.msk [vmem:[%s1161_s19 + $0xc] sm:$0xf] %vm612_vm2, %v672_v52 }
 0x3ce PF: > { %s19_s29 = sadd.s32 1, %s1022_s29   ;;  %s1204_s27 = smov %s1018_s28 }
 0x3cf   : > { %p16_p5 = scmp.ge.s32.totalorder %s19_s29, 4   ;;  %s1205_s28 = smov %s1207_s30 }
 0x3d1   :  { %18 = sbr.rel (!%p16_p5) target bundleno = 2 (0x2), region = 113 }

// kernel: _lambda_.9
= control target key start
LH: loop header
LB: loop body
LE: loop exit
PB: predicated region body
PF: predicated region fallthrough
CT: control target
= control target key end

     0   :  { %s1183_s24 = smov 0   ;;  %s1185_s25 = smov 0   ;;  %s1308_s0 = inlined_call_operand.vmem [shape: f32[2,16,32], index: 0, kind: input, shape index: {}]   ;;  %s1309_s1 = inlined_call_operand.vmem [shape: bf16[2,4,16,8], index: 1, kind: input, shape index: {}]   ;;  %s1310_s2 = inlined_call_operand.vmem [shape: bf16[4,8,32], index: 2, kind: input, shape index: {}]   ;;  %s1311_s3 = inlined_call_operand.vmem [shape: f32[1,32], index: 3, kind: input, shape index: {}]   ;;  %s1312_s4 = inlined_call_operand.vmem [shape: bf16[32,128], index: 4, kind: input, shape index: {}]   ;;  %s1313_s5 = inlined_call_operand.vmem [shape: bf16[64,32], index: 5, kind: input, shape index: {}]   ;;  %s1314_s6 = inlined_call_operand.vmem [shape: f32[8,16], index: 6, kind: input, shape index: {}]   ;;  %s1315_s7 = inlined_call_operand.vmem [shape: f32[2,8,32], index: 7, kind: output, shape index: {}]  }
   0x1   :  { %s1187_s26 = smov 0  }
   0x2 LB: > { %s29_s27 = sadd.s32 1, %s1133_s25  ;;  %p953_p0 = scmp.ge.s32.totalorder %s1137_s26, 1  ;;  %s1137_s26 = sphi %s1187_s26, %s17_s26   ;;  %s1133_s25 = sphi %s1185_s25, %s1317_s25   ;;  %s1129_s24 = sphi %s1183_s24, %s1316_s24  }
   0x3   : > { %p31_p1 = scmp.ge.s32.totalorder %s29_s27, 2  ;;  %p275_p2 = scmp.lt.s32.totalorder %s1137_s26, 3 }
   0x5   : > { %s1319_s27 = smov (%p31_p1, %s29_s27), 0  ;;  %p276_p3 = pnand %p953_p0, %p275_p2 }
   0x6   : > { %v961_v0 = vld [vmem:[%s1310_s2 + $0x4] sm:$0xf] (!%p276_p3)  ;;  %vm369_vm0 = vcmask (!%p276_p3), 1043456   ;;  %v354_v1 = vld [vmem:[%s1310_s2] sm:$0xf] (!%p276_p3)  ;;  %v1139_v2 = vmov (!%p276_p3), 0.0  }
   0x7   : > { %279 = sbr.rel (%p276_p3) target bundleno = 1183 (0x49f), region = 48  ;;  %1011 = vmatprep.subr.bf16.mxu0 (!%p276_p3), %v1139_v2  ;;  %1017 = vmatprep.subr.bf16.mxu1 (!%p276_p3), %v1139_v2  ;;  %v371_v3 = vsel (!%p276_p3), %vm369_vm0, %v961_v0, 0  ;;  %v423_v4 = vsel (!%p276_p3), %vm369_vm0, %v354_v1, 0  ;;  %p323_p4 = scmp.lt.s32.totalorder (!%p276_p3), %s1129_s24, 1  ;;  %v968_v5 = vld [vmem:[%s1310_s2 + $0x8] sm:$0xf] (!%p276_p3) }
   0x8   : > { %1012 = vmatpush3.bf16.msra.mxu0 (!%p276_p3), %v371_v3  ;;  %1018 = vmatpush3.bf16.msra.mxu1 (!%p276_p3), %v423_v4  ;;  %vm1140_vm1 = vmmov (!%p276_p3), 0   ;;  %v973_v6 = vld [vmem:[%s1310_s2 + $0xc] sm:$0xf] (!%p276_p3)  ;;  %vm365_vm2 = vcmask (!%p276_p3), 64512   ;;  %v480_v8 = vsel (!%p276_p3), %vm369_vm0, %v968_v5, 0  ;;  %vm588_vm3 = vcmask (!%p276_p3), 261120  }
   0x9   : > { %1013 = vmatprep.mubr.msk.bf16.mxu0 (!%p276_p3), %vm1140_vm1, %v1139_v2  ;;  %1019 = vmatprep.mubr.msk.bf16.mxu1 (!%p276_p3), %vm1140_vm1, %v1139_v2  ;;  %v539_v10 = vsel (!%p276_p3), %vm369_vm0, %v973_v6, 0  ;;  %v1097_v43 = vld [vmem:[%s1312_s4] sm:$0xff] (!%p276_p3)   ;;  %v1098_v44 = vld [vmem:[%s1312_s4 + $0x8] sm:$0xff] (!%p276_p3)   ;;  %v1101_v61 = vld [vmem:[%s1313_s5 + $0x10] sm:$0xff] (!%p276_p3)   ;;  %vm731_vm4 = vcmask (!%p276_p3), 523264   ;;  %vm779_vm5 = vcmask (!%p276_p3), 130048  }
   0xa   : > { %1023 = vmatprep.subr.bf16.mxu0 (!%p276_p3), %v1139_v2  ;;  %1029 = vmatprep.subr.bf16.mxu1 (!%p276_p3), %v1139_v2  ;;  %v976_v54 = vld [vmem:[%s1311_s3] ss:$0 sm:$0xff] (!%p276_p3)  ;;  %v1100_v60 = vld [vmem:[%s1313_s5 + $0x8] sm:$0xff] (!%p276_p3)   ;;  %v1102_v62 = vld [vmem:[%s1313_s5 + $0x18] sm:$0xff] (!%p276_p3)  }
   0xb   : > { %v1099_v59 = vld [vmem:[%s1313_s5] sm:$0xff] (!%p276_p3)  }
   0xe   : > { %s1321_s24 = smov (!%p323_p4, %s1129_s24), 1 }
   0xf   : > { %s991_s13 = sshll.u32 %s1321_s24, 5  ;;  %s990_s17 = sshll.u32 %s1321_s24, 4 }
  0x10   : > { %s340_s16 = scalar_lea.vmem %s1309_s1, %s991_s13  ;;  %s330_s20 = scalar_lea.vmem %s1308_s0, %s990_s17 }
  0x11   : > { %v1093_v7 = vld [vmem:[%s340_s16 + $0x8] sm:$0xff]   ;;  %v1094_v9 = vld [vmem:[%s340_s16] sm:$0xff]   ;;  %v1095_v11 = vld [vmem:[%s340_s16 + $0x10] sm:$0xff]   ;;  %s958_s19 = sshll.u32 %s1321_s24, 3 }
  0x12   : > { %1014 = vmatmul.mubr.msk.bf16.vlgmr.msra.gmra.mrb[0].mxu0 %vm365_vm2, %v1093_v7  ;;  %1020 = vmatmul.mubr.msk.bf16.vlgmr.msra.gmra.mrb[0].mxu1 %vm365_vm2, %v1094_v9  ;;  %v1096_v12 = vld [vmem:[%s340_s16 + $0x18] sm:$0xff]   ;;  %v350_v27 = vld [vmem:[%s330_s20] sm:$0xff]  ;;  %v351_v34 = vld [vmem:[%s330_s20 + $0x8] sm:$0xff]  ;;  %s1141_s16 = smov 64   ;;  %s348_s22 = scalar_lea.vmem %s1315_s7, %s958_s19 }
  0x13   : > { %1024 = vmatpush3.bf16.msra.mxu0 %v480_v8  ;;  %1030 = vmatpush3.bf16.msra.mxu1 %v539_v10 }
  0x14   : > { %1025 = vmatprep.mubr.msk.bf16.mxu0 %vm1140_vm1, %v1139_v2  ;;  %1031 = vmatprep.mubr.msk.bf16.mxu1 %vm1140_vm1, %v1139_v2 }
  0x15   : > { %1035 = vmatprep.subr.bf16.mxu0 %v1139_v2  ;;  %1043 = vmatprep.subr.bf16.mxu1 %v1139_v2 }
  0x1a   : > { %1026 = vmatmul.mubr.msk.bf16.vlgmr.msra.gmra.mrb[4].mxu0 %vm365_vm2, %v1095_v11  ;;  %1032 = vmatmul.mubr.msk.bf16.vlgmr.msra.gmra.mrb[4].mxu1 %vm365_vm2, %v1096_v12 }
  0x1b   : > { %1039 = vmatprep.mubr.msk.bf16.mxu0 %vm1140_vm1, %v1139_v2  ;;  %1051 = vmatprep.mubr.msk.bf16.mxu1 %vm1140_vm1, %v1139_v2 }
  0x1c   : > { %1036 = vmatpush3.bf16.msra.mxu0 %v1097_v43  ;;  %1044 = vmatpush3.bf16.msra.mxu1 %v1099_v59 }
  0x1d   : > { %1037 = vmatprep.subr.bf16.mxu0 %v1139_v2  ;;  %1045 = vmatprep.subr.bf16.mxu1 %v1139_v2 }
  0x20   : > { %1038 = vmatpush3.bf16.msra.mxu0 %v1098_v44  ;;  %1046 = vmatpush3.bf16.msra.mxu1 %v1100_v60 }
  0x21   : > { %1047 = vmatprep.subr.bf16.mxu1 %v1139_v2 }
  0x24   : > { %1048 = vmatpush3.bf16.msra.mxu1 %v1101_v61 }
  0x25   : > { %1049 = vmatprep.subr.bf16.mxu1 %v1139_v2 }
  0x28   : > { %1050 = vmatpush3.bf16.msra.mxu1 %v1102_v62 }
  0xe5   : > { %v407_v13 = vpop.f32.mrb[0].mxu0  ;;  %v459_v14 = vpop.f32.mrb[0].mxu1 }
  0xe6   : > { %v1015_v15 = vpop.f32.mrb[1].mxu0  ;;  %v460_v16 = vadd.f32 %v459_v14, %v407_v13  ;;  %v1021_v17 = vpop.f32.mrb[1].mxu1 }
  0xe7   : > { %v410_v18 = vpop.f32.mrb[2].mxu0  ;;  %v462_v19 = vpop.f32.mrb[2].mxu1 }
  0xe8   : > { %v1016_v20 = vpop.f32.mrb[3].mxu0  ;;  %v463_v21 = vadd.f32 %v462_v19, %v410_v18  ;;  %v1022_v22 = vpop.f32.mrb[3].mxu1  ;;  %v1142_v18 = vmov 0.0|0.0  }
  0xe9   : > { %1062 = vmatprep.subr.bf16.mxu0 %v1142_v18 }
  0xed   : > { %v516_v23 = vpop.f32.mrb[4].mxu0  ;;  %v575_v25 = vpop.f32.mrb[4].mxu1 }
  0xee   : > { %v523_v24 = vadd.f32 %v516_v23, %v460_v16  ;;  %v1027_v26 = vpop.f32.mrb[5].mxu0  ;;  %v1033_v28 = vpop.f32.mrb[5].mxu1 }
  0xef   : > { %v519_v29 = vpop.f32.mrb[6].mxu0  ;;  %v578_v32 = vpop.f32.mrb[6].mxu1  ;;  %v778_v26 = vld [vmem:[%s1314_s6] sm:$0xff] }
  0xf0   : > { %v582_v30 = vadd.f32 %v575_v25, %v523_v24  ;;  %v524_v31 = vadd.f32 %v519_v29, %v463_v21  ;;  %v1028_v33 = vpop.f32.mrb[7].mxu0  ;;  %v1034_v35 = vpop.f32.mrb[7].mxu1 }
  0xf2   : > { %v1249_v36 = vadd.f32 %v582_v30, %v350_v27  ;;  %v583_v37 = vadd.f32 %v578_v32, %v524_v31 }
  0xf4   : > { %v1251_v38 = vadd.f32 %v583_v37, %v351_v34  ;;  %v586_v39 = vmul.f32 %v1249_v36, %v1249_v36 }
  0xf6   : > { %v589_v40 = vsel %vm588_vm3, %v586_v39, 0.0  ;;  %v587_v41 = vmul.f32 %v1251_v38, %v1251_v38 }
  0xf7   : > { %590 = vadd.xlane.f32.xlu0 %v589_v40 }
  0xf8   : > { %v592_v42 = vsel %vm588_vm3, %v587_v41, 0.0 }
  0xfb   : > { %593 = vadd.xlane.f32.xlu0 %v592_v42 }
 0x184   : > { %v591_v45 = vpop.xlane.xlu0 %590 }
 0x185   : > { %v596_v46 = vmul.f32 0.03125, %v591_v45 }
 0x187   : > { %v598_v47 = vadd.f32 1e-05, %v596_v46 }
 0x188   : > { %v594_v48 = vpop.xlane.xlu0 %593 }
 0x189   : > { %1103 = vrsqrt.f32 %v598_v47  ;;  %v597_v49 = vmul.f32 0.03125, %v594_v48 }
 0x18b   : > { %v599_v50 = vadd.f32 1e-05, %v597_v49 }
 0x18d   : > { %1105 = vrsqrt.f32 %v599_v50 }
 0x193   : > { %v1104_v51 = vpop.eup %1103 }
 0x194   : > { %v602_v52 = vmul.f32 %v1104_v51, %v1249_v36 }
 0x196   : > { %v611_v57 = vmul.f32 %v976_v54, %v602_v52 }
 0x197   : > { %v1106_v53 = vpop.eup %1105 }
 0x198   : > { %v603_v55 = vmul.f32 %v1106_v53, %v1251_v38 }
 0x19a   : > { %v612_v56 = vmul.f32 %v976_v54, %v603_v55 }
 0x19c   : > { %v613_v58 = vpack.c.bf16 %v612_v56, %v611_v57 }
 0x19e   : > { %1040 = vmatmul.mubr.msk.bf16.vlgmr.msra.gmra.mrb[8].mxu0 %vm588_vm3, %v613_v58 }
 0x19f   : > { %1059 = vmatprep.mubr.msk.f32.mxu0 %vm1140_vm1, %v1139_v2 }
 0x271   : > { %v667_v63 = vpop.f32.mrb[8].mxu0 }
 0x272   : > { %690 = vrot.lane.b32.xlu1 %v667_v63, %s1141_s16  ;;  %v1041_v0 = vpop.f32.mrb[9].mxu0  ;;  %v980_v4 = vmul.f32 -1.442695, %v667_v63 }
 0x273   : > { %v670_v1 = vpop.f32.mrb[10].mxu0 }
 0x274   : > { %v1042_v3 = vpop.f32.mrb[11].mxu0  ;;  %v981_v5 = vmul.f32 -1.442695, %v670_v1  ;;  %1107 = vpow2.f32 %v980_v4 }
 0x276   : > { %692 = vrot.lane.b32.xlu1 %v670_v1, %s1141_s16  ;;  %1109 = vpow2.f32 %v981_v5 }
 0x27e   : > { %v1108_v6 = vpop.eup %1107 }
 0x27f   : > { %v680_v8 = vadd.f32 1.0, %v1108_v6 }
 0x280   : > { %v1110_v7 = vpop.eup %1109 }
 0x281   : > { %v681_v2 = vadd.f32 1.0, %v1110_v7  ;;  %1111 = vrcp.f32 %v680_v8 }
 0x283   : > { %1113 = vrcp.f32 %v681_v2 }
 0x28b   : > { %v1112_v9 = vpop.eup %1111 }
 0x28c   : > { %v686_v12 = vmul.f32 %v1112_v9, %v667_v63 }
 0x28d   : > { %v1114_v10 = vpop.eup %1113 }
 0x28e   : > { %v687_v13 = vmul.f32 %v1114_v10, %v670_v1 }
 0x2e4   : > { %v691_v11 = vpop.permute.xlu1 %690 }
 0x2e5   : > { %v696_v15 = vmul.f32 %v691_v11, %v686_v12 }
 0x2e8   : > { %v693_v14 = vpop.permute.xlu1 %692 }
 0x2e9   : > { %v697_v16 = vmul.f32 %v693_v14, %v687_v13 }
 0x2eb   : > { %v698_v17 = vpack.c.bf16 %v697_v16, %v696_v15 }
 0x2ed   : > { %1052 = vmatmul.mubr.msk.bf16.vlgmr.msra.gmra.mrb[8].mxu1 %vm731_vm4, %v698_v17 }
 0x3c0   : > { %v769_v19 = vpop.f32.mrb[8].mxu1 }
 0x3c1   : > { %v1053_v20 = vpop.f32.mrb[9].mxu1  ;;  %v776_v22 = vadd.f32 %v769_v19, %v1249_v36 }
 0x3c2   : > { %v772_v21 = vpop.f32.mrb[10].mxu1 }
 0x3c3   : > { %v777_v23 = vadd.f32 %v772_v21, %v1251_v38  ;;  %v1054_v24 = vpop.f32.mrb[11].mxu1 }
 0x3c5   : > { %v1063_v25 = vpack.c.bf16 %v777_v23, %v776_v22 }
 0x3c7   : > { %1064 = vmatpush3.bf16.msra.mxu0 %v1063_v25 }
 0x3ca   : > { %1060 = vmatmul.mubr.msk.f32.vlgmr.msra.gmra.mrb[12].mxu0 %vm779_vm5, %v778_v26 }
 0x49d   : > { %v849_v27 = vpop.f32.mrb[12].mxu0 }
 0x49e   : > { %853 = vst.msk [vmem:[%s348_s22] sm:$0xff] %vm588_vm3, %v849_v27  ;;  %v1061_v28 = vpop.f32.mrb[13].mxu0 }
 0x49f PF: > { %s17_s26 = sadd.s32 1, %s1137_s26   ;;  %s1316_s24 = smov %s1133_s25 }
 0x4a0   : > { %p14_p5 = scmp.ge.s32.totalorder %s17_s26, 4   ;;  %s1317_s25 = smov %s1319_s27 }
 0x4a2   :  { %16 = sbr.rel (!%p14_p5) target bundleno = 2 (0x2), region = 87 }

// kernel: _lambda_.11
= control target key start
LH: loop header
LB: loop body
LE: loop exit
PB: predicated region body
PF: predicated region fallthrough
CT: control target
= control target key end

     0   :  { %s774_s12 = smov 0   ;;  %s776_s13 = smov 0   ;;  %s848_s0 = inlined_call_operand.vmem [shape: bf16[2,4,8,8], index: 0, kind: input, shape index: {}]   ;;  %s849_s1 = inlined_call_operand.vmem [shape: bf16[2,4,8,8], index: 1, kind: input, shape index: {}]   ;;  %s850_s2 = inlined_call_operand.vmem [shape: bf16[2,4,8,8], index: 2, kind: input, shape index: {}]   ;;  %s851_s3 = inlined_call_operand.vmem [shape: bf16[2,4,8,8], index: 3, kind: output, shape index: {}]  }
   0x1   :  { %s778_s14 = smov 0   ;;  %s780_s15 = smov 0  }
   0x2   :  { %s782_s16 = smov 0  }
   0x3 LB: > { %s35_s17 = sadd.s32 1, %s740_s14  ;;  %s39_s18 = sadd.s32 1, %s744_s15  ;;  %s748_s16 = sphi %s782_s16, %s13_s16   ;;  %s744_s15 = sphi %s780_s15, %s855_s15   ;;  %s740_s14 = sphi %s778_s14, %s854_s14   ;;  %s736_s13 = sphi %s776_s13, %s853_s13   ;;  %s732_s12 = sphi %s774_s12, %s852_s12  }
   0x4   : > { %p37_p0 = scmp.ge.s32.totalorder %s35_s17, 4  ;;  %p629_p1 = scmp.ge.s32.totalorder %s748_s16, 1 }
   0x5   : > { %p217_p2 = scmp.lt.s32.totalorder %s748_s16, 9 }
   0x6   : > { %s857_s17 = smov (%p37_p0, %s35_s17), 0  ;;  %s859_s18 = smov (!%p37_p0, %s39_s18), %s744_s15 }
   0x7   : > { %p218_p3 = pnand %p629_p1, %p217_p2  ;;  %p41_p4 = scmp.ge.s32.totalorder %s859_s18, 2 }
   0x8   : > { %p275_p5 = scmp.lt.s32.totalorder (!%p218_p3), %s736_s13, 1  ;;  %p277_p6 = scmp.lt.s32.totalorder (!%p218_p3), %s732_s12, 3  ;;  %vm328_vm0 = vcmask (!%p218_p3), 64512   ;;  %v750_v0 = vmov (!%p218_p3), 0.0   ;;  %vm751_vm1 = vmmov (!%p218_p3), 0   ;;  %vm325_vm2 = vcmask (!%p218_p3), 7168  }
   0x9   : > { %s861_s18 = smov (%p41_p4, %s859_s18), 0  ;;  %221 = sbr.rel (%p218_p3) target bundleno = 827 (0x33b), region = 32 }
   0xa   : > { %646 = vmatprep.subr.bf16.mxu0 (!%p218_p3), %v750_v0  ;;  %329 = vst.msk [vmem:[#allocation4] sm:$0xff] (!%p218_p3), %vm328_vm0, %v750_v0  ;;  %648 = vmatprep.mubr.msk.bf16.mxu0 (!%p218_p3), %vm751_vm1, %v750_v0  ;;  %v752_v5 = vmov (!%p218_p3), -inf   ;;  %v753_v11 = vmov (!%p218_p3), 0   ;;  %vm416_vm3 = vcmask (!%p218_p3), 1043456   ;;  %vm476_vm4 = vcmask (!%p218_p3), 60416  }
   0xb   : > { %652 = vmatprep.subr.bf16.mxu1 (!%p218_p3), %v750_v0  ;;  %654 = vmatprep.mubr.msk.bf16.mxu1 (!%p218_p3), %vm751_vm1, %v750_v0  ;;  %326 = vst.msk [vmem:[#allocation2] sm:$0xff] (!%p218_p3), %vm325_vm2, %v752_v5  ;;  %327 = vst.msk [vmem:[#allocation3] sm:$0xff] (!%p218_p3), %vm325_vm2, %v750_v0 }
   0xc   : > { %702 = vset.pattern.permute.xlu0 (!%p218_p3), %v753_v11  ;;  %703 = vset.pattern.permute.xlu1 (!%p218_p3), %v753_v11 }
  0x10   : > { %s863_s13 = smov (!%p275_p5, %s736_s13), 1  ;;  %s865_s12 = smov (!%p277_p6, %s732_s12), 3 }
  0x11   : > { %s630_s19 = sshll.u32 %s863_s13, 2  ;;  %v405_v32 = vld [vmem:[#allocation4] sm:$0xff] }
  0x12   : > { %s283_s20 = sadd.s32 %s630_s19, %s865_s12  ;;  %v381_v12 = vld [vmem:[#allocation2] sm:$0xff]  ;;  %v397_v26 = vld [vmem:[#allocation3] sm:$0xff] }
  0x13   : > { %s805_s21 = sshll.u32 %s283_s20, 2 }
  0x14   : > { %s296_s24 = scalar_lea.vmem %s849_s1, %s805_s21  ;;  %s285_s27 = scalar_lea.vmem %s848_s0, %s805_s21 }
  0x15   : > { %v332_v1 = vld [vmem:[%s296_s24] sm:$0xf]  ;;  %s307_s30 = scalar_lea.vmem %s850_s2, %s805_s21  ;;  %s318_s6 = scalar_lea.vmem %s851_s3, %s805_s21 }
  0x16   : > { %v339_v2 = vsel %vm328_vm0, %v332_v1, 0  ;;  %v330_v3 = vld [vmem:[%s285_s27] sm:$0xf] }
  0x17   : > { %647 = vmatpush3.bf16.xpose.msra.mxu0 %v339_v2  ;;  %v331_v4 = vmul.bf16 1052065461, %v330_v3  ;;  %v333_v16 = vld [vmem:[%s307_s30] sm:$0xf] }
  0x18   : > { %v418_v17 = vsel %vm416_vm3, %v333_v16, 0 }
  0x19   : > { %653 = vmatpush3.bf16.msra.mxu1 %v418_v17 }
  0x1e   : > { %649 = vmatmul.mubr.msk.bf16.vlgmr.msra.gmra.mrb[0].mxu0 %vm328_vm0, %v331_v4 }
  0xf1   : > { %v375_v6 = vpop.f32.mrb[0].mxu0 }
  0xf2   : > { %v650_v7 = vpop.f32.mrb[1].mxu0  ;;  %v382_v8 = vsel %vm328_vm0, %v375_v6, -inf }
  0xf3   : > { %383 = vmax.xlane.f32.xlu0 %v382_v8  ;;  %v378_v9 = vpop.f32.mrb[2].mxu0 }
  0xf4   : > { %v651_v10 = vpop.f32.mrb[3].mxu0 }
 0x180   : > { %v384_v13 = vpop.xlane.xlu0 %383 }
 0x181   : > { %v385_v14 = vmax.f32 %v381_v12, %v384_v13 }
 0x183   : > { %v386_v15 = vsub.f32 %v381_v12, %v385_v14  ;;  %462 = vst.msk [vmem:[#allocation2] sm:$0xff] %vm325_vm2, %v385_v14  ;;  %391 = vperm.xlu0 %702, %v385_v14  }
 0x185   : > { %v387_v24 = vmul.f32 1.442695, %v386_v15 }
 0x202   : > { %v392_v18 = vpop.permute.xlu0 %391 }
 0x203   : > { %v394_v19 = vsub.f32 %v375_v6, %v392_v18 }
 0x205   : > { %v395_v20 = vmul.f32 1.442695, %v394_v19 }
 0x207   : > { %704 = vpow2.f32 %v395_v20 }
 0x208   : > { %706 = vpow2.f32 %v387_v24 }
 0x211   : > { %v705_v21 = vpop.eup %704 }
 0x212   : > { %v399_v22 = vsel %vm328_vm0, %v705_v21, 0.0  ;;  %v412_v23 = vpack.c.bf16 %v705_v21, %v705_v21  ;;  %v707_v25 = vpop.eup %706 }
 0x213   : > { %400 = vadd.xlane.f32.xlu1 %v399_v22  ;;  %v398_v27 = vmul.f32 %v707_v25, %v397_v26 }
 0x214   : > { %655 = vmatmul.mubr.msk.bf16.vlgmr.msra.gmra.mrb[0].mxu1 %vm328_vm0, %v412_v23 }
 0x224   : > { %408 = vperm.xlu1 %703, %v707_v25  }
 0x2a0   : > { %v401_v28 = vpop.xlane.xlu1 %400 }
 0x2a1   : > { %v402_v29 = vadd.f32 %v401_v28, %v398_v27 }
 0x2a3   : > { %404 = vst.msk [vmem:[#allocation3] sm:$0xff] %vm325_vm2, %v402_v29 }
 0x2a4   : > { %v409_v33 = vpop.permute.xlu1 %408 }
 0x2a5   : > { %v411_v34 = vmul.f32 %v409_v33, %v405_v32 }
 0x2aa   : > { %v467_v30 = vld [vmem:[#allocation3] sm:$0xff] }
 0x2ab   : > { %708 = vrcp.f32 %v467_v30 }
 0x2b5   : > { %v709_v31 = vpop.eup %708 }
 0x2b6   : > { %471 = vperm.xlu1 %703, %v709_v31  }
 0x2e7   : > { %v454_v35 = vpop.f32.mrb[0].mxu1 }
 0x2e8   : > { %v460_v36 = vadd.f32 %v454_v35, %v411_v34  ;;  %v656_v37 = vpop.f32.mrb[1].mxu1 }
 0x2e9   : > { %v457_v38 = vpop.f32.mrb[2].mxu1 }
 0x2ea   : > { %461 = vst.msk [vmem:[#allocation4] sm:$0xff] %vm328_vm0, %v460_v36  ;;  %v657_v39 = vpop.f32.mrb[3].mxu1 }
 0x2f1   : > { %v466_v40 = vld [vmem:[#allocation4] sm:$0xff] }
 0x335   : > { %v472_v41 = vpop.permute.xlu1 %471 }
 0x336   : > { %v474_v42 = vmul.f32 %v472_v41, %v466_v40 }
 0x338   : > { %v475_v43 = vpack.c.bf16 %v474_v42, %v474_v42 }
 0x33a   : > { %477 = vst.msk [vmem:[%s318_s6] sm:$0xf] %vm476_vm4, %v475_v43 }
 0x33b PF: > { %s13_s16 = sadd.s32 1, %s748_s16   ;;  %s852_s12 = smov %s740_s14 }
 0x33c   : > { %p10_p7 = scmp.ge.s32.totalorder %s13_s16, 10   ;;  %s853_s13 = smov %s744_s15 }
 0x33d   : > { %s854_s14 = smov %s857_s17  ;;  %s855_s15 = smov %s861_s18 }
 0x33e   :  { %12 = sbr.rel (!%p10_p7) target bundleno = 3 (0x3), region = 76 }

// kernel: _lambda_.12
= control target key start
LH: loop header
LB: loop body
LE: loop exit
PB: predicated region body
PF: predicated region fallthrough
CT: control target
= control target key end

     0   :  { %s1083_s24 = smov 0   ;;  %s1085_s25 = smov 0   ;;  %s1196_s0 = inlined_call_operand.vmem [shape: f32[2,8,32], index: 0, kind: input, shape index: {}]   ;;  %s1197_s1 = inlined_call_operand.vmem [shape: bf16[2,4,8,8], index: 1, kind: input, shape index: {}]   ;;  %s1198_s2 = inlined_call_operand.vmem [shape: bf16[4,8,32], index: 2, kind: input, shape index: {}]   ;;  %s1199_s3 = inlined_call_operand.vmem [shape: f32[1,32], index: 3, kind: input, shape index: {}]   ;;  %s1200_s4 = inlined_call_operand.vmem [shape: bf16[32,128], index: 4, kind: input, shape index: {}]   ;;  %s1201_s5 = inlined_call_operand.vmem [shape: bf16[64,32], index: 5, kind: input, shape index: {}]   ;;  %s1202_s6 = inlined_call_operand.vmem [shape: f32[4,8], index: 6, kind: input, shape index: {}]   ;;  %s1203_s7 = inlined_call_operand.vmem [shape: f32[2,4,32], index: 7, kind: output, shape index: {}]  }
   0x1   :  { %s1087_s26 = smov 0  }
   0x2 LB: > { %s29_s27 = sadd.s32 1, %s1034_s25  ;;  %p881_p0 = scmp.ge.s32.totalorder %s1038_s26, 1  ;;  %s1038_s26 = sphi %s1087_s26, %s17_s26   ;;  %s1034_s25 = sphi %s1085_s25, %s1205_s25   ;;  %s1030_s24 = sphi %s1083_s24, %s1204_s24  }
   0x3   : > { %p31_p1 = scmp.ge.s32.totalorder %s29_s27, 2  ;;  %p270_p2 = scmp.lt.s32.totalorder %s1038_s26, 3 }
   0x5   : > { %s1207_s27 = smov (%p31_p1, %s29_s27), 0  ;;  %p271_p3 = pnand %p881_p0, %p270_p2 }
   0x6   : > { %v887_v0 = vld [vmem:[%s1198_s2 + $0x4] sm:$0xf] (!%p271_p3)  ;;  %vm348_vm0 = vcmask (!%p271_p3), 1043456   ;;  %v339_v1 = vld [vmem:[%s1198_s2] sm:$0xf] (!%p271_p3)  ;;  %v1040_v2 = vmov (!%p271_p3), 0.0  }
   0x7   : > { %274 = sbr.rel (%p271_p3) target bundleno = 1169 (0x491), region = 48  ;;  %928 = vmatprep.subr.bf16.mxu0 (!%p271_p3), %v1040_v2  ;;  %934 = vmatprep.subr.bf16.mxu1 (!%p271_p3), %v1040_v2  ;;  %v350_v3 = vsel (!%p271_p3), %vm348_vm0, %v887_v0, 0  ;;  %v396_v4 = vsel (!%p271_p3), %vm348_vm0, %v339_v1, 0  ;;  %p314_p4 = scmp.lt.s32.totalorder (!%p271_p3), %s1030_s24, 1  ;;  %v891_v5 = vld [vmem:[%s1198_s2 + $0x8] sm:$0xf] (!%p271_p3) }
   0x8   : > { %929 = vmatpush3.bf16.msra.mxu0 (!%p271_p3), %v350_v3  ;;  %935 = vmatpush3.bf16.msra.mxu1 (!%p271_p3), %v396_v4  ;;  %v894_v6 = vld [vmem:[%s1198_s2 + $0xc] sm:$0xf] (!%p271_p3)  ;;  %vm1041_vm1 = vmmov (!%p271_p3), 0   ;;  %vm344_vm2 = vcmask (!%p271_p3), 64512   ;;  %v446_v7 = vsel (!%p271_p3), %vm348_vm0, %v891_v5, 0  ;;  %vm542_vm3 = vcmask (!%p271_p3), 261120  }
   0x9   : > { %930 = vmatprep.mubr.msk.bf16.mxu0 (!%p271_p3), %vm1041_vm1, %v1040_v2  ;;  %936 = vmatprep.mubr.msk.bf16.mxu1 (!%p271_p3), %vm1041_vm1, %v1040_v2  ;;  %v497_v8 = vsel (!%p271_p3), %vm348_vm0, %v894_v6, 0  ;;  %v1004_v36 = vld [vmem:[%s1200_s4] sm:$0xff] (!%p271_p3)   ;;  %v1005_v37 = vld [vmem:[%s1200_s4 + $0x8] sm:$0xff] (!%p271_p3)   ;;  %v1008_v48 = vld [vmem:[%s1201_s5 + $0x10] sm:$0xff] (!%p271_p3)   ;;  %vm664_vm4 = vcmask (!%p271_p3), 523264   ;;  %vm783_vm5 = vcmask (!%p271_p3), 257024  }
   0xa   : > { %940 = vmatprep.subr.bf16.mxu0 (!%p271_p3), %v1040_v2  ;;  %946 = vmatprep.subr.bf16.mxu1 (!%p271_p3), %v1040_v2  ;;  %v896_v42 = vld [vmem:[%s1199_s3] ss:$0 sm:$0xff] (!%p271_p3)  ;;  %v1007_v47 = vld [vmem:[%s1201_s5 + $0x8] sm:$0xff] (!%p271_p3)   ;;  %v1009_v49 = vld [vmem:[%s1201_s5 + $0x18] sm:$0xff] (!%p271_p3)  }
   0xb   : > { %v1006_v46 = vld [vmem:[%s1201_s5] sm:$0xff] (!%p271_p3)  }
   0xc   : > { %v709_v1 = vld [vmem:[%s1202_s6] sm:$0xf] (!%p271_p3) }
   0xe   : > { %s1209_s24 = smov (!%p314_p4, %s1030_s24), 1 }
   0xf   : > { %s909_s13 = sshll.u32 %s1209_s24, 4  ;;  %s882_s17 = sshll.u32 %s1209_s24, 3 }
  0x10   : > { %s328_s16 = scalar_lea.vmem %s1197_s1, %s909_s13  ;;  %s320_s20 = scalar_lea.vmem %s1196_s0, %s882_s17 }
  0x11   : > { %v886_v9 = vld [vmem:[%s328_s16 + $0x4] sm:$0xf]  ;;  %v338_v10 = vld [vmem:[%s328_s16] sm:$0xf]  ;;  %v890_v11 = vld [vmem:[%s328_s16 + $0x8] sm:$0xf] }
  0x12   : > { %931 = vmatmul.mubr.msk.bf16.vlgmr.msra.gmra.mrb[0].mxu0 %vm344_vm2, %v886_v9  ;;  %937 = vmatmul.mubr.msk.bf16.vlgmr.msra.gmra.mrb[0].mxu1 %vm344_vm2, %v338_v10  ;;  %v893_v12 = vld [vmem:[%s328_s16 + $0xc] sm:$0xf]  ;;  %v337_v27 = vld [vmem:[%s320_s20] sm:$0xff]  ;;  %s1042_s16 = smov 64   ;;  %s885_s19 = sshll.u32 %s1209_s24, 2 }
  0x13   : > { %941 = vmatpush3.bf16.msra.mxu0 %v446_v7  ;;  %947 = vmatpush3.bf16.msra.mxu1 %v497_v8  ;;  %s335_s22 = scalar_lea.vmem %s1203_s7, %s885_s19 }
  0x14   : > { %942 = vmatprep.mubr.msk.bf16.mxu0 %vm1041_vm1, %v1040_v2  ;;  %948 = vmatprep.mubr.msk.bf16.mxu1 %vm1041_vm1, %v1040_v2 }
  0x15   : > { %952 = vmatprep.subr.bf16.mxu0 %v1040_v2  ;;  %960 = vmatprep.subr.bf16.mxu1 %v1040_v2 }
  0x1a   : > { %943 = vmatmul.mubr.msk.bf16.vlgmr.msra.gmra.mrb[4].mxu0 %vm344_vm2, %v890_v11  ;;  %949 = vmatmul.mubr.msk.bf16.vlgmr.msra.gmra.mrb[4].mxu1 %vm344_vm2, %v893_v12 }
  0x1b   : > { %956 = vmatprep.mubr.msk.bf16.mxu0 %vm1041_vm1, %v1040_v2  ;;  %968 = vmatprep.mubr.msk.bf16.mxu1 %vm1041_vm1, %v1040_v2 }
  0x1c   : > { %953 = vmatpush3.bf16.msra.mxu0 %v1004_v36  ;;  %961 = vmatpush3.bf16.msra.mxu1 %v1006_v46 }
  0x1d   : > { %954 = vmatprep.subr.bf16.mxu0 %v1040_v2  ;;  %962 = vmatprep.subr.bf16.mxu1 %v1040_v2 }
  0x20   : > { %955 = vmatpush3.bf16.msra.mxu0 %v1005_v37  ;;  %963 = vmatpush3.bf16.msra.mxu1 %v1007_v47 }
  0x21   : > { %972 = vmatprep.subr.mxu0 %v1040_v2  ;;  %964 = vmatprep.subr.bf16.mxu1 %v1040_v2 }
  0x24   : > { %965 = vmatpush3.bf16.msra.mxu1 %v1008_v48 }
  0x25   : > { %966 = vmatprep.subr.bf16.mxu1 %v1040_v2 }
  0x28   : > { %967 = vmatpush3.bf16.msra.mxu1 %v1009_v49 }
  0xe5   : > { %v386_v13 = vpop.f32.mrb[0].mxu0  ;;  %v432_v14 = vpop.f32.mrb[0].mxu1 }
  0xe6   : > { %v433_v15 = vadd.f32 %v432_v14, %v386_v13  ;;  %v932_v16 = vpop.f32.mrb[1].mxu0  ;;  %v938_v17 = vpop.f32.mrb[1].mxu1 }
  0xe7   : > { %v389_v18 = vpop.f32.mrb[2].mxu0  ;;  %v435_v19 = vpop.f32.mrb[2].mxu1 }
  0xe8   : > { %v933_v20 = vpop.f32.mrb[3].mxu0  ;;  %v939_v21 = vpop.f32.mrb[3].mxu1 }
  0xed   : > { %v482_v22 = vpop.f32.mrb[4].mxu0  ;;  %v533_v23 = vpop.f32.mrb[4].mxu1 }
  0xee   : > { %v488_v24 = vadd.f32 %v482_v22, %v433_v15  ;;  %v944_v25 = vpop.f32.mrb[5].mxu0  ;;  %v950_v26 = vpop.f32.mrb[5].mxu1 }
  0xef   : > { %v485_v28 = vpop.f32.mrb[6].mxu0  ;;  %v536_v29 = vpop.f32.mrb[6].mxu1 }
  0xf0   : > { %v539_v30 = vadd.f32 %v533_v23, %v488_v24  ;;  %v945_v31 = vpop.f32.mrb[7].mxu0  ;;  %v951_v32 = vpop.f32.mrb[7].mxu1 }
  0xf2   : > { %v540_v33 = vadd.f32 %v539_v30, %v337_v27 }
  0xf4   : > { %v541_v34 = vmul.f32 %v540_v33, %v540_v33 }
  0xf6   : > { %v543_v35 = vsel %vm542_vm3, %v541_v34, 0.0 }
  0xf7   : > { %544 = vadd.xlane.f32.xlu0 %v543_v35 }
 0x184   : > { %v545_v38 = vpop.xlane.xlu0 %544 }
 0x185   : > { %v547_v39 = vmul.f32 0.03125, %v545_v38 }
 0x187   : > { %v548_v40 = vadd.f32 1e-05, %v547_v39 }
 0x189   : > { %1010 = vrsqrt.f32 %v548_v40 }
 0x193   : > { %v1011_v41 = vpop.eup %1010 }
 0x194   : > { %v550_v43 = vmul.f32 %v1011_v41, %v540_v33 }
 0x196   : > { %v558_v44 = vmul.f32 %v896_v42, %v550_v43 }
 0x198   : > { %v559_v45 = vpack.c.bf16 %v558_v44, %v558_v44 }
 0x19a   : > { %957 = vmatmul.mubr.msk.bf16.vlgmr.msra.gmra.mrb[8].mxu0 %vm542_vm3, %v559_v45 }
 0x19b   : > { %974 = vmatprep.mubr.msk.f32.mxu0 %vm1041_vm1, %v1040_v2 }
 0x26d   : > { %v613_v50 = vpop.f32.mrb[8].mxu0 }
 0x26e   : > { %627 = vrot.lane.b32.xlu0 %v613_v50, %s1042_s16  ;;  %v958_v51 = vpop.f32.mrb[9].mxu0  ;;  %v900_v54 = vmul.f32 -1.442695, %v613_v50 }
 0x26f   : > { %v616_v52 = vpop.f32.mrb[10].mxu0 }
 0x270   : > { %v959_v53 = vpop.f32.mrb[11].mxu0  ;;  %1012 = vpow2.f32 %v900_v54 }
 0x27a   : > { %v1013_v55 = vpop.eup %1012 }
 0x27b   : > { %v622_v56 = vadd.f32 1.0, %v1013_v55 }
 0x27d   : > { %1014 = vrcp.f32 %v622_v56 }
 0x287   : > { %v1015_v57 = vpop.eup %1014 }
 0x288   : > { %v625_v58 = vmul.f32 %v1015_v57, %v613_v50 }
 0x2e0   : > { %v628_v59 = vpop.permute.xlu0 %627 }
 0x2e1   : > { %v630_v60 = vmul.f32 %v628_v59, %v625_v58 }
 0x2e3   : > { %v631_v61 = vpack.c.bf16 %v630_v60, %v630_v60 }
 0x2e5   : > { %969 = vmatmul.mubr.msk.bf16.vlgmr.msra.gmra.mrb[8].mxu1 %vm664_vm4, %v631_v61 }
 0x3b8   : > { %v702_v62 = vpop.f32.mrb[8].mxu1 }
 0x3b9   : > { %v708_v63 = vadd.f32 %v702_v62, %v540_v33  ;;  %v970_v0 = vpop.f32.mrb[9].mxu1 }
 0x3ba   : > { %v705_v2 = vpop.f32.mrb[10].mxu1 }
 0x3bb   : > { %v971_v3 = vpop.f32.mrb[11].mxu1  ;;  %973 = vmatpush3.msra.mxu0 %v708_v63 }
 0x3bc   : > { %975 = vmatmul.mubr.msk.f32.vlgmr.msra.gmra.mrb[12].mxu0 %vm344_vm2, %v709_v1 }
 0x48f   : > { %v779_v4 = vpop.f32.mrb[12].mxu0 }
 0x490   : > { %784 = vst.msk [vmem:[%s335_s22] sm:$0xf] %vm783_vm5, %v779_v4  ;;  %v976_v5 = vpop.f32.mrb[13].mxu0 }
 0x491 PF: > { %s17_s26 = sadd.s32 1, %s1038_s26   ;;  %s1204_s24 = smov %s1034_s25 }
 0x492   : > { %p14_p5 = scmp.ge.s32.totalorder %s17_s26, 4   ;;  %s1205_s25 = smov %s1207_s27 }
 0x494   :  { %16 = sbr.rel (!%p14_p5) target bundleno = 2 (0x2), region = 87 }

// kernel: _lambda_.13
= control target key start
LH: loop header
LB: loop body
LE: loop exit
PB: predicated region body
PF: predicated region fallthrough
CT: control target
= control target key end

     0   :  { %s1174_s27 = smov 0   ;;  %s1272_s0 = inlined_call_operand.vmem [shape: f32[2,4,32], index: 0, kind: input, shape index: {}]   ;;  %s1273_s1 = inlined_call_operand.vmem [shape: f32[1,32], index: 1, kind: input, shape index: {}]   ;;  %s1274_s2 = inlined_call_operand.vmem [shape: bf16[32,10], index: 2, kind: input, shape index: {}]   ;;  %s1275_s3 = inlined_call_operand.vmem [shape: f32[1,2], index: 3, kind: input, shape index: {}]   ;;  %s1276_s4 = inlined_call_operand.vmem [shape: f32[5,4,4], index: 4, kind: input, shape index: {}]   ;;  %s1277_s5 = inlined_call_operand.vmem [shape: f32[10,2], index: 5, kind: input, shape index: {}]   ;;  %s1278_s6 = inlined_call_operand.vmem [shape: f32[4,1], index: 6, kind: input, shape index: {}]   ;;  %s1279_s7 = inlined_call_operand.vmem [shape: f32[4,1], index: 7, kind: input, shape index: {}]   ;;  %s1280_s8 = inlined_call_operand.vmem [shape: f32[2,1,1], index: 8, kind: output, shape index: {}]  }
   0x1 LB: > { %s985_s28 = sadd.s32 4294967295, %s1122_s27   ;;  %p989_p0 = scmp.ge.s32.totalorder %s1122_s27, 1  ;;  %s1122_s27 = sphi %s1174_s27, %s18_s27  }
   0x2   : > { %p261_p1 = scmp.lt.s32.totalorder %s1122_s27, 3 }
   0x4   : > { %p262_p2 = pnand %p989_p0, %p261_p1 }
   0x5   : > { %p292_p3 = scmp.lt.s32.totalorder (!%p262_p2), %s985_s28, 1  ;;  %vm302_vm0 = vcmask (!%p262_p2), 257024   ;;  %v1102_v3 = vld [vmem:[%s1274_s2] sm:$0xff] (!%p262_p2)   ;;  %v1124_v4 = vmov (!%p262_p2), 0.0   ;;  %vm1125_vm1 = vmmov (!%p262_p2), 0   ;;  %v1103_v5 = vld [vmem:[%s1274_s2 + $0x8] sm:$0xff] (!%p262_p2)   ;;  %v380_v18 = vlaneseq (!%p262_p2) }
   0x6   : > { %265 = sbr.rel (%p262_p2) target bundleno = 1077 (0x435), region = 52  ;;  %1037 = vmatprep.subr.bf16.mxu0 (!%p262_p2), %v1124_v4  ;;  %1041 = vmatprep.mubr.msk.bf16.mxu0 (!%p262_p2), %vm1125_vm1, %v1124_v4  ;;  %v991_v10 = vld [vmem:[%s1273_s1] ss:$0 sm:$0xff] (!%p262_p2)  ;;  %vm336_vm2 = vcmask (!%p262_p2), 261120   ;;  %v807_v15 = vld [vmem:[%s1277_s5 + $0x8] sm:$0x3] (!%p262_p2) }
   0x7   : > { %1038 = vmatpush3.bf16.msra.mxu0 (!%p262_p2), %v1102_v3  ;;  %1045 = vmatprep.subr.mxu1 (!%p262_p2), %v1124_v4  ;;  %v806_v14 = vld [vmem:[%s1277_s5] sm:$0xff] (!%p262_p2)  ;;  %vm819_vm3 = vcmask (!%p262_p2), 1041408   ;;  %v1126_v16 = vmov (!%p262_p2), 0.0|0.0   ;;  %vm1127_vm4 = vmmov (!%p262_p2), 1   ;;  %v381_v19 = vand.u32 (!%p262_p2), 127, %v380_v18  ;;  %s1128_s13 = smov (!%p262_p2), 127  }
   0x8   : > { %1039 = vmatprep.subr.bf16.mxu0 (!%p262_p2), %v1124_v4  ;;  %1047 = vmatprep.mubr.msk.f32.mxu1 (!%p262_p2), %vm1125_vm1, %v1124_v4  ;;  %v1078_v17 = vpack.c.bf16 (!%p262_p2), %v807_v15, %v806_v14  ;;  %vm1079_vm5 = vmpackc.low (!%p262_p2), %vm819_vm3, %vm1127_vm4  ;;  %vm401_vm12 = vcmask (!%p262_p2), 1043456   ;;  %v997_v26 = vld [vmem:[%s1276_s4 + $0x4] sm:$0xf] (!%p262_p2)  ;;  %vm397_vm13 = vcmask (!%p262_p2), 31744   ;;  %v387_v30 = vld [vmem:[%s1276_s4] sm:$0xf] (!%p262_p2) }
   0x9   : > { %vm389_vm6 = vcmp.eq.s32.totalorder (!%p262_p2), %v381_v19, 1  ;;  %vm390_vm7 = vcmp.eq.s32.totalorder (!%p262_p2), %v381_v19, 6  ;;  %vm382_vm8 = vcmp.eq.s32.totalorder (!%p262_p2), %v381_v19, 0  ;;  %vm383_vm9 = vcmp.eq.s32.totalorder (!%p262_p2), %v381_v19, 5  ;;  %v1003_v33 = vld [vmem:[%s1276_s4 + $0x8] sm:$0xf] (!%p262_p2) }
   0xa   : > { %vm391_vm10 = vmor (!%p262_p2), %vm389_vm6, %vm390_vm7  ;;  %vm551_vm14 = vcmp.eq.s32.totalorder (!%p262_p2), %v381_v19, 2  ;;  %vm552_vm15 = vcmp.eq.s32.totalorder (!%p262_p2), %v381_v19, 7  ;;  %vm637_vm3 = vcmp.eq.s32.totalorder (!%p262_p2), %v381_v19, 8  ;;  %vm722_vm6 = vcmp.eq.s32.totalorder (!%p262_p2), %v381_v19, 9  ;;  %v1007_v36 = vld [vmem:[%s1276_s4 + $0xc] sm:$0xf] (!%p262_p2) }
   0xb   : > { %1040 = vmatpush3.bf16.msra.mxu0 (!%p262_p2), %v1103_v5  ;;  %vm384_vm11 = vmor (!%p262_p2), %vm382_vm8, %vm383_vm9  ;;  %v996_v20 = vsel (!%p262_p2), %vm391_vm10, 1.0, %v1124_v4  ;;  %v1011_v38 = vld [vmem:[%s1276_s4 + $0x10] sm:$0xf] (!%p262_p2)  ;;  %vm815_vm8 = vcmask (!%p262_p2), 80896   ;;  %v1014_v41 = vld [vmem:[%s1275_s3] ss:$0 sm:$0xff] (!%p262_p2) }
   0xc   : > { %1077 = vmatprep.subr.bf16.mxu0 (!%p262_p2), %v1126_v16  ;;  %v995_v22 = vsel (!%p262_p2), %vm384_vm11, 1.0, %v1124_v4  ;;  %v925_v3 = vld [vmem:[%s1278_s6] sm:$0xf] (!%p262_p2)  ;;  %vm936_vm9 = vcmask (!%p262_p2), 0  }
   0xd   : > { %s1282_s28 = smov (!%p292_p3, %s985_s28), 1  ;;  %v927_v5 = vld [vmem:[%s1279_s7] sm:$0xf] }
   0xe   : > { %s990_s29 = sshll.u32 %s1282_s28, 2  ;;  %s298_s20 = scalar_lea.vmem %s1280_s8, %s1282_s28 }
   0xf   : > { %s295_s10 = scalar_lea.vmem %s1272_s0, %s990_s29 }
  0x10   : > { %v300_v0 = vld [vmem:[%s295_s10] sm:$0xf] }
  0x11   : > { %v301_v1 = vmul.f32 %v300_v0, %v300_v0 }
  0x13   : > { %v303_v2 = vsel %vm302_vm0, %v301_v1, 0.0  ;;  %vm553_vm0 = vmor %vm551_vm14, %vm552_vm15 }
  0x14   : > { %304 = vadd.xlane.f32.xlu0 %v303_v2  ;;  %v1002_v29 = vsel %vm553_vm0, 1.0, %v1124_v4 }
  0xa1   : > { %v305_v6 = vpop.xlane.xlu0 %304 }
  0xa2   : > { %v307_v7 = vmul.f32 0.03125, %v305_v6 }
  0xa4   : > { %v308_v8 = vadd.f32 1e-05, %v307_v7 }
  0xa6   : > { %1104 = vrsqrt.f32 %v308_v8 }
  0xb0   : > { %v1105_v9 = vpop.eup %1104 }
  0xb1   : > { %v310_v11 = vmul.f32 %v1105_v9, %v300_v0 }
  0xb3   : > { %v318_v12 = vmul.f32 %v991_v10, %v310_v11 }
  0xb5   : > { %v319_v13 = vpack.c.bf16 %v318_v12, %v318_v12 }
  0xb7   : > { %1042 = vmatmul.mubr.msk.bf16.vlgmr.msra.gmra.mrb[0].mxu0 %vm336_vm2, %v319_v13  ;;  %vm636_vm2 = vcmp.eq.s32.totalorder %v381_v19, 3 }
  0xb8   : > { %1074 = vmatprep.mubr.msk.f32.mxu0 %vm1125_vm1, %v1124_v4  ;;  %1080 = vmatpush3.bf16.msk.msra.mxu0 %vm1079_vm5, %v1078_v17  ;;  %vm638_vm4 = vmor %vm636_vm2, %vm637_vm3  ;;  %vm721_vm5 = vcmp.eq.s32.totalorder %v381_v19, 4 }
  0xb9   : > { %v1006_v32 = vsel %vm638_vm4, 1.0, %v1124_v4  ;;  %vm723_vm7 = vmor %vm721_vm5, %vm722_vm6 }
  0xba   : > { %v1010_v35 = vsel %vm723_vm7, 1.0, %v1124_v4 }
 0x18a   : > { %v374_v21 = vpop.f32.mrb[0].mxu0 }
 0x18b   : > { %v1043_v23 = vpop.f32.mrb[1].mxu0  ;;  %v396_v25 = vmul.f32 %v996_v20, %v374_v21  ;;  %v388_v28 = vmul.f32 %v995_v22, %v374_v21  ;;  %v558_v31 = vmul.f32 %v1002_v29, %v374_v21  ;;  %v643_v34 = vmul.f32 %v1006_v32, %v374_v21 }
 0x18c   : > { %v377_v24 = vpop.f32.mrb[2].mxu0  ;;  %v728_v37 = vmul.f32 %v1010_v35, %v374_v21 }
 0x18d   : > { %v1044_v27 = vpop.f32.mrb[3].mxu0  ;;  %1046 = vmatpush3.msk.msra.mxu1 %vm401_vm12, %v396_v25 }
 0x18e   : > { %1048 = vmatmul.mubr.msk.f32.vlgmr.msra.gmra.mrb[0].mxu1 %vm397_vm13, %v997_v26  ;;  %1050 = vmatprep.subr.mxu1 %v1124_v4 }
 0x18f   : > { %1051 = vmatpush3.msk.msra.mxu1 %vm401_vm12, %v388_v28  ;;  %1052 = vmatprep.mubr.msk.f32.mxu1 %vm1125_vm1, %v1124_v4 }
 0x190   : > { %1055 = vmatprep.subr.mxu1 %v1124_v4 }
 0x196   : > { %1053 = vmatmul.mubr.msk.f32.vlgmr.msra.gmra.mrb[0].mxu1 %vm397_vm13, %v387_v30 }
 0x197   : > { %1056 = vmatpush3.msk.msra.mxu1 %vm401_vm12, %v558_v31  ;;  %1057 = vmatprep.mubr.msk.f32.mxu1 %vm1125_vm1, %v1124_v4 }
 0x198   : > { %1060 = vmatprep.subr.mxu1 %v1124_v4 }
 0x19e   : > { %1058 = vmatmul.mubr.msk.f32.vlgmr.msra.gmra.mrb[0].mxu1 %vm397_vm13, %v1003_v33 }
 0x19f   : > { %1061 = vmatpush3.msk.msra.mxu1 %vm401_vm12, %v643_v34  ;;  %1062 = vmatprep.mubr.msk.f32.mxu1 %vm1125_vm1, %v1124_v4 }
 0x1a0   : > { %1065 = vmatprep.subr.mxu1 %v1124_v4 }
 0x1a6   : > { %1063 = vmatmul.mubr.msk.f32.vlgmr.msra.gmra.mrb[0].mxu1 %vm397_vm13, %v1007_v36 }
 0x1a7   : > { %1066 = vmatpush3.msk.msra.mxu1 %vm401_vm12, %v728_v37  ;;  %1067 = vmatprep.mubr.msk.f32.mxu1 %vm1125_vm1, %v1124_v4  ;;  %vm912_vm1 = vcmask 3072  }
 0x1ae   : > { %1068 = vmatmul.mubr.msk.f32.vlgmr.msra.gmra.mrb[0].mxu1 %vm397_vm13, %v1011_v38 }
 0x281   : > { %v801_v39 = vpop.f32.mrb[0].mxu1 }
 0x282   : > { %v1069_v40 = vpop.f32.mrb[1].mxu1  ;;  %1075 = vmatmul.mubr.msk.f32.vlgmr.msra.gmra.mrb[4].mxu0 %vm815_vm8, %v801_v39 }
 0x355   : > { %v889_v42 = vpop.f32.mrb[4].mxu0 }
 0x356   : > { %v890_v43 = vadd.f32 %v1014_v41, %v889_v42  ;;  %v1076_v44 = vpop.f32.mrb[5].mxu0 }
 0x358   : > { %v1017_v45 = vmul.f32 -1.442695, %v890_v43 }
 0x35a   : > { %1106 = vpow2.f32 %v1017_v45 }
 0x364   : > { %v1107_v46 = vpop.eup %1106 }
 0x365   : > { %v896_v47 = vadd.f32 1.0, %v1107_v46 }
 0x367   : > { %1108 = vrcp.f32 %v896_v47 }
 0x371   : > { %v1109_v48 = vpop.eup %1108 }
 0x372   : > { %900 = vrot.lane.b32.xlu0 %v1109_v48, %s1128_s13 }
 0x3e4   : > { %v901_v49 = vpop.permute.xlu0 %900 }
 0x3e5   : > { %v903_v50 = vmul.f32 %v901_v49, %v890_v43 }
 0x3e7   : > { %v1018_v51 = vmul.f32 -1.442695, %v903_v50 }
 0x3e9   : > { %1110 = vpow2.f32 %v1018_v51 }
 0x3f3   : > { %v1111_v52 = vpop.eup %1110 }
 0x3f4   : > { %v907_v53 = vadd.f32 1.0, %v1111_v52 }
 0x3f6   : > { %1112 = vrcp.f32 %v907_v53 }
 0x400   : > { %v1113_v54 = vpop.eup %1112 }
 0x401   : > { %v910_v55 = vmul.f32 %v1113_v54, %v903_v50 }
 0x403   : > { %v911_v56 = vmul.f32 %v910_v55, %v910_v55 }
 0x405   : > { %v913_v57 = vsel %vm912_vm1, %v911_v56, 0.0 }
 0x406   : > { %v914_v58 = vrot.slane %v913_v57, 4 }
 0x408   : > { %v915_v59 = vadd.f32 %v914_v58, %v913_v57 }
 0x40a   : > { %v916_v60 = vrot.slane %v915_v59, 2 }
 0x40c   : > { %v917_v61 = vadd.f32 %v916_v60, %v915_v59 }
 0x40e   : > { %v918_v62 = vrot.slane %v917_v61, 1 }
 0x410   : > { %v919_v63 = vadd.f32 %v918_v62, %v917_v61 }
 0x412   : > { %v921_v0 = vmul.f32 0.25, %v919_v63 }
 0x414   : > { %v922_v1 = vadd.f32 1e-05, %v921_v0 }
 0x416   : > { %1114 = vrsqrt.f32 %v922_v1 }
 0x420   : > { %v1115_v2 = vpop.eup %1114 }
 0x421   : > { %v924_v4 = vmul.f32 %v1115_v2, %v910_v55 }
 0x423   : > { %v926_v6 = vmul.f32 %v925_v3, %v924_v4 }
 0x425   : > { %v928_v7 = vmul.f32 %v927_v5, %v926_v6 }
 0x427   : > { %v929_v8 = vsel %vm912_vm1, %v928_v7, 0.0 }
 0x428   : > { %v930_v9 = vrot.slane %v929_v8, 4 }
 0x42a   : > { %v931_v10 = vadd.f32 %v930_v9, %v929_v8 }
 0x42c   : > { %v932_v11 = vrot.slane %v931_v10, 2 }
 0x42e   : > { %v933_v12 = vadd.f32 %v932_v11, %v931_v10 }
 0x430   : > { %v934_v13 = vrot.slane %v933_v12, 1 }
 0x432   : > { %v935_v14 = vadd.f32 %v934_v13, %v933_v12 }
 0x434   : > { %937 = vst.msk [vmem:[%s298_s20] sm:$0x1] %vm936_vm9, %v935_v14 }
 0x435 PF: > { %s18_s27 = sadd.s32 1, %s1122_s27  }
 0x436   : > { %p15_p4 = scmp.ge.s32.totalorder %s18_s27, 4  }
 0x438   :  { %17 = sbr.rel (!%p15_p4) target bundleno = 1 (0x1), region = 86 }

</bundles_post_ra>
